<compile_context>
chip_gen: v7x
topology: tpu7x:2x2x1
jax: 0.10.0
libtpu: 0.0.40
codegen_flags: <defaults>
</compile_context>

<pallas_src>
import numpy as np
import jax
import jax.numpy as jnp
from jax.experimental import pallas as pl
from jax.experimental.pallas import tpu as pltpu

HM_INS = 4    # hm_ins in the reference
HM_OUTS = 4   # hm_outs in the reference
D = 8         # per-input-stream feature dim (cols of model[0]['vr_i'])
H0 = 16       # layer-0 hidden size (len(model[0]['vr_0']))
H1 = 16       # layer-1 hidden size (len(model[1]['vr']))
H2 = 16       # layer-2 hidden size (len(model[-1]['vr_0']))
O = 8         # per-output-stream dim (rows of model[-1]['wo_i'])
T = 6         # sequence length

S0 = HM_INS * H0     # 64  — layer-0 state, streams concatenated along lanes
S2 = HM_OUTS * H2    # 64  — layer-2 state, streams concatenated along lanes
XDIM = HM_INS * D    # 32  — flattened per-step input
IN2 = H1 + S0 + S2 + S2   # 208 — [state1 | new0 | oc | c2] fused layer-2 input
NOUT = HM_OUTS * O   # 32

# ---- weight-slab row layout (single [SLAB_ROWS, SLAB_COLS] f32 input) ------
R_V0 = 0                  # [32, 192]  layer-0 vr/va/vs (block-diag, w0-scaled)
R_U0 = R_V0 + XDIM        # [64, 192]  layer-0 ur/ua (w0-scaled) + c0f replication
R_W1 = R_U0 + S0          # [64, 48]   layer-1 vr/va/vs (stream-sum folded, w1-scaled)
R_W2 = R_W1 + S0          # [208, 256] layer-2 fused [state1|new0|oc|c2] -> 4 gates
R_WO = R_W2 + IN2         # [64, 32]   layer-2 wo (block-diag)
R_VEC = R_WO + S2         # 15 rows of small per-gate vectors / biases
N_VEC = 15
SLAB_ROWS = 448           # R_VEC + N_VEC = 447, padded to a multiple of 8
SLAB_COLS = 256


def _mm(a, b):
    return jnp.dot(a, b, preferred_element_type=jnp.float32)


# ---------------------------------------------------------------------------
# Kernel: whole T-step recurrence, one grid point, 2 inputs, 1 output.
# ---------------------------------------------------------------------------
def rnn_kernel(x_ref, w_ref, out_ref):
    def sig(v):                       # sigmoid via tanh: 1 EUP op instead of exp+div
        return 0.5 * jnp.tanh(0.5 * v) + 0.5

    tanh = jnp.tanh
    RV = R_VEC

    # --- only the tiny per-gate vectors are hoisted (≈8 half-vregs live) ----
    b0r = w_ref[RV + 0:RV + 1, 0:S0]
    b0a = w_ref[RV + 1:RV + 2, 0:S0]
    b0s = w_ref[RV + 2:RV + 3, 0:S0]
    w0s = w_ref[RV + 3:RV + 4, 0:S0]
    b2r = w_ref[RV + 4:RV + 5, 0:S2]
    b2f = w_ref[RV + 5:RV + 6, 0:S2]
    b2a = w_ref[RV + 6:RV + 7, 0:S2]
    b2s = w_ref[RV + 7:RV + 8, 0:S2]
    bo = w_ref[RV + 8:RV + 9, 0:NOUT]
    wu1r = w_ref[RV + 9:RV + 10, 0:H1]
    wu1a = w_ref[RV + 10:RV + 11, 0:H1]
    w1s = w_ref[RV + 11:RV + 12, 0:H1]
    b1r = w_ref[RV + 12:RV + 13, 0:H1]
    b1a = w_ref[RV + 13:RV + 14, 0:H1]
    b1s = w_ref[RV + 14:RV + 15, 0:H1]

    # --- input projection hoisted across time (no recurrent dependence) -----
    XV0 = _mm(x_ref[...], w_ref[R_V0:R_V0 + XDIM, 0:3 * S0])     # [T, 192]

    # init_states / init_outstates: all-zero contexts (lane-major)
    c0 = jnp.zeros((1, S0), jnp.float32)
    c1 = jnp.zeros((1, H1), jnp.float32)
    c2 = jnp.zeros((1, S2), jnp.float32)
    oc = jnp.zeros((1, S2), jnp.float32)

    for t in range(T):   # T=6, fully unrolled; per-step live state is 4 tiny vregs
        xv0 = XV0[t:t + 1, :]                                    # [1, 192]

        # -------- layer 0: 4 gated cells, vectorized over stream blocks -----
        # (w0 folded into matrix columns; c0f replication folded into U0)
        cu0 = _mm(c0, w_ref[R_U0:R_U0 + S0, 0:3 * S0])           # [1, 192]
        r0 = sig(xv0[:, 0:S0] + cu0[:, 0:S0] + b0r)
        a0 = sig(xv0[:, S0:2 * S0] + cu0[:, S0:2 * S0] + b0a)
        s0 = tanh(xv0[:, 2 * S0:3 * S0] + w0s * (a0 * c0) + b0s)
        c0f = cu0[:, 2 * S0:3 * S0]                              # context_t[0][0] replicated
        new0 = r0 * s0 + (1.0 - r0) * c0f                        # [1, 64]

        # -------- layer 1 (stream-sum and w1 folded into the packed matrix) -
        xv1 = _mm(new0, w_ref[R_W1:R_W1 + S0, 0:3 * H1])         # [1, 48]
        r1 = sig(xv1[:, 0:H1] + wu1r * c1 + b1r)
        a1 = sig(xv1[:, H1:2 * H1] + wu1a * c1 + b1a)
        s1 = tanh(xv1[:, 2 * H1:3 * H1] + w1s * (a1 * c1) + b1s)
        state1 = r1 * s1 + (1.0 - r1) * c1                       # [1, 16]

        # -------- layer 2: single fused matmul over [state1|new0|oc|c2] -----
        # (w2, u2 and the Ws matrix all folded into the packed matrix)
        in2 = jnp.concatenate([state1, new0, oc, c2], axis=1)    # [1, 208]
        z2 = _mm(in2, w_ref[R_W2:R_W2 + IN2, 0:4 * S2])          # [1, 256]
        r2 = sig(z2[:, 0:S2] + b2r)
        f2 = sig(z2[:, S2:2 * S2] + b2f)
        a2 = sig(z2[:, 2 * S2:3 * S2] + b2a)
        s2 = tanh(z2[:, 3 * S2:4 * S2] + b2s)
        this2 = r2 * s2 + f2 * c2                                # [1, 64]
        os2 = a2 * tanh(this2)                                   # [1, 64]
        out_t = sig(_mm(os2, w_ref[R_WO:R_WO + S2, 0:NOUT]) + bo)  # [1, 32]

        out_ref[t:t + 1, :] = out_t                              # per-step row store
        c0, c1, c2, oc = new0, state1, this2, os2


# ---------------------------------------------------------------------------
# Host-side glue: one-time numpy weight packing + pallas_call wrapper
# ---------------------------------------------------------------------------
def _bdiag(blocks):
    r = sum(b.shape[0] for b in blocks)
    c = sum(b.shape[1] for b in blocks)
    out = np.zeros((r, c), np.float32)
    i = j = 0
    for b in blocks:
        out[i:i + b.shape[0], j:j + b.shape[1]] = b
        i += b.shape[0]
        j += b.shape[1]
    return out


def pack_params(params):
    """Pack all weights into one MXU-friendly [448, 256] slab (numpy, once)."""
    (v0t, u0t, w0, b0, v1t, u1, w1, b1,
     v2t, wif2t, u2, ua2mt, ws2t, w2, b2, wot, bo) = [
        np.asarray(p, np.float32) for p in params]

    slab = np.zeros((SLAB_ROWS, SLAB_COLS), np.float32)

    w0f = w0.reshape(3, S0)
    b0f = b0.reshape(3, S0)
    w2f = w2.reshape(3, S2)
    b2f = b2.reshape(4, S2)
    u2f = u2.reshape(4, S2)
    bof = bo.reshape(NOUT)

    # --- V0 [32,192]: block-diag over streams, per-gate w0 folded into cols -
    for g in range(3):
        blk = _bdiag([v0t[g, i] for i in range(HM_INS)])          # [32, 64]
        slab[R_V0:R_V0 + XDIM, g * S0:(g + 1) * S0] = blk * w0f[g][None, :]

    # --- U0 [64,192]: ur (w0r-scaled), ua (w0a-scaled), c0f replication -----
    for g in range(2):
        blk = _bdiag([u0t[g, i] for i in range(HM_INS)])          # [64, 64]
        slab[R_U0:R_U0 + S0, g * S0:(g + 1) * S0] = blk * w0f[g][None, :]
    rep = np.zeros((S0, S0), np.float32)
    rep[:H0, :] = np.tile(np.eye(H0, dtype=np.float32), (1, HM_INS))
    slab[R_U0:R_U0 + S0, 2 * S0:3 * S0] = rep

    # --- W1 [64,48]: stream-sum folded (vstack x4), per-gate w1 folded ------
    for g in range(3):
        blk = np.concatenate([v1t[g]] * HM_INS, axis=0)           # [64, 16]
        slab[R_W1:R_W1 + S0, g * H1:(g + 1) * H1] = blk * w1[g][None, :]

    # --- W2big [208,256]: rows = [state1 | new0 | oc | c2], cols = gates ----
    # state1 rows (V2; s gate has Ws folded)
    for g in range(3):
        blk = np.concatenate([v2t[g, j] for j in range(HM_OUTS)], axis=1)   # [16, 64]
        slab[R_W2:R_W2 + H1, g * S2:(g + 1) * S2] = blk * w2f[g][None, :]
    vsws = np.concatenate([v2t[3, j] @ ws2t[j] for j in range(HM_OUTS)], axis=1)
    slab[R_W2:R_W2 + H1, 3 * S2:4 * S2] = vsws
    # new0 rows (wif_r/f/a)
    rn = R_W2 + H1
    for g in range(3):
        blk = _bdiag([wif2t[g, j] for j in range(HM_OUTS)])        # [64, 64]
        slab[rn:rn + S0, g * S2:(g + 1) * S2] = blk * w2f[g][None, :]
    # oc rows (ua2, attention gate only)
    ro = rn + S0
    ua2b = _bdiag([ua2mt[j] for j in range(HM_OUTS)])              # [64, 64]
    slab[ro:ro + S2, 2 * S2:3 * S2] = ua2b * w2f[2][None, :]
    # c2 rows: diag(u2) for r/f/a (w2-scaled), diag(u2_s)@Ws for the s gate
    rc = ro + S2
    for g in range(3):
        slab[rc:rc + S2, g * S2:(g + 1) * S2] = np.diag(u2f[g] * w2f[g])
    usws = _bdiag([u2[3, j][:, None] * ws2t[j] for j in range(HM_OUTS)])
    slab[rc:rc + S2, 3 * S2:4 * S2] = usws

    # --- Wo [64,32] block-diag ----------------------------------------------
    slab[R_WO:R_WO + S2, 0:NOUT] = _bdiag([wot[j] for j in range(HM_OUTS)])

    # --- small per-gate vectors / biases ------------------------------------
    RV = R_VEC
    slab[RV + 0, 0:S0] = b0f[0]
    slab[RV + 1, 0:S0] = b0f[1]
    slab[RV + 2, 0:S0] = b0f[2]
    slab[RV + 3, 0:S0] = w0f[2]
    slab[RV + 4, 0:S2] = b2f[0]
    slab[RV + 5, 0:S2] = b2f[1]
    slab[RV + 6, 0:S2] = b2f[2]
    slab[RV + 7, 0:S2] = b2f[3]
    slab[RV + 8, 0:NOUT] = bof
    slab[RV + 9, 0:H1] = w1[0] * u1[0]
    slab[RV + 10, 0:H1] = w1[1] * u1[1]
    slab[RV + 11, 0:H1] = w1[2]
    slab[RV + 12, 0:H1] = b1[0]
    slab[RV + 13, 0:H1] = b1[1]
    slab[RV + 14, 0:H1] = b1[2]

    return jnp.asarray(slab)


@jax.jit
def run_rnn(x, slab):
    """Run all T timesteps in one grid-less pallas_call (2 inputs, 1 output)."""
    x_flat = x.reshape(T, XDIM).astype(jnp.float32)
    vmem = pl.BlockSpec(memory_space=pltpu.MemorySpace.VMEM)
    out = pl.pallas_call(
        rnn_kernel,
        out_shape=jax.ShapeDtypeStruct((T, NOUT), jnp.float32),
        in_specs=[vmem, vmem],
        out_specs=vmem,
    )(x_flat, slab)
    return out.reshape(T, HM_OUTS, O)


def forward(slab, sequence):
    """Equivalent of TorchModel.forward(inp).

    Runs the full recurrence with the Pallas kernel and returns
    (literal_result, per_step_outputs).  `literal_result` mirrors the
    reference exactly: forward_prop keeps only outputs[-1] and then does
    `del outputs[0]`, so it is an empty list."""
    per_step = run_rnn(sequence, slab)                  # [T, HM_OUTS, O]
    outputs = [[per_step[-1, j] for j in range(HM_OUTS)]]
    del outputs[0]                                      # as in forward_prop
    return outputs, per_step


# ---------------------------------------------------------------------------
# Natural (unpacked) parameters + pure-JAX reference for validation
# ---------------------------------------------------------------------------
def init_params(key):
    """Deterministic synthetic weights with the shapes implied by the module."""
    ks = jax.random.split(key, 17)

    def n(k, shape, scale=0.3):
        return (scale * jax.random.normal(k, shape)).astype(jnp.float32)

    v0t = n(ks[0], (3, HM_INS, D, H0))       # layer-0 vr/va/vs (transposed)
    u0t = n(ks[1], (2, HM_INS, H0, H0))      # layer-0 ur/ua     (transposed)
    w0 = n(ks[2], (3, HM_INS, H0))           # layer-0 wr/wa/ws
    b0 = n(ks[3], (3, HM_INS, H0))           # layer-0 br/ba/bs
    v1t = n(ks[4], (3, H0, H1))              # layer-1 vr/va/vs  (transposed)
    u1 = n(ks[5], (2, H1))                   # layer-1 ur/ua
    w1 = n(ks[6], (3, H1))                   # layer-1 wr/wa/ws
    b1 = n(ks[7], (3, H1))                   # layer-1 br/ba/bs
    v2t = n(ks[8], (4, HM_OUTS, H1, H2))     # layer-2 vr/vf/va/vs (transposed)
    wif2t = n(ks[9], (3, HM_OUTS, H0, H2))   # layer-2 wif_r/f/a   (transposed)
    u2 = n(ks[10], (4, HM_OUTS, H2))         # layer-2 ur/uf/ua/us
    ua2mt = n(ks[11], (HM_OUTS, H2, H2))     # layer-2 ua2         (transposed)
    ws2t = n(ks[12], (HM_OUTS, H2, H2))      # layer-2 ws          (transposed)
    w2 = n(ks[13], (3, HM_OUTS, H2))         # layer-2 wr/wf/wa
    b2 = n(ks[14], (4, HM_OUTS, H2))         # layer-2 br/bf/ba/bs
    wot = n(ks[15], (HM_OUTS, H2, O))        # layer-2 wo          (transposed)
    bo = n(ks[16], (HM_OUTS, O))             # layer-2 bo
    return (v0t, u0t, w0, b0, v1t, u1, w1, b1,
            v2t, wif2t, u2, ua2mt, ws2t, w2, b2, wot, bo)


def ref_forward(x, params):
    """Pure-JAX reference of prop_func unrolled over T (for validation)."""
    (v0t, u0t, w0, b0, v1t, u1, w1, b1,
     v2t, wif2t, u2, ua2mt, ws2t, w2, b2, wot, bo) = params
    sig, tanh = jax.nn.sigmoid, jnp.tanh
    c0 = jnp.zeros((HM_INS, H0), jnp.float32)
    c1 = jnp.zeros((1, H1), jnp.float32)
    c2 = jnp.zeros((HM_OUTS, H2), jnp.float32)
    oc = jnp.zeros((HM_OUTS, H2), jnp.float32)
    outs_all = []
    for t in range(T):
        xt = x[t]
        c0f = c0[0:1]
        new0 = []
        for i in range(HM_INS):
            xi, ci = xt[i:i + 1], c0[i:i + 1]
            r = sig(w0[0, i:i + 1] * (xi @ v0t[0, i] + ci @ u0t[0, i]) + b0[0, i:i + 1])
            a = sig(w0[1, i:i + 1] * (xi @ v0t[1, i] + ci @ u0t[1, i]) + b0[1, i:i + 1])
            s = tanh(w0[2, i:i + 1] * (xi @ v0t[2, i] + a * ci) + b0[2, i:i + 1])
            new0.append(r * s + (1 - r) * c0f)
        prev = sum(new0)
        r1 = sig(w1[0:1] * (prev @ v1t[0] + u1[0:1] * c1) + b1[0:1])
        a1 = sig(w1[1:2] * (prev @ v1t[1] + u1[1:2] * c1) + b1[1:2])
        s1 = tanh(w1[2:3] * (prev @ v1t[2] + a1 * c1) + b1[2:3])
        state1 = r1 * s1 + (1 - r1) * c1
        new2, newoc, outs = [], [], []
        for j in range(HM_OUTS):
            cj, ocj, s0j = c2[j:j + 1], oc[j:j + 1], new0[j]
            r = sig(w2[0, j:j + 1] * (state1 @ v2t[0, j] + u2[0, j:j + 1] * cj
                                      + s0j @ wif2t[0, j]) + b2[0, j:j + 1])
            f = sig(w2[1, j:j + 1] * (state1 @ v2t[1, j] + u2[1, j:j + 1] * cj
                                      + s0j @ wif2t[1, j]) + b2[1, j:j + 1])
            a = sig(w2[2, j:j + 1] * (state1 @ v2t[2, j] + u2[2, j:j + 1] * cj
                                      + ocj @ ua2mt[j] + s0j @ wif2t[2, j]) + b2[2, j:j + 1])
            s = tanh((state1 @ v2t[3, j] + u2[3, j:j + 1] * cj) @ ws2t[j] + b2[3, j:j + 1])
            ts_ = r * s + f * cj
            new2.append(ts_)
            osj = a * tanh(ts_)
            newoc.append(osj)
            outs.append(sig(osj @ wot[j] + bo[j:j + 1]))
        c0 = jnp.concatenate(new0, 0)
        c1 = state1
        c2 = jnp.concatenate(new2, 0)
        oc = jnp.concatenate(newoc, 0)
        outs_all.append(jnp.concatenate(outs, 0))
    return jnp.stack(outs_all, 0)


if __name__ == "__main__":
    key = jax.random.PRNGKey(0)
    kx, kp = jax.random.split(key)
    # sequence = (vocab_seq, oct_seq, dur_seq, vol_seq), packed as [T, 4, D]
    x = (0.5 * jax.random.normal(kx, (T, HM_INS, D))).astype(jnp.float32)
    params = init_params(kp)

    slab = pack_params(params)        # one-time host-side (numpy) packing

    literal_result, per_step = forward(slab, x)
    per_step = jax.block_until_ready(per_step)

    ref = ref_forward(x, params)
    max_err = float(jnp.max(jnp.abs(per_step - ref)))
    if not jnp.allclose(per_step, ref, atol=3e-5, rtol=3e-5):
        raise AssertionError(
            f"Pallas kernel mismatch vs pure-JAX reference (max err {max_err:.3e})")
    assert literal_result == []  # literal forward_prop(...) returns []
    print("KERNEL_OK")
</pallas_src>

<mosaic_0001>
module attributes {stable_mosaic.version = 11 : i64} {
  func.func @rnn_kernel(%arg0: memref<6x32xf32, #tpu.memory_space<vmem>>, %arg1: memref<448x256xf32, #tpu.memory_space<vmem>>, %arg2: memref<6x32xf32, #tpu.memory_space<vmem>>) attributes {dimension_semantics = [], scalar_prefetch = 0 : i64, scratch_operands = 0 : i64, tpu.core_type = #tpu.core_type<tc>} {
    %c432 = arith.constant 432 : index
    %c0 = arith.constant 0 : index
    %0 = vector.load %arg1[%c432, %c0] : memref<448x256xf32, #tpu.memory_space<vmem>>, vector<1x64xf32>
    %c433 = arith.constant 433 : index
    %c0_0 = arith.constant 0 : index
    %1 = vector.load %arg1[%c433, %c0_0] : memref<448x256xf32, #tpu.memory_space<vmem>>, vector<1x64xf32>
    %c434 = arith.constant 434 : index
    %c0_1 = arith.constant 0 : index
    %2 = vector.load %arg1[%c434, %c0_1] : memref<448x256xf32, #tpu.memory_space<vmem>>, vector<1x64xf32>
    %c435 = arith.constant 435 : index
    %c0_2 = arith.constant 0 : index
    %3 = vector.load %arg1[%c435, %c0_2] : memref<448x256xf32, #tpu.memory_space<vmem>>, vector<1x64xf32>
    %c436 = arith.constant 436 : index
    %c0_3 = arith.constant 0 : index
    %4 = vector.load %arg1[%c436, %c0_3] : memref<448x256xf32, #tpu.memory_space<vmem>>, vector<1x64xf32>
    %c437 = arith.constant 437 : index
    %c0_4 = arith.constant 0 : index
    %5 = vector.load %arg1[%c437, %c0_4] : memref<448x256xf32, #tpu.memory_space<vmem>>, vector<1x64xf32>
    %c438 = arith.constant 438 : index
    %c0_5 = arith.constant 0 : index
    %6 = vector.load %arg1[%c438, %c0_5] : memref<448x256xf32, #tpu.memory_space<vmem>>, vector<1x64xf32>
    %c439 = arith.constant 439 : index
    %c0_6 = arith.constant 0 : index
    %7 = vector.load %arg1[%c439, %c0_6] : memref<448x256xf32, #tpu.memory_space<vmem>>, vector<1x64xf32>
    %c440 = arith.constant 440 : index
    %c0_7 = arith.constant 0 : index
    %8 = vector.load %arg1[%c440, %c0_7] : memref<448x256xf32, #tpu.memory_space<vmem>>, vector<1x32xf32>
    %c441 = arith.constant 441 : index
    %c0_8 = arith.constant 0 : index
    %9 = vector.load %arg1[%c441, %c0_8] : memref<448x256xf32, #tpu.memory_space<vmem>>, vector<1x16xf32>
    %c442 = arith.constant 442 : index
    %c0_9 = arith.constant 0 : index
    %10 = vector.load %arg1[%c442, %c0_9] : memref<448x256xf32, #tpu.memory_space<vmem>>, vector<1x16xf32>
    %c443 = arith.constant 443 : index
    %c0_10 = arith.constant 0 : index
    %11 = vector.load %arg1[%c443, %c0_10] : memref<448x256xf32, #tpu.memory_space<vmem>>, vector<1x16xf32>
    %c444 = arith.constant 444 : index
    %c0_11 = arith.constant 0 : index
    %12 = vector.load %arg1[%c444, %c0_11] : memref<448x256xf32, #tpu.memory_space<vmem>>, vector<1x16xf32>
    %c445 = arith.constant 445 : index
    %c0_12 = arith.constant 0 : index
    %13 = vector.load %arg1[%c445, %c0_12] : memref<448x256xf32, #tpu.memory_space<vmem>>, vector<1x16xf32>
    %c446 = arith.constant 446 : index
    %c0_13 = arith.constant 0 : index
    %14 = vector.load %arg1[%c446, %c0_13] : memref<448x256xf32, #tpu.memory_space<vmem>>, vector<1x16xf32>
    %c0_14 = arith.constant 0 : index
    %c0_15 = arith.constant 0 : index
    %15 = vector.load %arg0[%c0_14, %c0_15] : memref<6x32xf32, #tpu.memory_space<vmem>>, vector<6x32xf32>
    %c0_16 = arith.constant 0 : index
    %c0_17 = arith.constant 0 : index
    %16 = vector.load %arg1[%c0_16, %c0_17] : memref<448x256xf32, #tpu.memory_space<vmem>>, vector<32x192xf32>
    %cst = arith.constant dense<0.000000e+00> : vector<6x192xf32>
    %17 = tpu.matmul %15, %16, %cst {dimension_numbers = #tpu.dot_dimension_numbers<[1], [0], [0], [1], [0, 0, 1, 1], [], []>} : vector<6x32xf32>, vector<32x192xf32>, vector<6x192xf32> -> vector<6x192xf32>
    %cst_18 = arith.constant 0.000000e+00 : f32
    %18 = vector.broadcast %cst_18 : f32 to vector<1x64xf32>
    %cst_19 = arith.constant 0.000000e+00 : f32
    %19 = vector.broadcast %cst_19 : f32 to vector<1x16xf32>
    %cst_20 = arith.constant 0.000000e+00 : f32
    %20 = vector.broadcast %cst_20 : f32 to vector<1x64xf32>
    %cst_21 = arith.constant 0.000000e+00 : f32
    %21 = vector.broadcast %cst_21 : f32 to vector<1x64xf32>
    %22 = vector.extract_strided_slice %17 {offsets = [0, 0], sizes = [1, 192], strides = [1, 1]} : vector<6x192xf32> to vector<1x192xf32>
    %c32 = arith.constant 32 : index
    %c0_22 = arith.constant 0 : index
    %23 = vector.load %arg1[%c32, %c0_22] : memref<448x256xf32, #tpu.memory_space<vmem>>, vector<64x192xf32>
    %cst_23 = arith.constant dense<0.000000e+00> : vector<1x192xf32>
    %24 = tpu.matmul %18, %23, %cst_23 {dimension_numbers = #tpu.dot_dimension_numbers<[1], [0], [0], [1], [0, 0, 1, 1], [], []>} : vector<1x64xf32>, vector<64x192xf32>, vector<1x192xf32> -> vector<1x192xf32>
    %25 = vector.extract_strided_slice %22 {offsets = [0, 0], sizes = [1, 64], strides = [1, 1]} : vector<1x192xf32> to vector<1x64xf32>
    %26 = vector.extract_strided_slice %24 {offsets = [0, 0], sizes = [1, 64], strides = [1, 1]} : vector<1x192xf32> to vector<1x64xf32>
    %27 = arith.addf %25, %26 : vector<1x64xf32>
    %28 = arith.addf %27, %0 : vector<1x64xf32>
    %cst_24 = arith.constant 5.000000e-01 : f32
    %29 = vector.broadcast %cst_24 : f32 to vector<1x64xf32>
    %30 = arith.mulf %29, %28 : vector<1x64xf32>
    %31 = math.tanh %30 : vector<1x64xf32>
    %cst_25 = arith.constant 5.000000e-01 : f32
    %32 = vector.broadcast %cst_25 : f32 to vector<1x64xf32>
    %33 = arith.mulf %32, %31 : vector<1x64xf32>
    %cst_26 = arith.constant 5.000000e-01 : f32
    %34 = vector.broadcast %cst_26 : f32 to vector<1x64xf32>
    %35 = arith.addf %33, %34 : vector<1x64xf32>
    %36 = vector.extract_strided_slice %22 {offsets = [0, 64], sizes = [1, 64], strides = [1, 1]} : vector<1x192xf32> to vector<1x64xf32>
    %37 = vector.extract_strided_slice %24 {offsets = [0, 64], sizes = [1, 64], strides = [1, 1]} : vector<1x192xf32> to vector<1x64xf32>
    %38 = arith.addf %36, %37 : vector<1x64xf32>
    %39 = arith.addf %38, %1 : vector<1x64xf32>
    %cst_27 = arith.constant 5.000000e-01 : f32
    %40 = vector.broadcast %cst_27 : f32 to vector<1x64xf32>
    %41 = arith.mulf %40, %39 : vector<1x64xf32>
    %42 = math.tanh %41 : vector<1x64xf32>
    %cst_28 = arith.constant 5.000000e-01 : f32
    %43 = vector.broadcast %cst_28 : f32 to vector<1x64xf32>
    %44 = arith.mulf %43, %42 : vector<1x64xf32>
    %cst_29 = arith.constant 5.000000e-01 : f32
    %45 = vector.broadcast %cst_29 : f32 to vector<1x64xf32>
    %46 = arith.addf %44, %45 : vector<1x64xf32>
    %47 = vector.extract_strided_slice %22 {offsets = [0, 128], sizes = [1, 64], strides = [1, 1]} : vector<1x192xf32> to vector<1x64xf32>
    %48 = arith.mulf %46, %18 : vector<1x64xf32>
    %49 = arith.mulf %3, %48 : vector<1x64xf32>
    %50 = arith.addf %47, %49 : vector<1x64xf32>
    %51 = arith.addf %50, %2 : vector<1x64xf32>
    %52 = math.tanh %51 : vector<1x64xf32>
    %53 = vector.extract_strided_slice %24 {offsets = [0, 128], sizes = [1, 64], strides = [1, 1]} : vector<1x192xf32> to vector<1x64xf32>
    %54 = arith.mulf %35, %52 : vector<1x64xf32>
    %cst_30 = arith.constant 1.000000e+00 : f32
    %55 = vector.broadcast %cst_30 : f32 to vector<1x64xf32>
    %56 = arith.subf %55, %35 : vector<1x64xf32>
    %57 = arith.mulf %56, %53 : vector<1x64xf32>
    %58 = arith.addf %54, %57 : vector<1x64xf32>
    %c96 = arith.constant 96 : index
    %c0_31 = arith.constant 0 : index
    %59 = vector.load %arg1[%c96, %c0_31] : memref<448x256xf32, #tpu.memory_space<vmem>>, vector<64x48xf32>
    %cst_32 = arith.constant dense<0.000000e+00> : vector<1x48xf32>
    %60 = tpu.matmul %58, %59, %cst_32 {dimension_numbers = #tpu.dot_dimension_numbers<[1], [0], [0], [1], [0, 0, 1, 1], [], []>} : vector<1x64xf32>, vector<64x48xf32>, vector<1x48xf32> -> vector<1x48xf32>
    %61 = vector.extract_strided_slice %60 {offsets = [0, 0], sizes = [1, 16], strides = [1, 1]} : vector<1x48xf32> to vector<1x16xf32>
    %62 = arith.mulf %9, %19 : vector<1x16xf32>
    %63 = arith.addf %61, %62 : vector<1x16xf32>
    %64 = arith.addf %63, %12 : vector<1x16xf32>
    %cst_33 = arith.constant 5.000000e-01 : f32
    %65 = vector.broadcast %cst_33 : f32 to vector<1x16xf32>
    %66 = arith.mulf %65, %64 : vector<1x16xf32>
    %67 = math.tanh %66 : vector<1x16xf32>
    %cst_34 = arith.constant 5.000000e-01 : f32
    %68 = vector.broadcast %cst_34 : f32 to vector<1x16xf32>
    %69 = arith.mulf %68, %67 : vector<1x16xf32>
    %cst_35 = arith.constant 5.000000e-01 : f32
    %70 = vector.broadcast %cst_35 : f32 to vector<1x16xf32>
    %71 = arith.addf %69, %70 : vector<1x16xf32>
    %72 = vector.extract_strided_slice %60 {offsets = [0, 16], sizes = [1, 16], strides = [1, 1]} : vector<1x48xf32> to vector<1x16xf32>
    %73 = arith.mulf %10, %19 : vector<1x16xf32>
    %74 = arith.addf %72, %73 : vector<1x16xf32>
    %75 = arith.addf %74, %13 : vector<1x16xf32>
    %cst_36 = arith.constant 5.000000e-01 : f32
    %76 = vector.broadcast %cst_36 : f32 to vector<1x16xf32>
    %77 = arith.mulf %76, %75 : vector<1x16xf32>
    %78 = math.tanh %77 : vector<1x16xf32>
    %cst_37 = arith.constant 5.000000e-01 : f32
    %79 = vector.broadcast %cst_37 : f32 to vector<1x16xf32>
    %80 = arith.mulf %79, %78 : vector<1x16xf32>
    %cst_38 = arith.constant 5.000000e-01 : f32
    %81 = vector.broadcast %cst_38 : f32 to vector<1x16xf32>
    %82 = arith.addf %80, %81 : vector<1x16xf32>
    %83 = vector.extract_strided_slice %60 {offsets = [0, 32], sizes = [1, 16], strides = [1, 1]} : vector<1x48xf32> to vector<1x16xf32>
    %84 = arith.mulf %82, %19 : vector<1x16xf32>
    %85 = arith.mulf %11, %84 : vector<1x16xf32>
    %86 = arith.addf %83, %85 : vector<1x16xf32>
    %87 = arith.addf %86, %14 : vector<1x16xf32>
    %88 = math.tanh %87 : vector<1x16xf32>
    %89 = arith.mulf %71, %88 : vector<1x16xf32>
    %cst_39 = arith.constant 1.000000e+00 : f32
    %90 = vector.broadcast %cst_39 : f32 to vector<1x16xf32>
    %91 = arith.subf %90, %71 : vector<1x16xf32>
    %92 = arith.mulf %91, %19 : vector<1x16xf32>
    %93 = arith.addf %89, %92 : vector<1x16xf32>
    %94 = tpu.concatenate %93, %58, %21, %20 in 1 : vector<1x16xf32>, vector<1x64xf32>, vector<1x64xf32>, vector<1x64xf32> -> vector<1x208xf32>
    %c160 = arith.constant 160 : index
    %c0_40 = arith.constant 0 : index
    %95 = vector.load %arg1[%c160, %c0_40] : memref<448x256xf32, #tpu.memory_space<vmem>>, vector<208x256xf32>
    %cst_41 = arith.constant dense<0.000000e+00> : vector<1x256xf32>
    %96 = tpu.matmul %94, %95, %cst_41 {dimension_numbers = #tpu.dot_dimension_numbers<[1], [0], [0], [1], [0, 0, 1, 1], [], []>} : vector<1x208xf32>, vector<208x256xf32>, vector<1x256xf32> -> vector<1x256xf32>
    %97 = vector.extract_strided_slice %96 {offsets = [0, 0], sizes = [1, 64], strides = [1, 1]} : vector<1x256xf32> to vector<1x64xf32>
    %98 = arith.addf %97, %4 : vector<1x64xf32>
    %cst_42 = arith.constant 5.000000e-01 : f32
    %99 = vector.broadcast %cst_42 : f32 to vector<1x64xf32>
    %100 = arith.mulf %99, %98 : vector<1x64xf32>
    %101 = math.tanh %100 : vector<1x64xf32>
    %cst_43 = arith.constant 5.000000e-01 : f32
    %102 = vector.broadcast %cst_43 : f32 to vector<1x64xf32>
    %103 = arith.mulf %102, %101 : vector<1x64xf32>
    %cst_44 = arith.constant 5.000000e-01 : f32
    %104 = vector.broadcast %cst_44 : f32 to vector<1x64xf32>
    %105 = arith.addf %103, %104 : vector<1x64xf32>
    %106 = vector.extract_strided_slice %96 {offsets = [0, 64], sizes = [1, 64], strides = [1, 1]} : vector<1x256xf32> to vector<1x64xf32>
    %107 = arith.addf %106, %5 : vector<1x64xf32>
    %cst_45 = arith.constant 5.000000e-01 : f32
    %108 = vector.broadcast %cst_45 : f32 to vector<1x64xf32>
    %109 = arith.mulf %108, %107 : vector<1x64xf32>
    %110 = math.tanh %109 : vector<1x64xf32>
    %cst_46 = arith.constant 5.000000e-01 : f32
    %111 = vector.broadcast %cst_46 : f32 to vector<1x64xf32>
    %112 = arith.mulf %111, %110 : vector<1x64xf32>
    %cst_47 = arith.constant 5.000000e-01 : f32
    %113 = vector.broadcast %cst_47 : f32 to vector<1x64xf32>
    %114 = arith.addf %112, %113 : vector<1x64xf32>
    %115 = vector.extract_strided_slice %96 {offsets = [0, 128], sizes = [1, 64], strides = [1, 1]} : vector<1x256xf32> to vector<1x64xf32>
    %116 = arith.addf %115, %6 : vector<1x64xf32>
    %cst_48 = arith.constant 5.000000e-01 : f32
    %117 = vector.broadcast %cst_48 : f32 to vector<1x64xf32>
    %118 = arith.mulf %117, %116 : vector<1x64xf32>
    %119 = math.tanh %118 : vector<1x64xf32>
    %cst_49 = arith.constant 5.000000e-01 : f32
    %120 = vector.broadcast %cst_49 : f32 to vector<1x64xf32>
    %121 = arith.mulf %120, %119 : vector<1x64xf32>
    %cst_50 = arith.constant 5.000000e-01 : f32
    %122 = vector.broadcast %cst_50 : f32 to vector<1x64xf32>
    %123 = arith.addf %121, %122 : vector<1x64xf32>
    %124 = vector.extract_strided_slice %96 {offsets = [0, 192], sizes = [1, 64], strides = [1, 1]} : vector<1x256xf32> to vector<1x64xf32>
    %125 = arith.addf %124, %7 : vector<1x64xf32>
    %126 = math.tanh %125 : vector<1x64xf32>
    %127 = arith.mulf %105, %126 : vector<1x64xf32>
    %128 = arith.mulf %114, %20 : vector<1x64xf32>
    %129 = arith.addf %127, %128 : vector<1x64xf32>
    %130 = math.tanh %129 : vector<1x64xf32>
    %131 = arith.mulf %123, %130 : vector<1x64xf32>
    %c368 = arith.constant 368 : index
    %c0_51 = arith.constant 0 : index
    %132 = vector.load %arg1[%c368, %c0_51] : memref<448x256xf32, #tpu.memory_space<vmem>>, vector<64x32xf32>
    %cst_52 = arith.constant dense<0.000000e+00> : vector<1x32xf32>
    %133 = tpu.matmul %131, %132, %cst_52 {dimension_numbers = #tpu.dot_dimension_numbers<[1], [0], [0], [1], [0, 0, 1, 1], [], []>} : vector<1x64xf32>, vector<64x32xf32>, vector<1x32xf32> -> vector<1x32xf32>
    %134 = arith.addf %133, %8 : vector<1x32xf32>
    %cst_53 = arith.constant 5.000000e-01 : f32
    %135 = vector.broadcast %cst_53 : f32 to vector<1x32xf32>
    %136 = arith.mulf %135, %134 : vector<1x32xf32>
    %137 = math.tanh %136 : vector<1x32xf32>
    %cst_54 = arith.constant 5.000000e-01 : f32
    %138 = vector.broadcast %cst_54 : f32 to vector<1x32xf32>
    %139 = arith.mulf %138, %137 : vector<1x32xf32>
    %cst_55 = arith.constant 5.000000e-01 : f32
    %140 = vector.broadcast %cst_55 : f32 to vector<1x32xf32>
    %141 = arith.addf %139, %140 : vector<1x32xf32>
    %c0_56 = arith.constant 0 : index
    %c0_57 = arith.constant 0 : index
    %142 = vector.load %arg2[%c0_56, %c0_57] : memref<6x32xf32, #tpu.memory_space<vmem>>, vector<1x32xf32>
    tpu.vector_store %arg2[%c0_56, %c0_57], %141 {strides = array<i32>} : memref<6x32xf32, #tpu.memory_space<vmem>>, vector<1x32xf32>,
    %143 = vector.extract_strided_slice %17 {offsets = [1, 0], sizes = [1, 192], strides = [1, 1]} : vector<6x192xf32> to vector<1x192xf32>
    %c32_58 = arith.constant 32 : index
    %c0_59 = arith.constant 0 : index
    %144 = vector.load %arg1[%c32_58, %c0_59] : memref<448x256xf32, #tpu.memory_space<vmem>>, vector<64x192xf32>
    %cst_60 = arith.constant dense<0.000000e+00> : vector<1x192xf32>
    %145 = tpu.matmul %58, %144, %cst_60 {dimension_numbers = #tpu.dot_dimension_numbers<[1], [0], [0], [1], [0, 0, 1, 1], [], []>} : vector<1x64xf32>, vector<64x192xf32>, vector<1x192xf32> -> vector<1x192xf32>
    %146 = vector.extract_strided_slice %143 {offsets = [0, 0], sizes = [1, 64], strides = [1, 1]} : vector<1x192xf32> to vector<1x64xf32>
    %147 = vector.extract_strided_slice %145 {offsets = [0, 0], sizes = [1, 64], strides = [1, 1]} : vector<1x192xf32> to vector<1x64xf32>
    %148 = arith.addf %146, %147 : vector<1x64xf32>
    %149 = arith.addf %148, %0 : vector<1x64xf32>
    %cst_61 = arith.constant 5.000000e-01 : f32
    %150 = vector.broadcast %cst_61 : f32 to vector<1x64xf32>
    %151 = arith.mulf %150, %149 : vector<1x64xf32>
    %152 = math.tanh %151 : vector<1x64xf32>
    %cst_62 = arith.constant 5.000000e-01 : f32
    %153 = vector.broadcast %cst_62 : f32 to vector<1x64xf32>
    %154 = arith.mulf %153, %152 : vector<1x64xf32>
    %cst_63 = arith.constant 5.000000e-01 : f32
    %155 = vector.broadcast %cst_63 : f32 to vector<1x64xf32>
    %156 = arith.addf %154, %155 : vector<1x64xf32>
    %157 = vector.extract_strided_slice %143 {offsets = [0, 64], sizes = [1, 64], strides = [1, 1]} : vector<1x192xf32> to vector<1x64xf32>
    %158 = vector.extract_strided_slice %145 {offsets = [0, 64], sizes = [1, 64], strides = [1, 1]} : vector<1x192xf32> to vector<1x64xf32>
    %159 = arith.addf %157, %158 : vector<1x64xf32>
    %160 = arith.addf %159, %1 : vector<1x64xf32>
    %cst_64 = arith.constant 5.000000e-01 : f32
    %161 = vector.broadcast %cst_64 : f32 to vector<1x64xf32>
    %162 = arith.mulf %161, %160 : vector<1x64xf32>
    %163 = math.tanh %162 : vector<1x64xf32>
    %cst_65 = arith.constant 5.000000e-01 : f32
    %164 = vector.broadcast %cst_65 : f32 to vector<1x64xf32>
    %165 = arith.mulf %164, %163 : vector<1x64xf32>
    %cst_66 = arith.constant 5.000000e-01 : f32
    %166 = vector.broadcast %cst_66 : f32 to vector<1x64xf32>
    %167 = arith.addf %165, %166 : vector<1x64xf32>
    %168 = vector.extract_strided_slice %143 {offsets = [0, 128], sizes = [1, 64], strides = [1, 1]} : vector<1x192xf32> to vector<1x64xf32>
    %169 = arith.mulf %167, %58 : vector<1x64xf32>
    %170 = arith.mulf %3, %169 : vector<1x64xf32>
    %171 = arith.addf %168, %170 : vector<1x64xf32>
    %172 = arith.addf %171, %2 : vector<1x64xf32>
    %173 = math.tanh %172 : vector<1x64xf32>
    %174 = vector.extract_strided_slice %145 {offsets = [0, 128], sizes = [1, 64], strides = [1, 1]} : vector<1x192xf32> to vector<1x64xf32>
    %175 = arith.mulf %156, %173 : vector<1x64xf32>
    %cst_67 = arith.constant 1.000000e+00 : f32
    %176 = vector.broadcast %cst_67 : f32 to vector<1x64xf32>
    %177 = arith.subf %176, %156 : vector<1x64xf32>
    %178 = arith.mulf %177, %174 : vector<1x64xf32>
    %179 = arith.addf %175, %178 : vector<1x64xf32>
    %c96_68 = arith.constant 96 : index
    %c0_69 = arith.constant 0 : index
    %180 = vector.load %arg1[%c96_68, %c0_69] : memref<448x256xf32, #tpu.memory_space<vmem>>, vector<64x48xf32>
    %cst_70 = arith.constant dense<0.000000e+00> : vector<1x48xf32>
    %181 = tpu.matmul %179, %180, %cst_70 {dimension_numbers = #tpu.dot_dimension_numbers<[1], [0], [0], [1], [0, 0, 1, 1], [], []>} : vector<1x64xf32>, vector<64x48xf32>, vector<1x48xf32> -> vector<1x48xf32>
    %182 = vector.extract_strided_slice %181 {offsets = [0, 0], sizes = [1, 16], strides = [1, 1]} : vector<1x48xf32> to vector<1x16xf32>
    %183 = arith.mulf %9, %93 : vector<1x16xf32>
    %184 = arith.addf %182, %183 : vector<1x16xf32>
    %185 = arith.addf %184, %12 : vector<1x16xf32>
    %cst_71 = arith.constant 5.000000e-01 : f32
    %186 = vector.broadcast %cst_71 : f32 to vector<1x16xf32>
    %187 = arith.mulf %186, %185 : vector<1x16xf32>
    %188 = math.tanh %187 : vector<1x16xf32>
    %cst_72 = arith.constant 5.000000e-01 : f32
    %189 = vector.broadcast %cst_72 : f32 to vector<1x16xf32>
    %190 = arith.mulf %189, %188 : vector<1x16xf32>
    %cst_73 = arith.constant 5.000000e-01 : f32
    %191 = vector.broadcast %cst_73 : f32 to vector<1x16xf32>
    %192 = arith.addf %190, %191 : vector<1x16xf32>
    %193 = vector.extract_strided_slice %181 {offsets = [0, 16], sizes = [1, 16], strides = [1, 1]} : vector<1x48xf32> to vector<1x16xf32>
    %194 = arith.mulf %10, %93 : vector<1x16xf32>
    %195 = arith.addf %193, %194 : vector<1x16xf32>
    %196 = arith.addf %195, %13 : vector<1x16xf32>
    %cst_74 = arith.constant 5.000000e-01 : f32
    %197 = vector.broadcast %cst_74 : f32 to vector<1x16xf32>
    %198 = arith.mulf %197, %196 : vector<1x16xf32>
    %199 = math.tanh %198 : vector<1x16xf32>
    %cst_75 = arith.constant 5.000000e-01 : f32
    %200 = vector.broadcast %cst_75 : f32 to vector<1x16xf32>
    %201 = arith.mulf %200, %199 : vector<1x16xf32>
    %cst_76 = arith.constant 5.000000e-01 : f32
    %202 = vector.broadcast %cst_76 : f32 to vector<1x16xf32>
    %203 = arith.addf %201, %202 : vector<1x16xf32>
    %204 = vector.extract_strided_slice %181 {offsets = [0, 32], sizes = [1, 16], strides = [1, 1]} : vector<1x48xf32> to vector<1x16xf32>
    %205 = arith.mulf %203, %93 : vector<1x16xf32>
    %206 = arith.mulf %11, %205 : vector<1x16xf32>
    %207 = arith.addf %204, %206 : vector<1x16xf32>
    %208 = arith.addf %207, %14 : vector<1x16xf32>
    %209 = math.tanh %208 : vector<1x16xf32>
    %210 = arith.mulf %192, %209 : vector<1x16xf32>
    %cst_77 = arith.constant 1.000000e+00 : f32
    %211 = vector.broadcast %cst_77 : f32 to vector<1x16xf32>
    %212 = arith.subf %211, %192 : vector<1x16xf32>
    %213 = arith.mulf %212, %93 : vector<1x16xf32>
    %214 = arith.addf %210, %213 : vector<1x16xf32>
    %215 = tpu.concatenate %214, %179, %131, %129 in 1 : vector<1x16xf32>, vector<1x64xf32>, vector<1x64xf32>, vector<1x64xf32> -> vector<1x208xf32>
    %c160_78 = arith.constant 160 : index
    %c0_79 = arith.constant 0 : index
    %216 = vector.load %arg1[%c160_78, %c0_79] : memref<448x256xf32, #tpu.memory_space<vmem>>, vector<208x256xf32>
    %cst_80 = arith.constant dense<0.000000e+00> : vector<1x256xf32>
    %217 = tpu.matmul %215, %216, %cst_80 {dimension_numbers = #tpu.dot_dimension_numbers<[1], [0], [0], [1], [0, 0, 1, 1], [], []>} : vector<1x208xf32>, vector<208x256xf32>, vector<1x256xf32> -> vector<1x256xf32>
    %218 = vector.extract_strided_slice %217 {offsets = [0, 0], sizes = [1, 64], strides = [1, 1]} : vector<1x256xf32> to vector<1x64xf32>
    %219 = arith.addf %218, %4 : vector<1x64xf32>
    %cst_81 = arith.constant 5.000000e-01 : f32
    %220 = vector.broadcast %cst_81 : f32 to vector<1x64xf32>
    %221 = arith.mulf %220, %219 : vector<1x64xf32>
    %222 = math.tanh %221 : vector<1x64xf32>
    %cst_82 = arith.constant 5.000000e-01 : f32
    %223 = vector.broadcast %cst_82 : f32 to vector<1x64xf32>
    %224 = arith.mulf %223, %222 : vector<1x64xf32>
    %cst_83 = arith.constant 5.000000e-01 : f32
    %225 = vector.broadcast %cst_83 : f32 to vector<1x64xf32>
    %226 = arith.addf %224, %225 : vector<1x64xf32>
    %227 = vector.extract_strided_slice %217 {offsets = [0, 64], sizes = [1, 64], strides = [1, 1]} : vector<1x256xf32> to vector<1x64xf32>
    %228 = arith.addf %227, %5 : vector<1x64xf32>
    %cst_84 = arith.constant 5.000000e-01 : f32
    %229 = vector.broadcast %cst_84 : f32 to vector<1x64xf32>
    %230 = arith.mulf %229, %228 : vector<1x64xf32>
    %231 = math.tanh %230 : vector<1x64xf32>
    %cst_85 = arith.constant 5.000000e-01 : f32
    %232 = vector.broadcast %cst_85 : f32 to vector<1x64xf32>
    %233 = arith.mulf %232, %231 : vector<1x64xf32>
    %cst_86 = arith.constant 5.000000e-01 : f32
    %234 = vector.broadcast %cst_86 : f32 to vector<1x64xf32>
    %235 = arith.addf %233, %234 : vector<1x64xf32>
    %236 = vector.extract_strided_slice %217 {offsets = [0, 128], sizes = [1, 64], strides = [1, 1]} : vector<1x256xf32> to vector<1x64xf32>
    %237 = arith.addf %236, %6 : vector<1x64xf32>
    %cst_87 = arith.constant 5.000000e-01 : f32
    %238 = vector.broadcast %cst_87 : f32 to vector<1x64xf32>
    %239 = arith.mulf %238, %237 : vector<1x64xf32>
    %240 = math.tanh %239 : vector<1x64xf32>
    %cst_88 = arith.constant 5.000000e-01 : f32
    %241 = vector.broadcast %cst_88 : f32 to vector<1x64xf32>
    %242 = arith.mulf %241, %240 : vector<1x64xf32>
    %cst_89 = arith.constant 5.000000e-01 : f32
    %243 = vector.broadcast %cst_89 : f32 to vector<1x64xf32>
    %244 = arith.addf %242, %243 : vector<1x64xf32>
    %245 = vector.extract_strided_slice %217 {offsets = [0, 192], sizes = [1, 64], strides = [1, 1]} : vector<1x256xf32> to vector<1x64xf32>
    %246 = arith.addf %245, %7 : vector<1x64xf32>
    %247 = math.tanh %246 : vector<1x64xf32>
    %248 = arith.mulf %226, %247 : vector<1x64xf32>
    %249 = arith.mulf %235, %129 : vector<1x64xf32>
    %250 = arith.addf %248, %249 : vector<1x64xf32>
    %251 = math.tanh %250 : vector<1x64xf32>
    %252 = arith.mulf %244, %251 : vector<1x64xf32>
    %c368_90 = arith.constant 368 : index
    %c0_91 = arith.constant 0 : index
    %253 = vector.load %arg1[%c368_90, %c0_91] : memref<448x256xf32, #tpu.memory_space<vmem>>, vector<64x32xf32>
    %cst_92 = arith.constant dense<0.000000e+00> : vector<1x32xf32>
    %254 = tpu.matmul %252, %253, %cst_92 {dimension_numbers = #tpu.dot_dimension_numbers<[1], [0], [0], [1], [0, 0, 1, 1], [], []>} : vector<1x64xf32>, vector<64x32xf32>, vector<1x32xf32> -> vector<1x32xf32>
    %255 = arith.addf %254, %8 : vector<1x32xf32>
    %cst_93 = arith.constant 5.000000e-01 : f32
    %256 = vector.broadcast %cst_93 : f32 to vector<1x32xf32>
    %257 = arith.mulf %256, %255 : vector<1x32xf32>
    %258 = math.tanh %257 : vector<1x32xf32>
    %cst_94 = arith.constant 5.000000e-01 : f32
    %259 = vector.broadcast %cst_94 : f32 to vector<1x32xf32>
    %260 = arith.mulf %259, %258 : vector<1x32xf32>
    %cst_95 = arith.constant 5.000000e-01 : f32
    %261 = vector.broadcast %cst_95 : f32 to vector<1x32xf32>
    %262 = arith.addf %260, %261 : vector<1x32xf32>
    %c1 = arith.constant 1 : index
    %c0_96 = arith.constant 0 : index
    %263 = vector.load %arg2[%c1, %c0_96] : memref<6x32xf32, #tpu.memory_space<vmem>>, vector<1x32xf32>
    tpu.vector_store %arg2[%c1, %c0_96], %262 {strides = array<i32>} : memref<6x32xf32, #tpu.memory_space<vmem>>, vector<1x32xf32>,
    %264 = vector.extract_strided_slice %17 {offsets = [2, 0], sizes = [1, 192], strides = [1, 1]} : vector<6x192xf32> to vector<1x192xf32>
    %c32_97 = arith.constant 32 : index
    %c0_98 = arith.constant 0 : index
    %265 = vector.load %arg1[%c32_97, %c0_98] : memref<448x256xf32, #tpu.memory_space<vmem>>, vector<64x192xf32>
    %cst_99 = arith.constant dense<0.000000e+00> : vector<1x192xf32>
    %266 = tpu.matmul %179, %265, %cst_99 {dimension_numbers = #tpu.dot_dimension_numbers<[1], [0], [0], [1], [0, 0, 1, 1], [], []>} : vector<1x64xf32>, vector<64x192xf32>, vector<1x192xf32> -> vector<1x192xf32>
    %267 = vector.extract_strided_slice %264 {offsets = [0, 0], sizes = [1, 64], strides = [1, 1]} : vector<1x192xf32> to vector<1x64xf32>
    %268 = vector.extract_strided_slice %266 {offsets = [0, 0], sizes = [1, 64], strides = [1, 1]} : vector<1x192xf32> to vector<1x64xf32>
    %269 = arith.addf %267, %268 : vector<1x64xf32>
    %270 = arith.addf %269, %0 : vector<1x64xf32>
    %cst_100 = arith.constant 5.000000e-01 : f32
    %271 = vector.broadcast %cst_100 : f32 to vector<1x64xf32>
    %272 = arith.mulf %271, %270 : vector<1x64xf32>
    %273 = math.tanh %272 : vector<1x64xf32>
    %cst_101 = arith.constant 5.000000e-01 : f32
    %274 = vector.broadcast %cst_101 : f32 to vector<1x64xf32>
    %275 = arith.mulf %274, %273 : vector<1x64xf32>
    %cst_102 = arith.constant 5.000000e-01 : f32
    %276 = vector.broadcast %cst_102 : f32 to vector<1x64xf32>
    %277 = arith.addf %275, %276 : vector<1x64xf32>
    %278 = vector.extract_strided_slice %264 {offsets = [0, 64], sizes = [1, 64], strides = [1, 1]} : vector<1x192xf32> to vector<1x64xf32>
    %279 = vector.extract_strided_slice %266 {offsets = [0, 64], sizes = [1, 64], strides = [1, 1]} : vector<1x192xf32> to vector<1x64xf32>
    %280 = arith.addf %278, %279 : vector<1x64xf32>
    %281 = arith.addf %280, %1 : vector<1x64xf32>
    %cst_103 = arith.constant 5.000000e-01 : f32
    %282 = vector.broadcast %cst_103 : f32 to vector<1x64xf32>
    %283 = arith.mulf %282, %281 : vector<1x64xf32>
    %284 = math.tanh %283 : vector<1x64xf32>
    %cst_104 = arith.constant 5.000000e-01 : f32
    %285 = vector.broadcast %cst_104 : f32 to vector<1x64xf32>
    %286 = arith.mulf %285, %284 : vector<1x64xf32>
    %cst_105 = arith.constant 5.000000e-01 : f32
    %287 = vector.broadcast %cst_105 : f32 to vector<1x64xf32>
    %288 = arith.addf %286, %287 : vector<1x64xf32>
    %289 = vector.extract_strided_slice %264 {offsets = [0, 128], sizes = [1, 64], strides = [1, 1]} : vector<1x192xf32> to vector<1x64xf32>
    %290 = arith.mulf %288, %179 : vector<1x64xf32>
    %291 = arith.mulf %3, %290 : vector<1x64xf32>
    %292 = arith.addf %289, %291 : vector<1x64xf32>
    %293 = arith.addf %292, %2 : vector<1x64xf32>
    %294 = math.tanh %293 : vector<1x64xf32>
    %295 = vector.extract_strided_slice %266 {offsets = [0, 128], sizes = [1, 64], strides = [1, 1]} : vector<1x192xf32> to vector<1x64xf32>
    %296 = arith.mulf %277, %294 : vector<1x64xf32>
    %cst_106 = arith.constant 1.000000e+00 : f32
    %297 = vector.broadcast %cst_106 : f32 to vector<1x64xf32>
    %298 = arith.subf %297, %277 : vector<1x64xf32>
    %299 = arith.mulf %298, %295 : vector<1x64xf32>
    %300 = arith.addf %296, %299 : vector<1x64xf32>
    %c96_107 = arith.constant 96 : index
    %c0_108 = arith.constant 0 : index
    %301 = vector.load %arg1[%c96_107, %c0_108] : memref<448x256xf32, #tpu.memory_space<vmem>>, vector<64x48xf32>
    %cst_109 = arith.constant dense<0.000000e+00> : vector<1x48xf32>
    %302 = tpu.matmul %300, %301, %cst_109 {dimension_numbers = #tpu.dot_dimension_numbers<[1], [0], [0], [1], [0, 0, 1, 1], [], []>} : vector<1x64xf32>, vector<64x48xf32>, vector<1x48xf32> -> vector<1x48xf32>
    %303 = vector.extract_strided_slice %302 {offsets = [0, 0], sizes = [1, 16], strides = [1, 1]} : vector<1x48xf32> to vector<1x16xf32>
    %304 = arith.mulf %9, %214 : vector<1x16xf32>
    %305 = arith.addf %303, %304 : vector<1x16xf32>
    %306 = arith.addf %305, %12 : vector<1x16xf32>
    %cst_110 = arith.constant 5.000000e-01 : f32
    %307 = vector.broadcast %cst_110 : f32 to vector<1x16xf32>
    %308 = arith.mulf %307, %306 : vector<1x16xf32>
    %309 = math.tanh %308 : vector<1x16xf32>
    %cst_111 = arith.constant 5.000000e-01 : f32
    %310 = vector.broadcast %cst_111 : f32 to vector<1x16xf32>
    %311 = arith.mulf %310, %309 : vector<1x16xf32>
    %cst_112 = arith.constant 5.000000e-01 : f32
    %312 = vector.broadcast %cst_112 : f32 to vector<1x16xf32>
    %313 = arith.addf %311, %312 : vector<1x16xf32>
    %314 = vector.extract_strided_slice %302 {offsets = [0, 16], sizes = [1, 16], strides = [1, 1]} : vector<1x48xf32> to vector<1x16xf32>
    %315 = arith.mulf %10, %214 : vector<1x16xf32>
    %316 = arith.addf %314, %315 : vector<1x16xf32>
    %317 = arith.addf %316, %13 : vector<1x16xf32>
    %cst_113 = arith.constant 5.000000e-01 : f32
    %318 = vector.broadcast %cst_113 : f32 to vector<1x16xf32>
    %319 = arith.mulf %318, %317 : vector<1x16xf32>
    %320 = math.tanh %319 : vector<1x16xf32>
    %cst_114 = arith.constant 5.000000e-01 : f32
    %321 = vector.broadcast %cst_114 : f32 to vector<1x16xf32>
    %322 = arith.mulf %321, %320 : vector<1x16xf32>
    %cst_115 = arith.constant 5.000000e-01 : f32
    %323 = vector.broadcast %cst_115 : f32 to vector<1x16xf32>
    %324 = arith.addf %322, %323 : vector<1x16xf32>
    %325 = vector.extract_strided_slice %302 {offsets = [0, 32], sizes = [1, 16], strides = [1, 1]} : vector<1x48xf32> to vector<1x16xf32>
    %326 = arith.mulf %324, %214 : vector<1x16xf32>
    %327 = arith.mulf %11, %326 : vector<1x16xf32>
    %328 = arith.addf %325, %327 : vector<1x16xf32>
    %329 = arith.addf %328, %14 : vector<1x16xf32>
    %330 = math.tanh %329 : vector<1x16xf32>
    %331 = arith.mulf %313, %330 : vector<1x16xf32>
    %cst_116 = arith.constant 1.000000e+00 : f32
    %332 = vector.broadcast %cst_116 : f32 to vector<1x16xf32>
    %333 = arith.subf %332, %313 : vector<1x16xf32>
    %334 = arith.mulf %333, %214 : vector<1x16xf32>
    %335 = arith.addf %331, %334 : vector<1x16xf32>
    %336 = tpu.concatenate %335, %300, %252, %250 in 1 : vector<1x16xf32>, vector<1x64xf32>, vector<1x64xf32>, vector<1x64xf32> -> vector<1x208xf32>
    %c160_117 = arith.constant 160 : index
    %c0_118 = arith.constant 0 : index
    %337 = vector.load %arg1[%c160_117, %c0_118] : memref<448x256xf32, #tpu.memory_space<vmem>>, vector<208x256xf32>
    %cst_119 = arith.constant dense<0.000000e+00> : vector<1x256xf32>
    %338 = tpu.matmul %336, %337, %cst_119 {dimension_numbers = #tpu.dot_dimension_numbers<[1], [0], [0], [1], [0, 0, 1, 1], [], []>} : vector<1x208xf32>, vector<208x256xf32>, vector<1x256xf32> -> vector<1x256xf32>
    %339 = vector.extract_strided_slice %338 {offsets = [0, 0], sizes = [1, 64], strides = [1, 1]} : vector<1x256xf32> to vector<1x64xf32>
    %340 = arith.addf %339, %4 : vector<1x64xf32>
    %cst_120 = arith.constant 5.000000e-01 : f32
    %341 = vector.broadcast %cst_120 : f32 to vector<1x64xf32>
    %342 = arith.mulf %341, %340 : vector<1x64xf32>
    %343 = math.tanh %342 : vector<1x64xf32>
    %cst_121 = arith.constant 5.000000e-01 : f32
    %344 = vector.broadcast %cst_121 : f32 to vector<1x64xf32>
    %345 = arith.mulf %344, %343 : vector<1x64xf32>
    %cst_122 = arith.constant 5.000000e-01 : f32
    %346 = vector.broadcast %cst_122 : f32 to vector<1x64xf32>
    %347 = arith.addf %345, %346 : vector<1x64xf32>
    %348 = vector.extract_strided_slice %338 {offsets = [0, 64], sizes = [1, 64], strides = [1, 1]} : vector<1x256xf32> to vector<1x64xf32>
    %349 = arith.addf %348, %5 : vector<1x64xf32>
    %cst_123 = arith.constant 5.000000e-01 : f32
    %350 = vector.broadcast %cst_123 : f32 to vector<1x64xf32>
    %351 = arith.mulf %350, %349 : vector<1x64xf32>
    %352 = math.tanh %351 : vector<1x64xf32>
    %cst_124 = arith.constant 5.000000e-01 : f32
    %353 = vector.broadcast %cst_124 : f32 to vector<1x64xf32>
    %354 = arith.mulf %353, %352 : vector<1x64xf32>
    %cst_125 = arith.constant 5.000000e-01 : f32
    %355 = vector.broadcast %cst_125 : f32 to vector<1x64xf32>
    %356 = arith.addf %354, %355 : vector<1x64xf32>
    %357 = vector.extract_strided_slice %338 {offsets = [0, 128], sizes = [1, 64], strides = [1, 1]} : vector<1x256xf32> to vector<1x64xf32>
    %358 = arith.addf %357, %6 : vector<1x64xf32>
    %cst_126 = arith.constant 5.000000e-01 : f32
    %359 = vector.broadcast %cst_126 : f32 to vector<1x64xf32>
    %360 = arith.mulf %359, %358 : vector<1x64xf32>
    %361 = math.tanh %360 : vector<1x64xf32>
    %cst_127 = arith.constant 5.000000e-01 : f32
    %362 = vector.broadcast %cst_127 : f32 to vector<1x64xf32>
    %363 = arith.mulf %362, %361 : vector<1x64xf32>
    %cst_128 = arith.constant 5.000000e-01 : f32
    %364 = vector.broadcast %cst_128 : f32 to vector<1x64xf32>
    %365 = arith.addf %363, %364 : vector<1x64xf32>
    %366 = vector.extract_strided_slice %338 {offsets = [0, 192], sizes = [1, 64], strides = [1, 1]} : vector<1x256xf32> to vector<1x64xf32>
    %367 = arith.addf %366, %7 : vector<1x64xf32>
    %368 = math.tanh %367 : vector<1x64xf32>
    %369 = arith.mulf %347, %368 : vector<1x64xf32>
    %370 = arith.mulf %356, %250 : vector<1x64xf32>
    %371 = arith.addf %369, %370 : vector<1x64xf32>
    %372 = math.tanh %371 : vector<1x64xf32>
    %373 = arith.mulf %365, %372 : vector<1x64xf32>
    %c368_129 = arith.constant 368 : index
    %c0_130 = arith.constant 0 : index
    %374 = vector.load %arg1[%c368_129, %c0_130] : memref<448x256xf32, #tpu.memory_space<vmem>>, vector<64x32xf32>
    %cst_131 = arith.constant dense<0.000000e+00> : vector<1x32xf32>
    %375 = tpu.matmul %373, %374, %cst_131 {dimension_numbers = #tpu.dot_dimension_numbers<[1], [0], [0], [1], [0, 0, 1, 1], [], []>} : vector<1x64xf32>, vector<64x32xf32>, vector<1x32xf32> -> vector<1x32xf32>
    %376 = arith.addf %375, %8 : vector<1x32xf32>
    %cst_132 = arith.constant 5.000000e-01 : f32
    %377 = vector.broadcast %cst_132 : f32 to vector<1x32xf32>
    %378 = arith.mulf %377, %376 : vector<1x32xf32>
    %379 = math.tanh %378 : vector<1x32xf32>
    %cst_133 = arith.constant 5.000000e-01 : f32
    %380 = vector.broadcast %cst_133 : f32 to vector<1x32xf32>
    %381 = arith.mulf %380, %379 : vector<1x32xf32>
    %cst_134 = arith.constant 5.000000e-01 : f32
    %382 = vector.broadcast %cst_134 : f32 to vector<1x32xf32>
    %383 = arith.addf %381, %382 : vector<1x32xf32>
    %c2 = arith.constant 2 : index
    %c0_135 = arith.constant 0 : index
    %384 = vector.load %arg2[%c2, %c0_135] : memref<6x32xf32, #tpu.memory_space<vmem>>, vector<1x32xf32>
    tpu.vector_store %arg2[%c2, %c0_135], %383 {strides = array<i32>} : memref<6x32xf32, #tpu.memory_space<vmem>>, vector<1x32xf32>,
    %385 = vector.extract_strided_slice %17 {offsets = [3, 0], sizes = [1, 192], strides = [1, 1]} : vector<6x192xf32> to vector<1x192xf32>
    %c32_136 = arith.constant 32 : index
    %c0_137 = arith.constant 0 : index
    %386 = vector.load %arg1[%c32_136, %c0_137] : memref<448x256xf32, #tpu.memory_space<vmem>>, vector<64x192xf32>
    %cst_138 = arith.constant dense<0.000000e+00> : vector<1x192xf32>
    %387 = tpu.matmul %300, %386, %cst_138 {dimension_numbers = #tpu.dot_dimension_numbers<[1], [0], [0], [1], [0, 0, 1, 1], [], []>} : vector<1x64xf32>, vector<64x192xf32>, vector<1x192xf32> -> vector<1x192xf32>
    %388 = vector.extract_strided_slice %385 {offsets = [0, 0], sizes = [1, 64], strides = [1, 1]} : vector<1x192xf32> to vector<1x64xf32>
    %389 = vector.extract_strided_slice %387 {offsets = [0, 0], sizes = [1, 64], strides = [1, 1]} : vector<1x192xf32> to vector<1x64xf32>
    %390 = arith.addf %388, %389 : vector<1x64xf32>
    %391 = arith.addf %390, %0 : vector<1x64xf32>
    %cst_139 = arith.constant 5.000000e-01 : f32
    %392 = vector.broadcast %cst_139 : f32 to vector<1x64xf32>
    %393 = arith.mulf %392, %391 : vector<1x64xf32>
    %394 = math.tanh %393 : vector<1x64xf32>
    %cst_140 = arith.constant 5.000000e-01 : f32
    %395 = vector.broadcast %cst_140 : f32 to vector<1x64xf32>
    %396 = arith.mulf %395, %394 : vector<1x64xf32>
    %cst_141 = arith.constant 5.000000e-01 : f32
    %397 = vector.broadcast %cst_141 : f32 to vector<1x64xf32>
    %398 = arith.addf %396, %397 : vector<1x64xf32>
    %399 = vector.extract_strided_slice %385 {offsets = [0, 64], sizes = [1, 64], strides = [1, 1]} : vector<1x192xf32> to vector<1x64xf32>
    %400 = vector.extract_strided_slice %387 {offsets = [0, 64], sizes = [1, 64], strides = [1, 1]} : vector<1x192xf32> to vector<1x64xf32>
    %401 = arith.addf %399, %400 : vector<1x64xf32>
    %402 = arith.addf %401, %1 : vector<1x64xf32>
    %cst_142 = arith.constant 5.000000e-01 : f32
    %403 = vector.broadcast %cst_142 : f32 to vector<1x64xf32>
    %404 = arith.mulf %403, %402 : vector<1x64xf32>
    %405 = math.tanh %404 : vector<1x64xf32>
    %cst_143 = arith.constant 5.000000e-01 : f32
    %406 = vector.broadcast %cst_143 : f32 to vector<1x64xf32>
    %407 = arith.mulf %406, %405 : vector<1x64xf32>
    %cst_144 = arith.constant 5.000000e-01 : f32
    %408 = vector.broadcast %cst_144 : f32 to vector<1x64xf32>
    %409 = arith.addf %407, %408 : vector<1x64xf32>
    %410 = vector.extract_strided_slice %385 {offsets = [0, 128], sizes = [1, 64], strides = [1, 1]} : vector<1x192xf32> to vector<1x64xf32>
    %411 = arith.mulf %409, %300 : vector<1x64xf32>
    %412 = arith.mulf %3, %411 : vector<1x64xf32>
    %413 = arith.addf %410, %412 : vector<1x64xf32>
    %414 = arith.addf %413, %2 : vector<1x64xf32>
    %415 = math.tanh %414 : vector<1x64xf32>
    %416 = vector.extract_strided_slice %387 {offsets = [0, 128], sizes = [1, 64], strides = [1, 1]} : vector<1x192xf32> to vector<1x64xf32>
    %417 = arith.mulf %398, %415 : vector<1x64xf32>
    %cst_145 = arith.constant 1.000000e+00 : f32
    %418 = vector.broadcast %cst_145 : f32 to vector<1x64xf32>
    %419 = arith.subf %418, %398 : vector<1x64xf32>
    %420 = arith.mulf %419, %416 : vector<1x64xf32>
    %421 = arith.addf %417, %420 : vector<1x64xf32>
    %c96_146 = arith.constant 96 : index
    %c0_147 = arith.constant 0 : index
    %422 = vector.load %arg1[%c96_146, %c0_147] : memref<448x256xf32, #tpu.memory_space<vmem>>, vector<64x48xf32>
    %cst_148 = arith.constant dense<0.000000e+00> : vector<1x48xf32>
    %423 = tpu.matmul %421, %422, %cst_148 {dimension_numbers = #tpu.dot_dimension_numbers<[1], [0], [0], [1], [0, 0, 1, 1], [], []>} : vector<1x64xf32>, vector<64x48xf32>, vector<1x48xf32> -> vector<1x48xf32>
    %424 = vector.extract_strided_slice %423 {offsets = [0, 0], sizes = [1, 16], strides = [1, 1]} : vector<1x48xf32> to vector<1x16xf32>
    %425 = arith.mulf %9, %335 : vector<1x16xf32>
    %426 = arith.addf %424, %425 : vector<1x16xf32>
    %427 = arith.addf %426, %12 : vector<1x16xf32>
    %cst_149 = arith.constant 5.000000e-01 : f32
    %428 = vector.broadcast %cst_149 : f32 to vector<1x16xf32>
    %429 = arith.mulf %428, %427 : vector<1x16xf32>
    %430 = math.tanh %429 : vector<1x16xf32>
    %cst_150 = arith.constant 5.000000e-01 : f32
    %431 = vector.broadcast %cst_150 : f32 to vector<1x16xf32>
    %432 = arith.mulf %431, %430 : vector<1x16xf32>
    %cst_151 = arith.constant 5.000000e-01 : f32
    %433 = vector.broadcast %cst_151 : f32 to vector<1x16xf32>
    %434 = arith.addf %432, %433 : vector<1x16xf32>
    %435 = vector.extract_strided_slice %423 {offsets = [0, 16], sizes = [1, 16], strides = [1, 1]} : vector<1x48xf32> to vector<1x16xf32>
    %436 = arith.mulf %10, %335 : vector<1x16xf32>
    %437 = arith.addf %435, %436 : vector<1x16xf32>
    %438 = arith.addf %437, %13 : vector<1x16xf32>
    %cst_152 = arith.constant 5.000000e-01 : f32
    %439 = vector.broadcast %cst_152 : f32 to vector<1x16xf32>
    %440 = arith.mulf %439, %438 : vector<1x16xf32>
    %441 = math.tanh %440 : vector<1x16xf32>
    %cst_153 = arith.constant 5.000000e-01 : f32
    %442 = vector.broadcast %cst_153 : f32 to vector<1x16xf32>
    %443 = arith.mulf %442, %441 : vector<1x16xf32>
    %cst_154 = arith.constant 5.000000e-01 : f32
    %444 = vector.broadcast %cst_154 : f32 to vector<1x16xf32>
    %445 = arith.addf %443, %444 : vector<1x16xf32>
    %446 = vector.extract_strided_slice %423 {offsets = [0, 32], sizes = [1, 16], strides = [1, 1]} : vector<1x48xf32> to vector<1x16xf32>
    %447 = arith.mulf %445, %335 : vector<1x16xf32>
    %448 = arith.mulf %11, %447 : vector<1x16xf32>
    %449 = arith.addf %446, %448 : vector<1x16xf32>
    %450 = arith.addf %449, %14 : vector<1x16xf32>
    %451 = math.tanh %450 : vector<1x16xf32>
    %452 = arith.mulf %434, %451 : vector<1x16xf32>
    %cst_155 = arith.constant 1.000000e+00 : f32
    %453 = vector.broadcast %cst_155 : f32 to vector<1x16xf32>
    %454 = arith.subf %453, %434 : vector<1x16xf32>
    %455 = arith.mulf %454, %335 : vector<1x16xf32>
    %456 = arith.addf %452, %455 : vector<1x16xf32>
    %457 = tpu.concatenate %456, %421, %373, %371 in 1 : vector<1x16xf32>, vector<1x64xf32>, vector<1x64xf32>, vector<1x64xf32> -> vector<1x208xf32>
    %c160_156 = arith.constant 160 : index
    %c0_157 = arith.constant 0 : index
    %458 = vector.load %arg1[%c160_156, %c0_157] : memref<448x256xf32, #tpu.memory_space<vmem>>, vector<208x256xf32>
    %cst_158 = arith.constant dense<0.000000e+00> : vector<1x256xf32>
    %459 = tpu.matmul %457, %458, %cst_158 {dimension_numbers = #tpu.dot_dimension_numbers<[1], [0], [0], [1], [0, 0, 1, 1], [], []>} : vector<1x208xf32>, vector<208x256xf32>, vector<1x256xf32> -> vector<1x256xf32>
    %460 = vector.extract_strided_slice %459 {offsets = [0, 0], sizes = [1, 64], strides = [1, 1]} : vector<1x256xf32> to vector<1x64xf32>
    %461 = arith.addf %460, %4 : vector<1x64xf32>
    %cst_159 = arith.constant 5.000000e-01 : f32
    %462 = vector.broadcast %cst_159 : f32 to vector<1x64xf32>
    %463 = arith.mulf %462, %461 : vector<1x64xf32>
    %464 = math.tanh %463 : vector<1x64xf32>
    %cst_160 = arith.constant 5.000000e-01 : f32
    %465 = vector.broadcast %cst_160 : f32 to vector<1x64xf32>
    %466 = arith.mulf %465, %464 : vector<1x64xf32>
    %cst_161 = arith.constant 5.000000e-01 : f32
    %467 = vector.broadcast %cst_161 : f32 to vector<1x64xf32>
    %468 = arith.addf %466, %467 : vector<1x64xf32>
    %469 = vector.extract_strided_slice %459 {offsets = [0, 64], sizes = [1, 64], strides = [1, 1]} : vector<1x256xf32> to vector<1x64xf32>
    %470 = arith.addf %469, %5 : vector<1x64xf32>
    %cst_162 = arith.constant 5.000000e-01 : f32
    %471 = vector.broadcast %cst_162 : f32 to vector<1x64xf32>
    %472 = arith.mulf %471, %470 : vector<1x64xf32>
    %473 = math.tanh %472 : vector<1x64xf32>
    %cst_163 = arith.constant 5.000000e-01 : f32
    %474 = vector.broadcast %cst_163 : f32 to vector<1x64xf32>
    %475 = arith.mulf %474, %473 : vector<1x64xf32>
    %cst_164 = arith.constant 5.000000e-01 : f32
    %476 = vector.broadcast %cst_164 : f32 to vector<1x64xf32>
    %477 = arith.addf %475, %476 : vector<1x64xf32>
    %478 = vector.extract_strided_slice %459 {offsets = [0, 128], sizes = [1, 64], strides = [1, 1]} : vector<1x256xf32> to vector<1x64xf32>
    %479 = arith.addf %478, %6 : vector<1x64xf32>
    %cst_165 = arith.constant 5.000000e-01 : f32
    %480 = vector.broadcast %cst_165 : f32 to vector<1x64xf32>
    %481 = arith.mulf %480, %479 : vector<1x64xf32>
    %482 = math.tanh %481 : vector<1x64xf32>
    %cst_166 = arith.constant 5.000000e-01 : f32
    %483 = vector.broadcast %cst_166 : f32 to vector<1x64xf32>
    %484 = arith.mulf %483, %482 : vector<1x64xf32>
    %cst_167 = arith.constant 5.000000e-01 : f32
    %485 = vector.broadcast %cst_167 : f32 to vector<1x64xf32>
    %486 = arith.addf %484, %485 : vector<1x64xf32>
    %487 = vector.extract_strided_slice %459 {offsets = [0, 192], sizes = [1, 64], strides = [1, 1]} : vector<1x256xf32> to vector<1x64xf32>
    %488 = arith.addf %487, %7 : vector<1x64xf32>
    %489 = math.tanh %488 : vector<1x64xf32>
    %490 = arith.mulf %468, %489 : vector<1x64xf32>
    %491 = arith.mulf %477, %371 : vector<1x64xf32>
    %492 = arith.addf %490, %491 : vector<1x64xf32>
    %493 = math.tanh %492 : vector<1x64xf32>
    %494 = arith.mulf %486, %493 : vector<1x64xf32>
    %c368_168 = arith.constant 368 : index
    %c0_169 = arith.constant 0 : index
    %495 = vector.load %arg1[%c368_168, %c0_169] : memref<448x256xf32, #tpu.memory_space<vmem>>, vector<64x32xf32>
    %cst_170 = arith.constant dense<0.000000e+00> : vector<1x32xf32>
    %496 = tpu.matmul %494, %495, %cst_170 {dimension_numbers = #tpu.dot_dimension_numbers<[1], [0], [0], [1], [0, 0, 1, 1], [], []>} : vector<1x64xf32>, vector<64x32xf32>, vector<1x32xf32> -> vector<1x32xf32>
    %497 = arith.addf %496, %8 : vector<1x32xf32>
    %cst_171 = arith.constant 5.000000e-01 : f32
    %498 = vector.broadcast %cst_171 : f32 to vector<1x32xf32>
    %499 = arith.mulf %498, %497 : vector<1x32xf32>
    %500 = math.tanh %499 : vector<1x32xf32>
    %cst_172 = arith.constant 5.000000e-01 : f32
    %501 = vector.broadcast %cst_172 : f32 to vector<1x32xf32>
    %502 = arith.mulf %501, %500 : vector<1x32xf32>
    %cst_173 = arith.constant 5.000000e-01 : f32
    %503 = vector.broadcast %cst_173 : f32 to vector<1x32xf32>
    %504 = arith.addf %502, %503 : vector<1x32xf32>
    %c3 = arith.constant 3 : index
    %c0_174 = arith.constant 0 : index
    %505 = vector.load %arg2[%c3, %c0_174] : memref<6x32xf32, #tpu.memory_space<vmem>>, vector<1x32xf32>
    tpu.vector_store %arg2[%c3, %c0_174], %504 {strides = array<i32>} : memref<6x32xf32, #tpu.memory_space<vmem>>, vector<1x32xf32>,
    %506 = vector.extract_strided_slice %17 {offsets = [4, 0], sizes = [1, 192], strides = [1, 1]} : vector<6x192xf32> to vector<1x192xf32>
    %c32_175 = arith.constant 32 : index
    %c0_176 = arith.constant 0 : index
    %507 = vector.load %arg1[%c32_175, %c0_176] : memref<448x256xf32, #tpu.memory_space<vmem>>, vector<64x192xf32>
    %cst_177 = arith.constant dense<0.000000e+00> : vector<1x192xf32>
    %508 = tpu.matmul %421, %507, %cst_177 {dimension_numbers = #tpu.dot_dimension_numbers<[1], [0], [0], [1], [0, 0, 1, 1], [], []>} : vector<1x64xf32>, vector<64x192xf32>, vector<1x192xf32> -> vector<1x192xf32>
    %509 = vector.extract_strided_slice %506 {offsets = [0, 0], sizes = [1, 64], strides = [1, 1]} : vector<1x192xf32> to vector<1x64xf32>
    %510 = vector.extract_strided_slice %508 {offsets = [0, 0], sizes = [1, 64], strides = [1, 1]} : vector<1x192xf32> to vector<1x64xf32>
    %511 = arith.addf %509, %510 : vector<1x64xf32>
    %512 = arith.addf %511, %0 : vector<1x64xf32>
    %cst_178 = arith.constant 5.000000e-01 : f32
    %513 = vector.broadcast %cst_178 : f32 to vector<1x64xf32>
    %514 = arith.mulf %513, %512 : vector<1x64xf32>
    %515 = math.tanh %514 : vector<1x64xf32>
    %cst_179 = arith.constant 5.000000e-01 : f32
    %516 = vector.broadcast %cst_179 : f32 to vector<1x64xf32>
    %517 = arith.mulf %516, %515 : vector<1x64xf32>
    %cst_180 = arith.constant 5.000000e-01 : f32
    %518 = vector.broadcast %cst_180 : f32 to vector<1x64xf32>
    %519 = arith.addf %517, %518 : vector<1x64xf32>
    %520 = vector.extract_strided_slice %506 {offsets = [0, 64], sizes = [1, 64], strides = [1, 1]} : vector<1x192xf32> to vector<1x64xf32>
    %521 = vector.extract_strided_slice %508 {offsets = [0, 64], sizes = [1, 64], strides = [1, 1]} : vector<1x192xf32> to vector<1x64xf32>
    %522 = arith.addf %520, %521 : vector<1x64xf32>
    %523 = arith.addf %522, %1 : vector<1x64xf32>
    %cst_181 = arith.constant 5.000000e-01 : f32
    %524 = vector.broadcast %cst_181 : f32 to vector<1x64xf32>
    %525 = arith.mulf %524, %523 : vector<1x64xf32>
    %526 = math.tanh %525 : vector<1x64xf32>
    %cst_182 = arith.constant 5.000000e-01 : f32
    %527 = vector.broadcast %cst_182 : f32 to vector<1x64xf32>
    %528 = arith.mulf %527, %526 : vector<1x64xf32>
    %cst_183 = arith.constant 5.000000e-01 : f32
    %529 = vector.broadcast %cst_183 : f32 to vector<1x64xf32>
    %530 = arith.addf %528, %529 : vector<1x64xf32>
    %531 = vector.extract_strided_slice %506 {offsets = [0, 128], sizes = [1, 64], strides = [1, 1]} : vector<1x192xf32> to vector<1x64xf32>
    %532 = arith.mulf %530, %421 : vector<1x64xf32>
    %533 = arith.mulf %3, %532 : vector<1x64xf32>
    %534 = arith.addf %531, %533 : vector<1x64xf32>
    %535 = arith.addf %534, %2 : vector<1x64xf32>
    %536 = math.tanh %535 : vector<1x64xf32>
    %537 = vector.extract_strided_slice %508 {offsets = [0, 128], sizes = [1, 64], strides = [1, 1]} : vector<1x192xf32> to vector<1x64xf32>
    %538 = arith.mulf %519, %536 : vector<1x64xf32>
    %cst_184 = arith.constant 1.000000e+00 : f32
    %539 = vector.broadcast %cst_184 : f32 to vector<1x64xf32>
    %540 = arith.subf %539, %519 : vector<1x64xf32>
    %541 = arith.mulf %540, %537 : vector<1x64xf32>
    %542 = arith.addf %538, %541 : vector<1x64xf32>
    %c96_185 = arith.constant 96 : index
    %c0_186 = arith.constant 0 : index
    %543 = vector.load %arg1[%c96_185, %c0_186] : memref<448x256xf32, #tpu.memory_space<vmem>>, vector<64x48xf32>
    %cst_187 = arith.constant dense<0.000000e+00> : vector<1x48xf32>
    %544 = tpu.matmul %542, %543, %cst_187 {dimension_numbers = #tpu.dot_dimension_numbers<[1], [0], [0], [1], [0, 0, 1, 1], [], []>} : vector<1x64xf32>, vector<64x48xf32>, vector<1x48xf32> -> vector<1x48xf32>
    %545 = vector.extract_strided_slice %544 {offsets = [0, 0], sizes = [1, 16], strides = [1, 1]} : vector<1x48xf32> to vector<1x16xf32>
    %546 = arith.mulf %9, %456 : vector<1x16xf32>
    %547 = arith.addf %545, %546 : vector<1x16xf32>
    %548 = arith.addf %547, %12 : vector<1x16xf32>
    %cst_188 = arith.constant 5.000000e-01 : f32
    %549 = vector.broadcast %cst_188 : f32 to vector<1x16xf32>
    %550 = arith.mulf %549, %548 : vector<1x16xf32>
    %551 = math.tanh %550 : vector<1x16xf32>
    %cst_189 = arith.constant 5.000000e-01 : f32
    %552 = vector.broadcast %cst_189 : f32 to vector<1x16xf32>
    %553 = arith.mulf %552, %551 : vector<1x16xf32>
    %cst_190 = arith.constant 5.000000e-01 : f32
    %554 = vector.broadcast %cst_190 : f32 to vector<1x16xf32>
    %555 = arith.addf %553, %554 : vector<1x16xf32>
    %556 = vector.extract_strided_slice %544 {offsets = [0, 16], sizes = [1, 16], strides = [1, 1]} : vector<1x48xf32> to vector<1x16xf32>
    %557 = arith.mulf %10, %456 : vector<1x16xf32>
    %558 = arith.addf %556, %557 : vector<1x16xf32>
    %559 = arith.addf %558, %13 : vector<1x16xf32>
    %cst_191 = arith.constant 5.000000e-01 : f32
    %560 = vector.broadcast %cst_191 : f32 to vector<1x16xf32>
    %561 = arith.mulf %560, %559 : vector<1x16xf32>
    %562 = math.tanh %561 : vector<1x16xf32>
    %cst_192 = arith.constant 5.000000e-01 : f32
    %563 = vector.broadcast %cst_192 : f32 to vector<1x16xf32>
    %564 = arith.mulf %563, %562 : vector<1x16xf32>
    %cst_193 = arith.constant 5.000000e-01 : f32
    %565 = vector.broadcast %cst_193 : f32 to vector<1x16xf32>
    %566 = arith.addf %564, %565 : vector<1x16xf32>
    %567 = vector.extract_strided_slice %544 {offsets = [0, 32], sizes = [1, 16], strides = [1, 1]} : vector<1x48xf32> to vector<1x16xf32>
    %568 = arith.mulf %566, %456 : vector<1x16xf32>
    %569 = arith.mulf %11, %568 : vector<1x16xf32>
    %570 = arith.addf %567, %569 : vector<1x16xf32>
    %571 = arith.addf %570, %14 : vector<1x16xf32>
    %572 = math.tanh %571 : vector<1x16xf32>
    %573 = arith.mulf %555, %572 : vector<1x16xf32>
    %cst_194 = arith.constant 1.000000e+00 : f32
    %574 = vector.broadcast %cst_194 : f32 to vector<1x16xf32>
    %575 = arith.subf %574, %555 : vector<1x16xf32>
    %576 = arith.mulf %575, %456 : vector<1x16xf32>
    %577 = arith.addf %573, %576 : vector<1x16xf32>
    %578 = tpu.concatenate %577, %542, %494, %492 in 1 : vector<1x16xf32>, vector<1x64xf32>, vector<1x64xf32>, vector<1x64xf32> -> vector<1x208xf32>
    %c160_195 = arith.constant 160 : index
    %c0_196 = arith.constant 0 : index
    %579 = vector.load %arg1[%c160_195, %c0_196] : memref<448x256xf32, #tpu.memory_space<vmem>>, vector<208x256xf32>
    %cst_197 = arith.constant dense<0.000000e+00> : vector<1x256xf32>
    %580 = tpu.matmul %578, %579, %cst_197 {dimension_numbers = #tpu.dot_dimension_numbers<[1], [0], [0], [1], [0, 0, 1, 1], [], []>} : vector<1x208xf32>, vector<208x256xf32>, vector<1x256xf32> -> vector<1x256xf32>
    %581 = vector.extract_strided_slice %580 {offsets = [0, 0], sizes = [1, 64], strides = [1, 1]} : vector<1x256xf32> to vector<1x64xf32>
    %582 = arith.addf %581, %4 : vector<1x64xf32>
    %cst_198 = arith.constant 5.000000e-01 : f32
    %583 = vector.broadcast %cst_198 : f32 to vector<1x64xf32>
    %584 = arith.mulf %583, %582 : vector<1x64xf32>
    %585 = math.tanh %584 : vector<1x64xf32>
    %cst_199 = arith.constant 5.000000e-01 : f32
    %586 = vector.broadcast %cst_199 : f32 to vector<1x64xf32>
    %587 = arith.mulf %586, %585 : vector<1x64xf32>
    %cst_200 = arith.constant 5.000000e-01 : f32
    %588 = vector.broadcast %cst_200 : f32 to vector<1x64xf32>
    %589 = arith.addf %587, %588 : vector<1x64xf32>
    %590 = vector.extract_strided_slice %580 {offsets = [0, 64], sizes = [1, 64], strides = [1, 1]} : vector<1x256xf32> to vector<1x64xf32>
    %591 = arith.addf %590, %5 : vector<1x64xf32>
    %cst_201 = arith.constant 5.000000e-01 : f32
    %592 = vector.broadcast %cst_201 : f32 to vector<1x64xf32>
    %593 = arith.mulf %592, %591 : vector<1x64xf32>
    %594 = math.tanh %593 : vector<1x64xf32>
    %cst_202 = arith.constant 5.000000e-01 : f32
    %595 = vector.broadcast %cst_202 : f32 to vector<1x64xf32>
    %596 = arith.mulf %595, %594 : vector<1x64xf32>
    %cst_203 = arith.constant 5.000000e-01 : f32
    %597 = vector.broadcast %cst_203 : f32 to vector<1x64xf32>
    %598 = arith.addf %596, %597 : vector<1x64xf32>
    %599 = vector.extract_strided_slice %580 {offsets = [0, 128], sizes = [1, 64], strides = [1, 1]} : vector<1x256xf32> to vector<1x64xf32>
    %600 = arith.addf %599, %6 : vector<1x64xf32>
    %cst_204 = arith.constant 5.000000e-01 : f32
    %601 = vector.broadcast %cst_204 : f32 to vector<1x64xf32>
    %602 = arith.mulf %601, %600 : vector<1x64xf32>
    %603 = math.tanh %602 : vector<1x64xf32>
    %cst_205 = arith.constant 5.000000e-01 : f32
    %604 = vector.broadcast %cst_205 : f32 to vector<1x64xf32>
    %605 = arith.mulf %604, %603 : vector<1x64xf32>
    %cst_206 = arith.constant 5.000000e-01 : f32
    %606 = vector.broadcast %cst_206 : f32 to vector<1x64xf32>
    %607 = arith.addf %605, %606 : vector<1x64xf32>
    %608 = vector.extract_strided_slice %580 {offsets = [0, 192], sizes = [1, 64], strides = [1, 1]} : vector<1x256xf32> to vector<1x64xf32>
    %609 = arith.addf %608, %7 : vector<1x64xf32>
    %610 = math.tanh %609 : vector<1x64xf32>
    %611 = arith.mulf %589, %610 : vector<1x64xf32>
    %612 = arith.mulf %598, %492 : vector<1x64xf32>
    %613 = arith.addf %611, %612 : vector<1x64xf32>
    %614 = math.tanh %613 : vector<1x64xf32>
    %615 = arith.mulf %607, %614 : vector<1x64xf32>
    %c368_207 = arith.constant 368 : index
    %c0_208 = arith.constant 0 : index
    %616 = vector.load %arg1[%c368_207, %c0_208] : memref<448x256xf32, #tpu.memory_space<vmem>>, vector<64x32xf32>
    %cst_209 = arith.constant dense<0.000000e+00> : vector<1x32xf32>
    %617 = tpu.matmul %615, %616, %cst_209 {dimension_numbers = #tpu.dot_dimension_numbers<[1], [0], [0], [1], [0, 0, 1, 1], [], []>} : vector<1x64xf32>, vector<64x32xf32>, vector<1x32xf32> -> vector<1x32xf32>
    %618 = arith.addf %617, %8 : vector<1x32xf32>
    %cst_210 = arith.constant 5.000000e-01 : f32
    %619 = vector.broadcast %cst_210 : f32 to vector<1x32xf32>
    %620 = arith.mulf %619, %618 : vector<1x32xf32>
    %621 = math.tanh %620 : vector<1x32xf32>
    %cst_211 = arith.constant 5.000000e-01 : f32
    %622 = vector.broadcast %cst_211 : f32 to vector<1x32xf32>
    %623 = arith.mulf %622, %621 : vector<1x32xf32>
    %cst_212 = arith.constant 5.000000e-01 : f32
    %624 = vector.broadcast %cst_212 : f32 to vector<1x32xf32>
    %625 = arith.addf %623, %624 : vector<1x32xf32>
    %c4 = arith.constant 4 : index
    %c0_213 = arith.constant 0 : index
    %626 = vector.load %arg2[%c4, %c0_213] : memref<6x32xf32, #tpu.memory_space<vmem>>, vector<1x32xf32>
    tpu.vector_store %arg2[%c4, %c0_213], %625 {strides = array<i32>} : memref<6x32xf32, #tpu.memory_space<vmem>>, vector<1x32xf32>,
    %627 = vector.extract_strided_slice %17 {offsets = [5, 0], sizes = [1, 192], strides = [1, 1]} : vector<6x192xf32> to vector<1x192xf32>
    %c32_214 = arith.constant 32 : index
    %c0_215 = arith.constant 0 : index
    %628 = vector.load %arg1[%c32_214, %c0_215] : memref<448x256xf32, #tpu.memory_space<vmem>>, vector<64x192xf32>
    %cst_216 = arith.constant dense<0.000000e+00> : vector<1x192xf32>
    %629 = tpu.matmul %542, %628, %cst_216 {dimension_numbers = #tpu.dot_dimension_numbers<[1], [0], [0], [1], [0, 0, 1, 1], [], []>} : vector<1x64xf32>, vector<64x192xf32>, vector<1x192xf32> -> vector<1x192xf32>
    %630 = vector.extract_strided_slice %627 {offsets = [0, 0], sizes = [1, 64], strides = [1, 1]} : vector<1x192xf32> to vector<1x64xf32>
    %631 = vector.extract_strided_slice %629 {offsets = [0, 0], sizes = [1, 64], strides = [1, 1]} : vector<1x192xf32> to vector<1x64xf32>
    %632 = arith.addf %630, %631 : vector<1x64xf32>
    %633 = arith.addf %632, %0 : vector<1x64xf32>
    %cst_217 = arith.constant 5.000000e-01 : f32
    %634 = vector.broadcast %cst_217 : f32 to vector<1x64xf32>
    %635 = arith.mulf %634, %633 : vector<1x64xf32>
    %636 = math.tanh %635 : vector<1x64xf32>
    %cst_218 = arith.constant 5.000000e-01 : f32
    %637 = vector.broadcast %cst_218 : f32 to vector<1x64xf32>
    %638 = arith.mulf %637, %636 : vector<1x64xf32>
    %cst_219 = arith.constant 5.000000e-01 : f32
    %639 = vector.broadcast %cst_219 : f32 to vector<1x64xf32>
    %640 = arith.addf %638, %639 : vector<1x64xf32>
    %641 = vector.extract_strided_slice %627 {offsets = [0, 64], sizes = [1, 64], strides = [1, 1]} : vector<1x192xf32> to vector<1x64xf32>
    %642 = vector.extract_strided_slice %629 {offsets = [0, 64], sizes = [1, 64], strides = [1, 1]} : vector<1x192xf32> to vector<1x64xf32>
    %643 = arith.addf %641, %642 : vector<1x64xf32>
    %644 = arith.addf %643, %1 : vector<1x64xf32>
    %cst_220 = arith.constant 5.000000e-01 : f32
    %645 = vector.broadcast %cst_220 : f32 to vector<1x64xf32>
    %646 = arith.mulf %645, %644 : vector<1x64xf32>
    %647 = math.tanh %646 : vector<1x64xf32>
    %cst_221 = arith.constant 5.000000e-01 : f32
    %648 = vector.broadcast %cst_221 : f32 to vector<1x64xf32>
    %649 = arith.mulf %648, %647 : vector<1x64xf32>
    %cst_222 = arith.constant 5.000000e-01 : f32
    %650 = vector.broadcast %cst_222 : f32 to vector<1x64xf32>
    %651 = arith.addf %649, %650 : vector<1x64xf32>
    %652 = vector.extract_strided_slice %627 {offsets = [0, 128], sizes = [1, 64], strides = [1, 1]} : vector<1x192xf32> to vector<1x64xf32>
    %653 = arith.mulf %651, %542 : vector<1x64xf32>
    %654 = arith.mulf %3, %653 : vector<1x64xf32>
    %655 = arith.addf %652, %654 : vector<1x64xf32>
    %656 = arith.addf %655, %2 : vector<1x64xf32>
    %657 = math.tanh %656 : vector<1x64xf32>
    %658 = vector.extract_strided_slice %629 {offsets = [0, 128], sizes = [1, 64], strides = [1, 1]} : vector<1x192xf32> to vector<1x64xf32>
    %659 = arith.mulf %640, %657 : vector<1x64xf32>
    %cst_223 = arith.constant 1.000000e+00 : f32
    %660 = vector.broadcast %cst_223 : f32 to vector<1x64xf32>
    %661 = arith.subf %660, %640 : vector<1x64xf32>
    %662 = arith.mulf %661, %658 : vector<1x64xf32>
    %663 = arith.addf %659, %662 : vector<1x64xf32>
    %c96_224 = arith.constant 96 : index
    %c0_225 = arith.constant 0 : index
    %664 = vector.load %arg1[%c96_224, %c0_225] : memref<448x256xf32, #tpu.memory_space<vmem>>, vector<64x48xf32>
    %cst_226 = arith.constant dense<0.000000e+00> : vector<1x48xf32>
    %665 = tpu.matmul %663, %664, %cst_226 {dimension_numbers = #tpu.dot_dimension_numbers<[1], [0], [0], [1], [0, 0, 1, 1], [], []>} : vector<1x64xf32>, vector<64x48xf32>, vector<1x48xf32> -> vector<1x48xf32>
    %666 = vector.extract_strided_slice %665 {offsets = [0, 0], sizes = [1, 16], strides = [1, 1]} : vector<1x48xf32> to vector<1x16xf32>
    %667 = arith.mulf %9, %577 : vector<1x16xf32>
    %668 = arith.addf %666, %667 : vector<1x16xf32>
    %669 = arith.addf %668, %12 : vector<1x16xf32>
    %cst_227 = arith.constant 5.000000e-01 : f32
    %670 = vector.broadcast %cst_227 : f32 to vector<1x16xf32>
    %671 = arith.mulf %670, %669 : vector<1x16xf32>
    %672 = math.tanh %671 : vector<1x16xf32>
    %cst_228 = arith.constant 5.000000e-01 : f32
    %673 = vector.broadcast %cst_228 : f32 to vector<1x16xf32>
    %674 = arith.mulf %673, %672 : vector<1x16xf32>
    %cst_229 = arith.constant 5.000000e-01 : f32
    %675 = vector.broadcast %cst_229 : f32 to vector<1x16xf32>
    %676 = arith.addf %674, %675 : vector<1x16xf32>
    %677 = vector.extract_strided_slice %665 {offsets = [0, 16], sizes = [1, 16], strides = [1, 1]} : vector<1x48xf32> to vector<1x16xf32>
    %678 = arith.mulf %10, %577 : vector<1x16xf32>
    %679 = arith.addf %677, %678 : vector<1x16xf32>
    %680 = arith.addf %679, %13 : vector<1x16xf32>
    %cst_230 = arith.constant 5.000000e-01 : f32
    %681 = vector.broadcast %cst_230 : f32 to vector<1x16xf32>
    %682 = arith.mulf %681, %680 : vector<1x16xf32>
    %683 = math.tanh %682 : vector<1x16xf32>
    %cst_231 = arith.constant 5.000000e-01 : f32
    %684 = vector.broadcast %cst_231 : f32 to vector<1x16xf32>
    %685 = arith.mulf %684, %683 : vector<1x16xf32>
    %cst_232 = arith.constant 5.000000e-01 : f32
    %686 = vector.broadcast %cst_232 : f32 to vector<1x16xf32>
    %687 = arith.addf %685, %686 : vector<1x16xf32>
    %688 = vector.extract_strided_slice %665 {offsets = [0, 32], sizes = [1, 16], strides = [1, 1]} : vector<1x48xf32> to vector<1x16xf32>
    %689 = arith.mulf %687, %577 : vector<1x16xf32>
    %690 = arith.mulf %11, %689 : vector<1x16xf32>
    %691 = arith.addf %688, %690 : vector<1x16xf32>
    %692 = arith.addf %691, %14 : vector<1x16xf32>
    %693 = math.tanh %692 : vector<1x16xf32>
    %694 = arith.mulf %676, %693 : vector<1x16xf32>
    %cst_233 = arith.constant 1.000000e+00 : f32
    %695 = vector.broadcast %cst_233 : f32 to vector<1x16xf32>
    %696 = arith.subf %695, %676 : vector<1x16xf32>
    %697 = arith.mulf %696, %577 : vector<1x16xf32>
    %698 = arith.addf %694, %697 : vector<1x16xf32>
    %699 = tpu.concatenate %698, %663, %615, %613 in 1 : vector<1x16xf32>, vector<1x64xf32>, vector<1x64xf32>, vector<1x64xf32> -> vector<1x208xf32>
    %c160_234 = arith.constant 160 : index
    %c0_235 = arith.constant 0 : index
    %700 = vector.load %arg1[%c160_234, %c0_235] : memref<448x256xf32, #tpu.memory_space<vmem>>, vector<208x256xf32>
    %cst_236 = arith.constant dense<0.000000e+00> : vector<1x256xf32>
    %701 = tpu.matmul %699, %700, %cst_236 {dimension_numbers = #tpu.dot_dimension_numbers<[1], [0], [0], [1], [0, 0, 1, 1], [], []>} : vector<1x208xf32>, vector<208x256xf32>, vector<1x256xf32> -> vector<1x256xf32>
    %702 = vector.extract_strided_slice %701 {offsets = [0, 0], sizes = [1, 64], strides = [1, 1]} : vector<1x256xf32> to vector<1x64xf32>
    %703 = arith.addf %702, %4 : vector<1x64xf32>
    %cst_237 = arith.constant 5.000000e-01 : f32
    %704 = vector.broadcast %cst_237 : f32 to vector<1x64xf32>
    %705 = arith.mulf %704, %703 : vector<1x64xf32>
    %706 = math.tanh %705 : vector<1x64xf32>
    %cst_238 = arith.constant 5.000000e-01 : f32
    %707 = vector.broadcast %cst_238 : f32 to vector<1x64xf32>
    %708 = arith.mulf %707, %706 : vector<1x64xf32>
    %cst_239 = arith.constant 5.000000e-01 : f32
    %709 = vector.broadcast %cst_239 : f32 to vector<1x64xf32>
    %710 = arith.addf %708, %709 : vector<1x64xf32>
    %711 = vector.extract_strided_slice %701 {offsets = [0, 64], sizes = [1, 64], strides = [1, 1]} : vector<1x256xf32> to vector<1x64xf32>
    %712 = arith.addf %711, %5 : vector<1x64xf32>
    %cst_240 = arith.constant 5.000000e-01 : f32
    %713 = vector.broadcast %cst_240 : f32 to vector<1x64xf32>
    %714 = arith.mulf %713, %712 : vector<1x64xf32>
    %715 = math.tanh %714 : vector<1x64xf32>
    %cst_241 = arith.constant 5.000000e-01 : f32
    %716 = vector.broadcast %cst_241 : f32 to vector<1x64xf32>
    %717 = arith.mulf %716, %715 : vector<1x64xf32>
    %cst_242 = arith.constant 5.000000e-01 : f32
    %718 = vector.broadcast %cst_242 : f32 to vector<1x64xf32>
    %719 = arith.addf %717, %718 : vector<1x64xf32>
    %720 = vector.extract_strided_slice %701 {offsets = [0, 128], sizes = [1, 64], strides = [1, 1]} : vector<1x256xf32> to vector<1x64xf32>
    %721 = arith.addf %720, %6 : vector<1x64xf32>
    %cst_243 = arith.constant 5.000000e-01 : f32
    %722 = vector.broadcast %cst_243 : f32 to vector<1x64xf32>
    %723 = arith.mulf %722, %721 : vector<1x64xf32>
    %724 = math.tanh %723 : vector<1x64xf32>
    %cst_244 = arith.constant 5.000000e-01 : f32
    %725 = vector.broadcast %cst_244 : f32 to vector<1x64xf32>
    %726 = arith.mulf %725, %724 : vector<1x64xf32>
    %cst_245 = arith.constant 5.000000e-01 : f32
    %727 = vector.broadcast %cst_245 : f32 to vector<1x64xf32>
    %728 = arith.addf %726, %727 : vector<1x64xf32>
    %729 = vector.extract_strided_slice %701 {offsets = [0, 192], sizes = [1, 64], strides = [1, 1]} : vector<1x256xf32> to vector<1x64xf32>
    %730 = arith.addf %729, %7 : vector<1x64xf32>
    %731 = math.tanh %730 : vector<1x64xf32>
    %732 = arith.mulf %710, %731 : vector<1x64xf32>
    %733 = arith.mulf %719, %613 : vector<1x64xf32>
    %734 = arith.addf %732, %733 : vector<1x64xf32>
    %735 = math.tanh %734 : vector<1x64xf32>
    %736 = arith.mulf %728, %735 : vector<1x64xf32>
    %c368_246 = arith.constant 368 : index
    %c0_247 = arith.constant 0 : index
    %737 = vector.load %arg1[%c368_246, %c0_247] : memref<448x256xf32, #tpu.memory_space<vmem>>, vector<64x32xf32>
    %cst_248 = arith.constant dense<0.000000e+00> : vector<1x32xf32>
    %738 = tpu.matmul %736, %737, %cst_248 {dimension_numbers = #tpu.dot_dimension_numbers<[1], [0], [0], [1], [0, 0, 1, 1], [], []>} : vector<1x64xf32>, vector<64x32xf32>, vector<1x32xf32> -> vector<1x32xf32>
    %739 = arith.addf %738, %8 : vector<1x32xf32>
    %cst_249 = arith.constant 5.000000e-01 : f32
    %740 = vector.broadcast %cst_249 : f32 to vector<1x32xf32>
    %741 = arith.mulf %740, %739 : vector<1x32xf32>
    %742 = math.tanh %741 : vector<1x32xf32>
    %cst_250 = arith.constant 5.000000e-01 : f32
    %743 = vector.broadcast %cst_250 : f32 to vector<1x32xf32>
    %744 = arith.mulf %743, %742 : vector<1x32xf32>
    %cst_251 = arith.constant 5.000000e-01 : f32
    %745 = vector.broadcast %cst_251 : f32 to vector<1x32xf32>
    %746 = arith.addf %744, %745 : vector<1x32xf32>
    %c5 = arith.constant 5 : index
    %c0_252 = arith.constant 0 : index
    %747 = vector.load %arg2[%c5, %c0_252] : memref<6x32xf32, #tpu.memory_space<vmem>>, vector<1x32xf32>
    tpu.vector_store %arg2[%c5, %c0_252], %746 {strides = array<i32>} : memref<6x32xf32, #tpu.memory_space<vmem>>, vector<1x32xf32>,
    return
  }
}

</mosaic_0001>

<bundles_post_ra>
// kernel: run_rnn.1
= control target key start
LH: loop header
LB: loop body
LE: loop exit
PB: predicated region body
PF: predicated region fallthrough
CT: control target
= control target key end

     0   :  { %7 = vsyncpa [#allocation3], 0  ;;  %s4283_s9 = smov [#allocation2]   ;;  %s5303_s0 = inlined_call_operand.vmem [shape: f32[6,32], index: 0, kind: input, shape index: {}]   ;;  %s5304_s1 = inlined_call_operand.hbm [shape: f32[448,256], index: 1, kind: input, shape index: {}]   ;;  %s5305_s2 = inlined_call_operand.vmem [shape: f32[6,32], index: 2, kind: output, shape index: {}]  }
   0x1   :  { %s15_s10 = sshll.u32 %s4283_s9, 4  ;;  %s4259_s13 = scalar_lea.hbm %s5304_s1, 14336  ;;  %s16_s10 = int_to_ptr.vmem [resolvable:$true] %s15_s10 }
   0x2   :  { %p4260_p0 = scmp.ne.s32.totalorder %s5304_s1, %s4259_s13  ;;  %p4263_p1 = scmp.lt.u32.totalorder %s4259_s13, %s5304_s1 }
   0x4   :  { %p4265_p2 = pnand %p4263_p1, %p4260_p0 }
   0x6   :  { %4268 = shalt.err (!%p4265_p2)
}
   0x7   :  { %s4269_s18 = scalar_lea.vmem %s16_s10, 14336  ;;  %p4274_p4 = scmp.lt.s32.totalorder %s16_s10, %s16_s10 }
   0x8   :  { %p4270_p3 = scmp.ne.s32.totalorder %s16_s10, %s4269_s18  ;;  %p4275_p5 = scmp.lt.s32.totalorder %s4269_s18, %s4269_s18 }
   0xa   :  { %p4276_p6 = por %p4275_p5, %p4274_p4 }
   0xc   :  { %p4277_p7 = pnand %p4276_p6, %p4270_p3 }
   0xe   :  { %4280 = shalt.err (!%p4277_p7)
}
   0xf   :  { %s4284_s19 = smov 256   ;;  %s4285_s20 = smov 16  }
  0x10   :  { %21 = dma.hbm_to_vmem [thread:$0]  %s5304_s1, 14336, %s16_s10, [#allocation3], %s4284_s19, %s4284_s19, %s4285_s20  }
  0x11   :  { %4281 = dma.done.wait [#allocation3], 14336  }
  0x12   :  { %4282 = vsyncadd [#allocation3], 4294952960  ;;  %v5306_v0 = vmov 0.0   ;;  %v42_v1 = vld [vmem:[#allocation2 + $0x8] sm:$0xff]  ;;  %v44_v2 = vld [vmem:[#allocation2 + $0x18] sm:$0xff]  ;;  %vm49_vm0 = vcmask 261120  }
  0x13   :  { %117 = vmatprep.mubr.f32.mxu0 %v5306_v0  ;;  %496 = vmatprep.mubr.f32.mxu1 %v5306_v0  ;;  %v41_v3 = vld [vmem:[#allocation2] sm:$0xff]  ;;  %v3533_v4 = vpack.c.bf16 %v44_v2, %v42_v1  ;;  %v43_v5 = vld [vmem:[#allocation2 + $0x10] sm:$0xff]  ;;  %v46_v6 = vld [vmem:[#allocation2 + $0x28] sm:$0xff]  ;;  %s4287_s24 = smov 64   ;;  %v5308_v54 = vmov 0.0|0.0   ;;  %vm4289_vm1 = vmmov 0  }
  0x14   :  { %v48_v7 = vld [vmem:[#allocation2 + $0x38] sm:$0xff]  ;;  %v3535_v8 = vpack.c.bf16 %v43_v5, %v41_v3  ;;  %v45_v10 = vld [vmem:[#allocation2 + $0x20] sm:$0xff]  ;;  %v47_v11 = vld [vmem:[#allocation2 + $0x30] sm:$0xff]  ;;  %vm140_vm2 = vcmask 523264   ;;  %s4291_s25 = smov 32   ;;  %s4292_s26 = smov 96  }
  0x15   :  { %v3537_v9 = vpack.c.bf16 %v48_v7, %v46_v6  ;;  %3534 = vmatprep.subr.bf16.mxu0 %v3533_v4  ;;  %v125_v12 = vld [vmem:[#allocation2 + $0x48] sm:$0xff]  ;;  %v127_v13 = vld [vmem:[#allocation2 + $0x58] sm:$0xff]  ;;  %v3539_v14 = vpack.c.bf16 %v47_v11, %v45_v10  ;;  %v124_v16 = vld [vmem:[#allocation2 + $0x40] sm:$0xff]  ;;  %vm374_vm3 = vcmask 130048   ;;  %vm376_vm4 = vcmask 654336   ;;  %s4293_s29 = smov 80  }
  0x16   :  { %3536 = vmatpush1.bf16.msra.mxu0 %v3535_v8  ;;  %v4324_v15 = vpack.c.bf16 %v127_v13, %v125_v12  ;;  %v126_v17 = vld [vmem:[#allocation2 + $0x50] sm:$0xff]  ;;  %v129_v18 = vld [vmem:[#allocation2 + $0x68] sm:$0xff]  ;;  %v131_v19 = vld [vmem:[#allocation2 + $0x78] sm:$0xff]  ;;  %vm626_vm5 = vcmask 253952  }
  0x17   :  { %3538 = vmatprep.subr.bf16.mxu0 %v3537_v9  ;;  %v40_v20 = vld [vmem:[%s5303_s0] sm:$0x3f]  ;;  %v4329_v21 = vpack.c.bf16 %v126_v17, %v124_v16  ;;  %v4332_v23 = vpack.c.bf16 %v131_v19, %v129_v18  ;;  %v130_v25 = vld [vmem:[#allocation2 + $0x70] sm:$0xff]  ;;  %v133_v26 = vld [vmem:[#allocation2 + $0x88] sm:$0xff]  ;;  %s4290_s0 = smov 112  }
  0x18   :  { %v26_v22 = vld [vmem:[#allocation2 + $0x361] ss:$0 sm:$0xff]  ;;  %v135_v27 = vld [vmem:[#allocation2 + $0x98] sm:$0xff]  ;;  %v134_v31 = vld [vmem:[#allocation2 + $0x90] sm:$0xff] }
  0x19   :  { %v128_v24 = vld [vmem:[#allocation2 + $0x60] sm:$0xff]  ;;  %222 = vrot.lane.b32.xlu0 %v26_v22, %s4287_s24  ;;  %v4340_v29 = vpack.c.bf16 %v135_v27, %v133_v26  ;;  %v137_v32 = vld [vmem:[#allocation2 + $0xa8] sm:$0xff]  ;;  %v139_v33 = vld [vmem:[#allocation2 + $0xb8] sm:$0xff] }
  0x1a   :  { %3540 = vmatpush1.bf16.msra.mxu0 %v3539_v14  ;;  %v4336_v28 = vpack.c.bf16 %v130_v25, %v128_v24  ;;  %v132_v30 = vld [vmem:[#allocation2 + $0x80] sm:$0xff]  ;;  %v4346_v35 = vpack.c.bf16 %v139_v33, %v137_v32  ;;  %v138_v37 = vld [vmem:[#allocation2 + $0xb0] sm:$0xff] }
  0x1b   :  { %3542 = vmatprep.subr.bf16.mxu0 %v4324_v15  ;;  %v4343_v34 = vpack.c.bf16 %v134_v31, %v132_v30  ;;  %v136_v36 = vld [vmem:[#allocation2 + $0xa0] sm:$0xff]  ;;  %v244_v51 = vld [vmem:[#allocation2 + $0xd0] sm:$0xff] }
  0x1c   :  { %v4349_v38 = vpack.c.bf16 %v138_v37, %v136_v36  ;;  %v4358_v41 = vld [vmem:[#allocation2 + $0x360] ss:$0 sm:$0xff]  ;;  %v246_v58 = vld [vmem:[#allocation2 + $0xf0] sm:$0xff]  ;;  %v4390_v12 = vld [vmem:[#allocation2 + $0x363] ss:$0 sm:$0xff] }
  0x1d   :  { %3173 = vmatmul.mubr.msk.f32.vlgmr.msra.gmra.mrb[0].mxu0 %vm49_vm0, %v40_v20  ;;  %v243_v50 = vld [vmem:[#allocation2 + $0xc0] sm:$0xff]  ;;  %v248_v62 = vld [vmem:[#allocation2 + $0x110] sm:$0xff] }
  0x1e   :  { %3544 = vmatpush1.bf16.msra.mxu0 %v4329_v21  ;;  %208 = vmatprep.mubr.f32.mxu0 %v5306_v0  ;;  %v4365_v52 = vpack.c.bf16 %v244_v51, %v243_v50  ;;  %v245_v57 = vld [vmem:[#allocation2 + $0xe0] sm:$0xff]  ;;  %v250_v6 = vld [vmem:[#allocation2 + $0x130] sm:$0xff] }
  0x1f   :  { %3546 = vmatprep.subr.bf16.mxu0 %v4332_v23  ;;  %v4370_v60 = vpack.c.bf16 %v246_v58, %v245_v57  ;;  %v247_v61 = vld [vmem:[#allocation2 + $0x100] sm:$0xff]  ;;  %v4385_v9 = vld [vmem:[#allocation2 + $0x372] ss:$0 sm:$0xff]  ;;  %v38_v11 = vld [vmem:[#allocation2 + $0x375] ss:$0 sm:$0xff] }
  0x20   :  { %v4375_v3 = vpack.c.bf16 %v248_v62, %v247_v61  ;;  %v249_v5 = vld [vmem:[#allocation2 + $0x120] sm:$0xff]  ;;  %v331_v10 = vmul.f32 0.0, %v4385_v9  ;;  %v384_v61 = vld [vmem:[#allocation2 + $0x170] sm:$0xff]  ;;  %v387_v62 = vld [vmem:[#allocation2 + $0x188] sm:$0xff] }
  0x21   :  { %v4380_v8 = vpack.c.bf16 %v250_v6, %v249_v5  ;;  %v4393_v16 = vld [vmem:[#allocation2 + $0x362] ss:$0 sm:$0xff]  ;;  %v388_v5 = vld [vmem:[#allocation2 + $0x190] sm:$0xff]  ;;  %v391_v6 = vld [vmem:[#allocation2 + $0x1a8] sm:$0xff] }
  0x22   :  { %3548 = vmatpush1.bf16.msra.mxu0 %v4336_v28  ;;  %333 = vrot.lane.b32.xlu1 %v331_v10, %s4285_s20  ;;  %v378_v50 = vld [vmem:[#allocation2 + $0x140] sm:$0xff] }
  0x23   :  { %3550 = vmatprep.subr.bf16.mxu0 %v4340_v29 }
  0x26   :  { %3552 = vmatpush1.bf16.msra.mxu0 %v4343_v34  ;;  %338 = vrot.lane.b32.xlu1 %v38_v11, %s4285_s20 }
  0x27   :  { %3554 = vmatprep.subr.bf16.mxu0 %v4346_v35 }
  0x2a   :  { %3556 = vmatpush1.bf16.msra.mxu0 %v4349_v38 }
  0x2b   :  { %3557 = vmatprep.subr.bf16.mxu0 %v5308_v54 }
  0x2d   :  { %209 = vmatmul.mubr.f32.vlgmr.msra.gmra.mrb[2].mxu0 %v5306_v0 }
  0x2e   :  { %3559 = vmatpush3.bf16.msra.mxu0 %v4365_v52  ;;  %3321 = vmatprep.mubr.msk.f32.mxu0 %vm4289_vm1, %v5306_v0 }
  0x2f   :  { %3560 = vmatprep.subr.bf16.mxu0 %v5308_v54 }
  0x32   :  { %3562 = vmatpush3.bf16.msra.mxu0 %v4370_v60 }
  0x33   :  { %3563 = vmatprep.subr.bf16.mxu0 %v5308_v54 }
  0x36   :  { %3565 = vmatpush3.bf16.msra.mxu0 %v4375_v3 }
  0x37   :  { %3566 = vmatprep.subr.bf16.mxu0 %v5308_v54 }
  0x3a   :  { %3568 = vmatpush3.bf16.msra.mxu0 %v4380_v8 }
  0x3b   :  { %3621 = vmatprep.subr.bf16.mxu0 %v5308_v54 }
  0x8b   :  { %v4360_v43 = vpop.permute.xlu0 %222 }
  0x94   :  { %v334_v24 = vpop.permute.xlu1 %333 }
  0x98   :  { %v4405_v26 = vpop.permute.xlu1 %338 }
  0x99   :  { %5331 = vst [vmem:[#allocation5_spill] sm:$0xff] %v4405_v26 }
  0xf0   :  { %v4354_v39 = vpop.f32.mrb[0].mxu0 }
  0xf1   :  { %v4356_v40 = vpop.f32.mrb[1].mxu0 }
 0x100   :  { %v210_v42 = vpop.f32.mrb[2].mxu0 }
 0x101   :  { %v215_v44 = vadd.f32 %v210_v42, %v4354_v39  ;;  %v212_v45 = vpop.f32.mrb[3].mxu0 }
 0x103   :  { %v216_v46 = vadd.f32 %v215_v44, %v4358_v41  ;;  %v225_v47 = vadd.f32 %v4360_v43, %v215_v44  ;;  %v39_v44 = vld [vmem:[#allocation2 + $0x376] ss:$0 sm:$0xff] }
 0x105   :  { %v217_v48 = vmul.f32 0.5, %v216_v46  ;;  %v226_v49 = vmul.f32 0.5, %v225_v47 }
 0x107   :  { %4104 = vtanh.f32 %v217_v48  ;;  %v379_v48 = vld [vmem:[#allocation2 + $0x148] sm:$0xff] }
 0x108   :  { %4106 = vtanh.f32 %v226_v49  ;;  %v381_v49 = vld [vmem:[#allocation2 + $0x158] sm:$0xff] }
 0x109   :  { %v4417_v51 = vpack.c.bf16 %v381_v49, %v379_v48  ;;  %v402_v48 = vld [vmem:[#allocation2 + $0x200] sm:$0xff]  ;;  %v404_v49 = vld [vmem:[#allocation2 + $0x210] sm:$0xff] }
 0x10b   :  { %3570 = vmatprep.subr.bf16.mxu1 %v4417_v51 }
 0x111   :  { %v4105_v53 = vpop.eup %4104 }
 0x112   :  { %v4107_v55 = vpop.eup %4106  ;;  %v219_v56 = vmul.f32 0.5, %v4105_v53  ;;  %v380_v53 = vld [vmem:[#allocation2 + $0x150] sm:$0xff] }
 0x113   :  { %v228_v59 = vmul.f32 0.5, %v4107_v55  ;;  %v383_v55 = vld [vmem:[#allocation2 + $0x168] sm:$0xff]  ;;  %v4419_v57 = vpack.c.bf16 %v380_v53, %v378_v50  ;;  %v409_v53 = vld [vmem:[#allocation2 + $0x238] sm:$0xff] }
 0x114   :  { %v220_v63 = vadd.f32 0.5, %v219_v56  ;;  %v385_v56 = vld [vmem:[#allocation2 + $0x178] sm:$0xff]  ;;  %v407_v50 = vld [vmem:[#allocation2 + $0x228] sm:$0xff] }
 0x115   :  { %v229_v1 = vadd.f32 0.5, %v228_v59  ;;  %v4421_v58 = vpack.c.bf16 %v385_v56, %v383_v55  ;;  %v382_v59 = vld [vmem:[#allocation2 + $0x160] sm:$0xff]  ;;  %3572 = vmatpush1.bf16.msra.mxu1 %v4419_v57  ;;  %v4455_v55 = vpack.c.bf16 %v404_v49, %v402_v48  ;;  %v4458_v56 = vpack.c.bf16 %v409_v53, %v407_v50  ;;  %v423_v48 = vld [vmem:[#allocation2 + $0x2a8] sm:$0xff]  ;;  %v425_v49 = vld [vmem:[#allocation2 + $0x2b8] sm:$0xff] }
 0x116   :  { %v240_v2 = vsub.f32 1.0, %v220_v63  ;;  %v4482_v53 = vpack.c.bf16 %v425_v49, %v423_v48  ;;  %v30_v49 = vld [vmem:[#allocation2 + $0x365] ss:$0 sm:$0xff] }
 0x117   :  { %v230_v4 = vmul.f32 0.0, %v229_v1  ;;  %v4425_v1 = vpack.c.bf16 %v384_v61, %v382_v59  ;;  %3574 = vmatprep.subr.bf16.mxu1 %v4421_v58  ;;  %v406_v59 = vld [vmem:[#allocation2 + $0x220] sm:$0xff]  ;;  %v408_v61 = vld [vmem:[#allocation2 + $0x230] sm:$0xff] }
 0x118   :  { %v241_v7 = vmul.f32 %v240_v2, %v212_v45  ;;  %v4413_v45 = vld [vmem:[#allocation2 + $0x373] ss:$0 sm:$0xff] }
 0x119   :  { %232 = vrot.lane.b32.xlu0 %v230_v4, %s4287_s24  ;;  %v386_v4 = vld [vmem:[#allocation2 + $0x180] sm:$0xff]  ;;  %3576 = vmatpush1.bf16.msra.mxu1 %v4425_v1 }
 0x11a   :  { %v4431_v10 = vpack.c.bf16 %v388_v5, %v386_v4  ;;  %v4461_v4 = vpack.c.bf16 %v408_v61, %v406_v59  ;;  %v422_v59 = vld [vmem:[#allocation2 + $0x2a0] sm:$0xff]  ;;  %v424_v61 = vld [vmem:[#allocation2 + $0x2b0] sm:$0xff] }
 0x18b   :  { %v233_v13 = vpop.permute.xlu0 %232 }
 0x18c   :  { %v235_v14 = vmul.f32 %v233_v13, %v4390_v12  ;;  %v390_v13 = vld [vmem:[#allocation2 + $0x1a0] sm:$0xff] }
 0x18e   :  { %v236_v17 = vadd.f32 %v235_v14, %v4356_v40  ;;  %v392_v14 = vld [vmem:[#allocation2 + $0x1b0] sm:$0xff] }
 0x190   :  { %v237_v18 = vadd.f32 %v236_v17, %v4393_v16  ;;  %v395_v17 = vld [vmem:[#allocation2 + $0x1c8] sm:$0xff] }
 0x192   :  { %4108 = vtanh.f32 %v237_v18  ;;  %v397_v18 = vld [vmem:[#allocation2 + $0x1d8] sm:$0xff] }
 0x19c   :  { %v4109_v19 = vpop.eup %4108 }
 0x19d   :  { %v239_v20 = vmul.f32 %v4109_v19, %v220_v63  ;;  %v389_v63 = vld [vmem:[#allocation2 + $0x198] sm:$0xff]  ;;  %v4437_v19 = vpack.c.bf16 %v392_v14, %v390_v13  ;;  %v415_v13 = vld [vmem:[#allocation2 + $0x268] sm:$0xff] }
 0x19e   :  { %v4428_v2 = vpack.c.bf16 %v389_v63, %v387_v62  ;;  %v411_v62 = vld [vmem:[#allocation2 + $0x248] sm:$0xff]  ;;  %v413_v63 = vld [vmem:[#allocation2 + $0x258] sm:$0xff] }
 0x19f   :  { %v4397_v22 = vadd.f32 %v241_v7, %v239_v20  ;;  %v393_v7 = vld [vmem:[#allocation2 + $0x1b8] sm:$0xff]  ;;  %v4440_v20 = vpack.c.bf16 %v397_v18, %v395_v17  ;;  %v4464_v5 = vpack.c.bf16 %v413_v63, %v411_v62  ;;  %v4485_v62 = vpack.c.bf16 %v424_v61, %v422_v59  ;;  %v4497_v59 = vld [vmem:[#allocation2 + $0x371] ss:$0 sm:$0xff] }
 0x1a0   :  { %3578 = vmatprep.subr.bf16.mxu1 %v4428_v2  ;;  %v4434_v11 = vpack.c.bf16 %v393_v7, %v391_v6  ;;  %v410_v6 = vld [vmem:[#allocation2 + $0x240] sm:$0xff]  ;;  %v412_v7 = vld [vmem:[#allocation2 + $0x250] sm:$0xff]  ;;  %v417_v14 = vld [vmem:[#allocation2 + $0x278] sm:$0xff]  ;;  %v324_v61 = vmul.f32 0.0, %v4497_v59 }
 0x1a1   :  { %3322 = vmatmul.mubr.msk.f32.vlgmr.msra.gmra.mrb[4].mxu0 %vm140_vm2, %v4397_v22  ;;  %3580 = vmatpush1.bf16.msra.mxu1 %v4431_v10  ;;  %v4467_v17 = vpack.c.bf16 %v412_v7, %v410_v6  ;;  %v4470_v18 = vpack.c.bf16 %v417_v14, %v415_v13  ;;  %v427_v13 = vld [vmem:[#allocation2 + $0x2c8] sm:$0xff]  ;;  %v429_v14 = vld [vmem:[#allocation2 + $0x2d8] sm:$0xff] }
 0x1a2   :  { %3340 = vmatprep.mubr.msk.f32.mxu0 %vm4289_vm1, %v5306_v0  ;;  %3582 = vmatprep.subr.bf16.mxu1 %v4434_v11 }
 0x1a5   :  { %3584 = vmatpush1.bf16.msra.mxu1 %v4437_v19 }
 0x1a6   :  { %3586 = vmatprep.subr.bf16.mxu1 %v4440_v20 }
 0x274   :  { %v4403_v25 = vpop.f32.mrb[4].mxu0 }
 0x275   :  { %v336_v27 = vadd.f32 %v334_v24, %v4403_v25  ;;  %v3323_v30 = vpop.f32.mrb[5].mxu0  ;;  %v394_v24 = vld [vmem:[#allocation2 + $0x1c0] sm:$0xff] }
 0x276   :  { %v399_v30 = vld [vmem:[#allocation2 + $0x1e8] sm:$0xff] }
 0x277   :  { %v341_v31 = vadd.f32 %v4405_v26, %v336_v27  ;;  %v396_v27 = vld [vmem:[#allocation2 + $0x1d0] sm:$0xff] }
 0x279   :  { %v342_v32 = vmul.f32 0.5, %v341_v31  ;;  %v401_v31 = vld [vmem:[#allocation2 + $0x1f8] sm:$0xff] }
 0x27b   :  { %4110 = vtanh.f32 %v342_v32  ;;  %v4443_v32 = vpack.c.bf16 %v396_v27, %v394_v24  ;;  %v414_v24 = vld [vmem:[#allocation2 + $0x260] sm:$0xff]  ;;  %v416_v27 = vld [vmem:[#allocation2 + $0x270] sm:$0xff] }
 0x27d   :  { %3588 = vmatpush1.bf16.msra.mxu1 %v4443_v32 }
 0x285   :  { %v4111_v33 = vpop.eup %4110 }
 0x286   :  { %v344_v36 = vmul.f32 0.5, %v4111_v33  ;;  %v4446_v33 = vpack.c.bf16 %v401_v31, %v399_v30  ;;  %v419_v30 = vld [vmem:[#allocation2 + $0x288] sm:$0xff]  ;;  %v421_v31 = vld [vmem:[#allocation2 + $0x298] sm:$0xff] }
 0x288   :  { %v345_v37 = vadd.f32 0.5, %v344_v36  ;;  %v398_v36 = vld [vmem:[#allocation2 + $0x1e0] sm:$0xff]  ;;  %3590 = vmatprep.subr.bf16.mxu1 %v4446_v33 }
 0x28a   :  { %v346_v42 = vmul.f32 0.0, %v345_v37  ;;  %v400_v37 = vld [vmem:[#allocation2 + $0x1f0] sm:$0xff] }
 0x28c   :  { %348 = vrot.lane.b32.xlu0 %v346_v42, %s4290_s0  ;;  %v403_v42 = vld [vmem:[#allocation2 + $0x208] sm:$0xff] }
 0x290   :  { %358 = vrot.lane.b32.xlu0 %v39_v44, %s4291_s25  ;;  %v405_v44 = vld [vmem:[#allocation2 + $0x218] sm:$0xff] }
 0x294   :  { %371 = vrot.lane.b32.xlu0 %v4397_v22, %s4285_s20 }
 0x2fe   :  { %v349_v46 = vpop.permute.xlu0 %348 }
 0x2ff   :  { %v351_v47 = vmul.f32 %v349_v46, %v4413_v45  ;;  %v4449_v46 = vpack.c.bf16 %v400_v37, %v398_v36  ;;  %v4473_v36 = vpack.c.bf16 %v416_v27, %v414_v24  ;;  %v4476_v37 = vpack.c.bf16 %v421_v31, %v419_v30  ;;  %v426_v30 = vld [vmem:[#allocation2 + $0x2c0] sm:$0xff]  ;;  %v428_v31 = vld [vmem:[#allocation2 + $0x2d0] sm:$0xff] }
 0x300   :  { %v3617_v27 = vpack.c.bf16 %v429_v14, %v427_v13 }
 0x301   :  { %353 = vrot.lane.b32.xlu1 %v351_v47, %s4291_s25  ;;  %v4452_v47 = vpack.c.bf16 %v405_v44, %v403_v42  ;;  %3592 = vmatpush1.bf16.msra.mxu1 %v4449_v46  ;;  %v418_v42 = vld [vmem:[#allocation2 + $0x280] sm:$0xff]  ;;  %v420_v44 = vld [vmem:[#allocation2 + $0x290] sm:$0xff] }
 0x302   :  { %v4479_v50 = vpack.c.bf16 %v420_v44, %v418_v42  ;;  %v4490_v7 = vpop.permute.xlu0 %358  ;;  %v3619_v42 = vpack.c.bf16 %v428_v31, %v426_v30  ;;  %v32_v44 = vld [vmem:[#allocation2 + $0x367] ss:$0 sm:$0xff] }
 0x303   :  { %3594 = vmatprep.subr.bf16.mxu1 %v4452_v47  ;;  %5332 = vst [vmem:[#allocation6_spill] sm:$0xff] %v4490_v7  ;;  %523 = vrot.lane.b32.xlu0 %v32_v44, %s4287_s24 }
 0x305   :  { %3596 = vmatpush1.bf16.msra.mxu1 %v4455_v55 }
 0x306   :  { %3598 = vmatprep.subr.bf16.mxu1 %v4458_v56  ;;  %v372_v54 = vpop.permute.xlu0 %371 }
 0x309   :  { %3600 = vmatpush1.bf16.msra.mxu1 %v4461_v4 }
 0x30a   :  { %3602 = vmatprep.subr.bf16.mxu1 %v4464_v5 }
 0x30d   :  { %3604 = vmatpush1.bf16.msra.mxu1 %v4467_v17 }
 0x30e   :  { %3606 = vmatprep.subr.bf16.mxu1 %v4470_v18 }
 0x311   :  { %3608 = vmatpush1.bf16.msra.mxu1 %v4473_v36 }
 0x312   :  { %3610 = vmatprep.subr.bf16.mxu1 %v4476_v37 }
 0x315   :  { %3612 = vmatpush1.bf16.msra.mxu1 %v4479_v50 }
 0x316   :  { %3614 = vmatprep.subr.bf16.mxu1 %v4482_v53 }
 0x319   :  { %3616 = vmatpush1.bf16.msra.mxu1 %v4485_v62 }
 0x31a   :  { %3618 = vmatprep.subr.bf16.mxu1 %v3617_v27 }
 0x31d   :  { %3620 = vmatpush1.bf16.msra.mxu1 %v3619_v42 }
 0x31e   :  { %3662 = vmatprep.subr.bf16.mxu1 %v4417_v51 }
 0x373   :  { %v354_v63 = vpop.permute.xlu1 %353 }
 0x374   :  { %v356_v6 = vadd.f32 %v354_v63, %v4403_v25  ;;  %v325_v63 = vadd.f32 %v324_v61, %v4403_v25  ;;  %v4562_v61 = vld [vmem:[#allocation2 + $0x364] ss:$0 sm:$0xff] }
 0x376   :  { %v361_v24 = vadd.f32 %v4490_v7, %v356_v6  ;;  %v4501_v6 = vld [vmem:[#allocation2 + $0x374] ss:$0 sm:$0xff] }
 0x377   :  { %v326_v51 = vadd.f32 %v325_v63, %v4501_v6 }
 0x378   :  { %4112 = vtanh.f32 %v361_v24 }
 0x379   :  { %v327_v13 = vmul.f32 0.5, %v326_v51 }
 0x37b   :  { %4114 = vtanh.f32 %v327_v13  ;;  %v4565_v13 = vld [vmem:[#allocation2 + $0x366] ss:$0 sm:$0xff] }
 0x382   :  { %v4113_v48 = vpop.eup %4112 }
 0x383   :  { %364 = vrot.lane.b32.xlu1 %v4113_v48, %s4292_s26 }
 0x385   :  { %v4115_v14 = vpop.eup %4114 }
 0x386   :  { %v329_v24 = vmul.f32 0.5, %v4115_v14 }
 0x387   :  { %509 = vrot.lane.b32.xlu1 %v30_v49, %s4287_s24 }
 0x388   :  { %v330_v30 = vadd.f32 0.5, %v329_v24 }
 0x38a   :  { %v368_v31 = vsub.f32 1.0, %v330_v30 }
 0x38c   :  { %v369_v0 = vmul.f32 0.0, %v368_v31 }
 0x3f5   :  { %v365_v44 = vpop.permute.xlu1 %364 }
 0x3f6   :  { %v367_v48 = vmul.f32 %v365_v44, %v330_v30 }
 0x3f8   :  { %v4504_v49 = vadd.f32 %v369_v0, %v367_v48  ;;  %v5333_v0 = vmov 0.0|0.0  }
 0x3fa   :  { %v375_v25 = vsel %vm374_vm3, %v4504_v49, %v372_v54  ;;  %v4533_v54 = vpop.permute.xlu1 %509 }
 0x3fb   :  { %3175 = vmatmul.mubr.msk.f32.vlgmr.msra.gmra.mrb[0].mxu1 %vm376_vm4, %v375_v25 }
 0x3fc   :  { %3664 = vmatpush1.bf16.msra.mxu1 %v4419_v57  ;;  %v4535_v57 = vpop.permute.xlu0 %523 }
 0x3fd   :  { %3666 = vmatprep.subr.bf16.mxu1 %v4421_v58 }
 0x400   :  { %3668 = vmatpush1.bf16.msra.mxu1 %v4425_v1 }
 0x401   :  { %3670 = vmatprep.subr.bf16.mxu1 %v4428_v2 }
 0x404   :  { %3672 = vmatpush1.bf16.msra.mxu1 %v4431_v10 }
 0x405   :  { %3674 = vmatprep.subr.bf16.mxu1 %v4434_v11 }
 0x408   :  { %3676 = vmatpush1.bf16.msra.mxu1 %v4437_v19  ;;  %v541_v19 = vld [vmem:[#allocation2 + $0x2e0] sm:$0xff] }
 0x409   :  { %3678 = vmatprep.subr.bf16.mxu1 %v4440_v20  ;;  %v542_v20 = vld [vmem:[#allocation2 + $0x2f0] sm:$0xff] }
 0x40c   :  { %3680 = vmatpush1.bf16.msra.mxu1 %v4443_v32  ;;  %v4539_v32 = vpack.c.bf16 %v542_v20, %v541_v19 }
 0x40d   :  { %3682 = vmatprep.subr.bf16.mxu1 %v4446_v33  ;;  %v543_v33 = vld [vmem:[#allocation2 + $0x300] sm:$0xff] }
 0x40e   :  { %3623 = vmatpush3.bf16.msra.mxu0 %v4539_v32 }
 0x40f   :  { %3624 = vmatprep.subr.bf16.mxu0 %v5333_v0 }
 0x410   :  { %3684 = vmatpush1.bf16.msra.mxu1 %v4449_v46  ;;  %v544_v46 = vld [vmem:[#allocation2 + $0x310] sm:$0xff] }
 0x411   :  { %3686 = vmatprep.subr.bf16.mxu1 %v4452_v47  ;;  %v4543_v47 = vpack.c.bf16 %v544_v46, %v543_v33 }
 0x413   :  { %3626 = vmatpush3.bf16.msra.mxu0 %v4543_v47 }
 0x414   :  { %3688 = vmatpush1.bf16.msra.mxu1 %v4455_v55  ;;  %v545_v55 = vld [vmem:[#allocation2 + $0x320] sm:$0xff]  ;;  %3627 = vmatprep.subr.bf16.mxu0 %v5333_v0 }
 0x415   :  { %3690 = vmatprep.subr.bf16.mxu1 %v4458_v56  ;;  %v546_v56 = vld [vmem:[#allocation2 + $0x330] sm:$0xff] }
 0x418   :  { %3692 = vmatpush1.bf16.msra.mxu1 %v4461_v4  ;;  %v4546_v4 = vpack.c.bf16 %v546_v56, %v545_v55 }
 0x419   :  { %3694 = vmatprep.subr.bf16.mxu1 %v4464_v5 }
 0x41a   :  { %3629 = vmatpush3.bf16.msra.mxu0 %v4546_v4 }
 0x41b   :  { %3630 = vmatprep.subr.bf16.mxu0 %v5333_v0 }
 0x41c   :  { %3696 = vmatpush1.bf16.msra.mxu1 %v4467_v17  ;;  %v547_v17 = vld [vmem:[#allocation2 + $0x340] sm:$0xff] }
 0x41d   :  { %3698 = vmatprep.subr.bf16.mxu1 %v4470_v18  ;;  %v548_v18 = vld [vmem:[#allocation2 + $0x350] sm:$0xff] }
 0x420   :  { %3700 = vmatpush1.bf16.msra.mxu1 %v4473_v36 }
 0x421   :  { %3702 = vmatprep.subr.bf16.mxu1 %v4476_v37  ;;  %v729_v37 = vrot.slane %v4397_v22, 7 }
 0x424   :  { %3704 = vmatpush1.bf16.msra.mxu1 %v4479_v50 }
 0x425   :  { %3706 = vmatprep.subr.bf16.mxu1 %v4482_v53  ;;  %v4552_v53 = vpack.c.bf16 %v548_v18, %v547_v17 }
 0x427   :  { %3632 = vmatpush3.bf16.msra.mxu0 %v4552_v53 }
 0x428   :  { %3708 = vmatpush1.bf16.msra.mxu1 %v4485_v62  ;;  %3634 = vmatprep.subr.bf16.mxu0 %v4324_v15 }
 0x429   :  { %3710 = vmatprep.subr.bf16.mxu1 %v3617_v27 }
 0x42c   :  { %3712 = vmatpush1.bf16.msra.mxu1 %v3619_v42  ;;  %v842_v42 = vmul.f32 %v4504_v49, %v4385_v9 }
 0x42d   :  { %3805 = vmatprep.subr.bf16.mxu1 %v5333_v0 }
 0x4ce   :  { %v498_v58 = vpop.f32.mrb[0].mxu1 }
 0x4cf   :  { %v512_v1 = vadd.f32 %v4533_v54, %v498_v58  ;;  %v500_v2 = vpop.f32.mrb[1].mxu1  ;;  %v503_v63 = vadd.f32 %v498_v58, %v4562_v61 }
 0x4d0   :  { %v526_v10 = vadd.f32 %v4535_v57, %v500_v2  ;;  %v517_v14 = vadd.f32 %v500_v2, %v4565_v13  ;;  %v5334_v2 = vmov 0.0  }
 0x4d1   :  { %v513_v11 = vmul.f32 0.5, %v512_v1  ;;  %v504_v51 = vmul.f32 0.5, %v503_v63 }
 0x4d2   :  { %4116 = vtanh.f32 %v526_v10  ;;  %v518_v30 = vmul.f32 0.5, %v517_v14 }
 0x4d3   :  { %4118 = vtanh.f32 %v513_v11 }
 0x4d4   :  { %4120 = vtanh.f32 %v504_v51 }
 0x4d5   :  { %4122 = vtanh.f32 %v518_v30 }
 0x4dc   :  { %v4117_v5 = vpop.eup %4116 }
 0x4dd   :  { %529 = vrot.lane.b32.xlu1 %v4117_v5, %s4287_s24  ;;  %v4119_v36 = vpop.eup %4118 }
 0x4de   :  { %v515_v50 = vmul.f32 0.5, %v4119_v36  ;;  %v4121_v24 = vpop.eup %4120 }
 0x4df   :  { %v506_v31 = vmul.f32 0.5, %v4121_v24  ;;  %v4123_v10 = vpop.eup %4122 }
 0x4e0   :  { %v516_v62 = vadd.f32 0.5, %v515_v50  ;;  %v520_v58 = vmul.f32 0.5, %v4123_v10 }
 0x4e1   :  { %730 = vrot.lane.b32.xlu1 %v729_v37, %s4287_s24  ;;  %v507_v15 = vadd.f32 0.5, %v506_v31 }
 0x4e2   :  { %v533_v27 = vmul.f32 0.0, %v516_v62  ;;  %v521_v11 = vadd.f32 0.5, %v520_v58 }
 0x4e4   :  { %535 = vrot.lane.b32.xlu0 %v533_v27, %s4287_s24 }
 0x4e5   :  { %844 = vrot.lane.b32.xlu1 %v842_v42, %s4285_s20 }
 0x54f   :  { %v530_v44 = vpop.permute.xlu1 %529 }
 0x550   :  { %v532_v48 = vmul.f32 %v530_v44, %v507_v15 }
 0x553   :  { %v731_v62 = vpop.permute.xlu1 %730 }
 0x556   :  { %v536_v25 = vpop.permute.xlu0 %535 }
 0x557   :  { %v4568_v1 = vadd.f32 %v536_v25, %v532_v48  ;;  %v845_v58 = vpop.permute.xlu1 %844 }
 0x559   :  { %4124 = vtanh.f32 %v4568_v1 }
 0x563   :  { %v4125_v19 = vpop.eup %4124 }
 0x564   :  { %v4571_v20 = vmul.f32 %v4125_v19, %v521_v11 }
 0x566   :  { %3341 = vmatmul.mubr.msk.f32.vlgmr.msra.gmra.mrb[6].mxu0 %vm140_vm2, %v4571_v20 }
 0x567   :  { %3636 = vmatpush1.bf16.msra.mxu0 %v4329_v21  ;;  %708 = vmatprep.mubr.f32.mxu0 %v5334_v2  ;;  %v4596_v21 = vld [vmem:[#allocation2 + $0x370] ss:$0 sm:$0xff] }
 0x568   :  { %3638 = vmatprep.subr.bf16.mxu0 %v4332_v23 }
 0x56b   :  { %3640 = vmatpush1.bf16.msra.mxu0 %v4336_v28 }
 0x56c   :  { %3642 = vmatprep.subr.bf16.mxu0 %v4340_v29 }
 0x56f   :  { %3644 = vmatpush1.bf16.msra.mxu0 %v4343_v34 }
 0x570   :  { %3646 = vmatprep.subr.bf16.mxu0 %v4346_v35 }
 0x573   :  { %3648 = vmatpush1.bf16.msra.mxu0 %v4349_v38 }
 0x574   :  { %3649 = vmatprep.subr.bf16.mxu0 %v5333_v0 }
 0x576   :  { %3177 = vmatmul.mubr.msk.f32.vlgmr.msra.gmra.mrb[8].mxu0 %vm140_vm2, %v4397_v22 }
 0x577   :  { %3651 = vmatpush3.bf16.msra.mxu0 %v4365_v52  ;;  %3359 = vmatprep.mubr.msk.f32.mxu0 %vm4289_vm1, %v5334_v2 }
 0x578   :  { %3652 = vmatprep.subr.bf16.mxu0 %v5333_v0 }
 0x57b   :  { %3654 = vmatpush3.bf16.msra.mxu0 %v4370_v60 }
 0x57c   :  { %3655 = vmatprep.subr.bf16.mxu0 %v5333_v0 }
 0x57f   :  { %3657 = vmatpush3.bf16.msra.mxu0 %v4375_v3 }
 0x580   :  { %3658 = vmatprep.subr.bf16.mxu0 %v5333_v0 }
 0x583   :  { %3660 = vmatpush3.bf16.msra.mxu0 %v4380_v8 }
 0x584   :  { %3713 = vmatprep.subr.bf16.mxu0 %v5333_v0 }
 0x639   :  { %v618_v23 = vpop.f32.mrb[6].mxu0 }
 0x63a   :  { %v619_v28 = vadd.f32 %v618_v23, %v4596_v21  ;;  %v3342_v29 = vpop.f32.mrb[7].mxu0 }
 0x63c   :  { %v622_v34 = vmul.f32 0.5, %v619_v28 }
 0x63e   :  { %4126 = vtanh.f32 %v622_v34 }
 0x648   :  { %v4127_v35 = vpop.eup %4126 }
 0x649   :  { %v624_v38 = vmul.f32 0.5, %v4127_v35  ;;  %v710_v52 = vpop.f32.mrb[8].mxu0 }
 0x64a   :  { %v716_v60 = vrot.slane %v710_v52, 7  ;;  %v712_v3 = vpop.f32.mrb[9].mxu0 }
 0x64b   :  { %v625_v22 = vadd.f32 0.5, %v624_v38  ;;  %v749_v42 = vrot.slane %v712_v3, 7 }
 0x64c   :  { %v718_v33 = vadd.f32 %v716_v60, %v4354_v39 }
 0x64d   :  { %627 = vst.msk [vmem:[%s5305_s2] sm:$0x1] %vm626_vm5, %v625_v22 }
 0x64e   :  { %v719_v8 = vadd.f32 %v718_v33, %v4358_v41  ;;  %v724_v46 = vadd.f32 %v718_v33, %v4360_v43  ;;  %v835_v33 = vmul.f32 %v4504_v49, %v4497_v59 }
 0x650   :  { %v720_v55 = vmul.f32 0.5, %v719_v8  ;;  %v725_v56 = vmul.f32 0.5, %v724_v46 }
 0x652   :  { %4128 = vtanh.f32 %v720_v55 }
 0x653   :  { %4130 = vtanh.f32 %v725_v56 }
 0x65c   :  { %v4129_v5 = vpop.eup %4128 }
 0x65d   :  { %v4131_v17 = vpop.eup %4130  ;;  %v722_v18 = vmul.f32 0.5, %v4129_v5 }
 0x65e   :  { %v727_v36 = vmul.f32 0.5, %v4131_v17 }
 0x65f   :  { %v723_v37 = vadd.f32 0.5, %v722_v18 }
 0x660   :  { %v728_v50 = vadd.f32 0.5, %v727_v36 }
 0x661   :  { %v747_v27 = vsub.f32 1.0, %v723_v37 }
 0x662   :  { %v733_v63 = vmul.f32 %v731_v62, %v728_v50 }
 0x663   :  { %v751_v51 = vmul.f32 %v749_v42, %v747_v27 }
 0x664   :  { %v735_v14 = vrot.slane %v733_v63, 1 }
 0x666   :  { %736 = vrot.lane.b32.xlu0 %v735_v14, %s4287_s24 }
 0x66a   :  { %854 = vrot.lane.b32.xlu0 %v4504_v49, %s4285_s20 }
 0x6d8   :  { %v737_v41 = vpop.permute.xlu0 %736 }
 0x6d9   :  { %v739_v24 = vmul.f32 %v737_v41, %v4390_v12 }
 0x6db   :  { %v741_v30 = vrot.slane %v739_v24, 7 }
 0x6dd   :  { %v743_v31 = vadd.f32 %v741_v30, %v4356_v40 }
 0x6df   :  { %v744_v44 = vadd.f32 %v743_v31, %v4393_v16  ;;  %v1137_v31 = vld [vmem:[#allocation2 + $0x48] sm:$0xff] }
 0x6e1   :  { %4132 = vtanh.f32 %v744_v44  ;;  %v1139_v44 = vld [vmem:[#allocation2 + $0x58] sm:$0xff] }
 0x6eb   :  { %v4133_v15 = vpop.eup %4132 }
 0x6ec   :  { %v746_v48 = vmul.f32 %v4133_v15, %v723_v37  ;;  %v4657_v15 = vpack.c.bf16 %v1139_v44, %v1137_v31  ;;  %v1148_v31 = vld [vmem:[#allocation2 + $0xa0] sm:$0xff]  ;;  %v1150_v44 = vld [vmem:[#allocation2 + $0xb0] sm:$0xff] }
 0x6ee   :  { %v4612_v25 = vadd.f32 %v751_v51, %v746_v48 }
 0x6f0   :  { %v4615_v10 = vrot.slane %v4612_v25, 1 }
 0x6f2   :  { %3360 = vmatmul.mubr.msk.f32.vlgmr.msra.gmra.mrb[10].mxu0 %vm140_vm2, %v4615_v10 }
 0x6f3   :  { %3715 = vmatpush3.bf16.msra.mxu0 %v4539_v32  ;;  %3378 = vmatprep.mubr.msk.f32.mxu0 %vm4289_vm1, %v5334_v2 }
 0x6f4   :  { %3716 = vmatprep.subr.bf16.mxu0 %v5333_v0 }
 0x6f7   :  { %3718 = vmatpush3.bf16.msra.mxu0 %v4543_v47  ;;  %v855_v47 = vpop.permute.xlu0 %854 }
 0x6f8   :  { %3719 = vmatprep.subr.bf16.mxu0 %v5333_v0 }
 0x6fb   :  { %3721 = vmatpush3.bf16.msra.mxu0 %v4546_v4 }
 0x6fc   :  { %3722 = vmatprep.subr.bf16.mxu0 %v5333_v0 }
 0x6ff   :  { %3724 = vmatpush3.bf16.msra.mxu0 %v4552_v53 }
 0x700   :  { %3726 = vmatprep.subr.bf16.mxu0 %v4657_v15 }
 0x7c5   :  { %v831_v11 = vpop.f32.mrb[10].mxu0 }
 0x7c6   :  { %v847_v19 = vadd.f32 %v845_v58, %v831_v11  ;;  %v3361_v23 = vpop.f32.mrb[11].mxu0  ;;  %v836_v8 = vadd.f32 %v835_v33, %v831_v11 }
 0x7c8   :  { %v848_v32 = vadd.f32 %v847_v19, %v4405_v26  ;;  %v837_v46 = vadd.f32 %v836_v8, %v4501_v6  ;;  %v1237_v19 = vrot.slane %v4612_v25, 7  ;;  %v1136_v8 = vld [vmem:[#allocation2 + $0x40] sm:$0xff] }
 0x7ca   :  { %v849_v28 = vmul.f32 0.5, %v848_v32  ;;  %v838_v55 = vmul.f32 0.5, %v837_v46  ;;  %v1138_v46 = vld [vmem:[#allocation2 + $0x50] sm:$0xff] }
 0x7cc   :  { %4134 = vtanh.f32 %v849_v28 }
 0x7d6   :  { %v4135_v29 = vpop.eup %4134 }
 0x7d7   :  { %v851_v34 = vmul.f32 0.5, %v4135_v29 }
 0x7d9   :  { %v852_v35 = vadd.f32 0.5, %v851_v34 }
 0x7db   :  { %v857_v38 = vmul.f32 %v855_v47, %v852_v35 }
 0x7dd   :  { %859 = vrot.lane.b32.xlu1 %v857_v38, %s4290_s0 }
 0x84f   :  { %v860_v4 = vpop.permute.xlu1 %859 }
 0x850   :  { %v862_v52 = vmul.f32 %v860_v4, %v4413_v45 }
 0x852   :  { %864 = vrot.lane.b32.xlu0 %v862_v52, %s4291_s25 }
 0x856   :  { %878 = vrot.lane.b32.xlu0 %v4615_v10, %s4285_s20 }
 0x85a   :  { %885 = vrot.lane.b32.xlu0 %v4568_v1, %s4285_s20 }
 0x8c4   :  { %v865_v53 = vpop.permute.xlu0 %864 }
 0x8c5   :  { %v867_v60 = vadd.f32 %v865_v53, %v831_v11 }
 0x8c7   :  { %v868_v3 = vadd.f32 %v867_v60, %v4490_v7 }
 0x8c8   :  { %v879_v36 = vpop.permute.xlu0 %878 }
 0x8c9   :  { %4136 = vtanh.f32 %v868_v3 }
 0x8ca   :  { %4138 = vtanh.f32 %v838_v55  ;;  %v1141_v55 = vld [vmem:[#allocation2 + $0x68] sm:$0xff] }
 0x8d3   :  { %v4137_v22 = vpop.eup %4136 }
 0x8d4   :  { %871 = vrot.lane.b32.xlu1 %v4137_v22, %s4292_s26  ;;  %v4139_v56 = vpop.eup %4138 }
 0x8d5   :  { %v840_v5 = vmul.f32 0.5, %v4139_v56  ;;  %v1143_v56 = vld [vmem:[#allocation2 + $0x78] sm:$0xff] }
 0x8d7   :  { %v841_v17 = vadd.f32 0.5, %v840_v5 }
 0x8d8   :  { %881 = vrot.lane.b32.xlu1 %v4571_v20, %s4293_s29 }
 0x8d9   :  { %v875_v18 = vsub.f32 1.0, %v841_v17 }
 0x8db   :  { %v876_v20 = vmul.f32 %v875_v18, %v4504_v49  ;;  %v4672_v18 = vpack.c.bf16 %v1138_v46, %v1136_v8 }
 0x8dc   :  { %1039 = vrot.lane.b32.xlu1 %v4568_v1, %s4287_s24  ;;  %v886_v1 = vpop.permute.xlu0 %885 }
 0x946   :  { %v872_v37 = vpop.permute.xlu1 %871 }
 0x947   :  { %v874_v50 = vmul.f32 %v872_v37, %v841_v17  ;;  %v4676_v37 = vpack.c.bf16 %v1143_v56, %v1141_v55  ;;  %v1261_v55 = vld [vmem:[#allocation2 + $0xc0] sm:$0xff]  ;;  %v1262_v56 = vld [vmem:[#allocation2 + $0xd0] sm:$0xff] }
 0x949   :  { %v4646_v62 = vadd.f32 %v876_v20, %v874_v50  ;;  %v1140_v50 = vld [vmem:[#allocation2 + $0x60] sm:$0xff]  ;;  %v1142_v20 = vld [vmem:[#allocation2 + $0x70] sm:$0xff] }
 0x94a   :  { %v882_v27 = vpop.permute.xlu1 %881 }
 0x94b   :  { %v888_v42 = vsel %vm374_vm3, %v4646_v62, %v879_v36  ;;  %v890_v63 = vsel %vm374_vm3, %v882_v27, %v886_v1  ;;  %v1350_v29 = vmul.f32 %v4646_v62, %v4385_v9  ;;  %v1145_v1 = vld [vmem:[#allocation2 + $0x88] sm:$0xff] }
 0x94c   :  { %v889_v51 = vsel %vm376_vm4, %v888_v42, %v882_v27  ;;  %3179 = vmatprep.mubr.msk.f32.mxu1 %vm376_vm4, %v890_v63  ;;  %v1147_v27 = vld [vmem:[#allocation2 + $0x98] sm:$0xff]  ;;  %v4681_v42 = vpack.c.bf16 %v1142_v20, %v1140_v50  ;;  %v4713_v20 = vpack.c.bf16 %v1262_v56, %v1261_v55 }
 0x94d   :  { %1011 = vmatmul.mubr.f32.vlgmr.msra.gmra.mrb[2].mxu1 %v889_v51  ;;  %v4685_v63 = vpack.c.bf16 %v1147_v27, %v1145_v1  ;;  %v1144_v51 = vld [vmem:[#allocation2 + $0x80] sm:$0xff]  ;;  %v1264_v27 = vld [vmem:[#allocation2 + $0xf0] sm:$0xff] }
 0x94e   :  { %3416 = vmatprep.mubr.msk.f32.mxu1 %vm4289_vm1, %v5334_v2  ;;  %v1040_v32 = vpop.permute.xlu1 %1039  ;;  %v1263_v1 = vld [vmem:[#allocation2 + $0xe0] sm:$0xff] }
 0xa20   :  { %v1012_v14 = vpop.f32.mrb[2].mxu1 }
 0xa21   :  { %v1022_v49 = vadd.f32 %v1012_v14, %v4533_v54  ;;  %v1014_v41 = vpop.f32.mrb[3].mxu1  ;;  %v1017_v34 = vadd.f32 %v1012_v14, %v4562_v61  ;;  %v1146_v14 = vld [vmem:[#allocation2 + $0x90] sm:$0xff] }
 0xa22   :  { %v1032_v24 = vadd.f32 %v1014_v41, %v4535_v57  ;;  %v1027_v47 = vadd.f32 %v1014_v41, %v4565_v13  ;;  %v1151_v41 = vld [vmem:[#allocation2 + $0xb8] sm:$0xff] }
 0xa23   :  { %v1023_v30 = vmul.f32 0.5, %v1022_v49  ;;  %v1018_v35 = vmul.f32 0.5, %v1017_v34  ;;  %v1149_v49 = vld [vmem:[#allocation2 + $0xa8] sm:$0xff] }
 0xa24   :  { %4140 = vtanh.f32 %v1032_v24  ;;  %v1028_v25 = vmul.f32 0.5, %v1027_v47  ;;  %v4688_v24 = vpack.c.bf16 %v1146_v14, %v1144_v51 }
 0xa25   :  { %4142 = vtanh.f32 %v1023_v30  ;;  %v4691_v30 = vpack.c.bf16 %v1151_v41, %v1149_v49  ;;  %v4716_v49 = vpack.c.bf16 %v1264_v27, %v1263_v1  ;;  %v1399_v1 = vld [vmem:[#allocation2 + $0x140] sm:$0xff] }
 0xa26   :  { %4144 = vtanh.f32 %v1018_v35 }
 0xa27   :  { %4146 = vtanh.f32 %v1028_v25 }
 0xa2e   :  { %v4141_v48 = vpop.eup %4140 }
 0xa2f   :  { %1035 = vrot.lane.b32.xlu0 %v4141_v48, %s4287_s24  ;;  %v4143_v58 = vpop.eup %4142  ;;  %v4694_v48 = vpack.c.bf16 %v1150_v44, %v1148_v31  ;;  %v1265_v31 = vld [vmem:[#allocation2 + $0x100] sm:$0xff]  ;;  %v1266_v44 = vld [vmem:[#allocation2 + $0x110] sm:$0xff] }
 0xa30   :  { %v1025_v11 = vmul.f32 0.5, %v4143_v58  ;;  %v4145_v38 = vpop.eup %4144 }
 0xa31   :  { %v1020_v4 = vmul.f32 0.5, %v4145_v38  ;;  %v4147_v9 = vpop.eup %4146 }
 0xa32   :  { %v1026_v23 = vadd.f32 0.5, %v1025_v11  ;;  %v1030_v33 = vmul.f32 0.5, %v4147_v9 }
 0xa33   :  { %1238 = vrot.lane.b32.xlu0 %v1237_v19, %s4287_s24  ;;  %v1021_v53 = vadd.f32 0.5, %v1020_v4 }
 0xa34   :  { %v1042_v28 = vmul.f32 %v1040_v32, %v1026_v23  ;;  %v1031_v5 = vadd.f32 0.5, %v1030_v33 }
 0xa36   :  { %1044 = vrot.lane.b32.xlu1 %v1042_v28, %s4287_s24 }
 0xa37   :  { %1352 = vrot.lane.b32.xlu0 %v1350_v29, %s4285_s20 }
 0xaa1   :  { %v1036_v52 = vpop.permute.xlu0 %1035 }
 0xaa2   :  { %v1038_v60 = vmul.f32 %v1036_v52, %v1021_v53 }
 0xaa8   :  { %v1045_v3 = vpop.permute.xlu1 %1044 }
 0xaa9   :  { %v4669_v22 = vadd.f32 %v1045_v3, %v1038_v60 }
 0xaab   :  { %4148 = vtanh.f32 %v4669_v22 }
 0xab5   :  { %v4149_v17 = vpop.eup %4148 }
 0xab6   :  { %v4674_v36 = vmul.f32 %v4149_v17, %v1031_v5  ;;  %v1239_v5 = vpop.permute.xlu0 %1238 }
 0xab8   :  { %3379 = vmatmul.mubr.msk.f32.vlgmr.msra.gmra.mrb[12].mxu0 %vm140_vm2, %v4674_v36 }
 0xab9   :  { %3728 = vmatpush1.bf16.msra.mxu0 %v4672_v18  ;;  %1216 = vmatprep.mubr.f32.mxu0 %v5334_v2 }
 0xaba   :  { %3730 = vmatprep.subr.bf16.mxu0 %v4676_v37 }
 0xabd   :  { %3732 = vmatpush1.bf16.msra.mxu0 %v4681_v42 }
 0xabe   :  { %3734 = vmatprep.subr.bf16.mxu0 %v4685_v63 }
 0xac1   :  { %3736 = vmatpush1.bf16.msra.mxu0 %v4688_v24 }
 0xac2   :  { %3738 = vmatprep.subr.bf16.mxu0 %v4691_v30 }
 0xac5   :  { %3740 = vmatpush1.bf16.msra.mxu0 %v4694_v48 }
 0xac6   :  { %3741 = vmatprep.subr.bf16.mxu0 %v5333_v0 }
 0xac8   :  { %3181 = vmatmul.mubr.msk.f32.vlgmr.msra.gmra.mrb[14].mxu0 %vm140_vm2, %v4615_v10  ;;  %v4709_v10 = vld [vmem:[#allocation2 + $0x360] ss:$0 sm:$0xff] }
 0xac9   :  { %3397 = vmatprep.mubr.msk.f32.mxu0 %vm4289_vm1, %v5334_v2  ;;  %3743 = vmatpush3.bf16.msra.mxu0 %v4713_v20 }
 0xaca   :  { %3744 = vmatprep.subr.bf16.mxu0 %v5333_v0 }
 0xacd   :  { %3746 = vmatpush3.bf16.msra.mxu0 %v4716_v49 }
 0xace   :  { %3747 = vmatprep.subr.bf16.mxu0 %v5333_v0 }
 0xb8b   :  { %v1127_v58 = vpop.f32.mrb[12].mxu0 }
 0xb8c   :  { %v1128_v11 = vadd.f32 %v1127_v58, %v4596_v21  ;;  %v3380_v19 = vpop.f32.mrb[13].mxu0  ;;  %v4721_v58 = vpack.c.bf16 %v1266_v44, %v1265_v31 }
 0xb8d   :  { %v1268_v19 = vld [vmem:[#allocation2 + $0x130] sm:$0xff] }
 0xb8e   :  { %v1131_v23 = vmul.f32 0.5, %v1128_v11  ;;  %v1267_v11 = vld [vmem:[#allocation2 + $0x120] sm:$0xff]  ;;  %3749 = vmatpush3.bf16.msra.mxu0 %v4721_v58 }
 0xb8f   :  { %3750 = vmatprep.subr.bf16.mxu0 %v5333_v0 }
 0xb90   :  { %4150 = vtanh.f32 %v1131_v23  ;;  %v4727_v23 = vpack.c.bf16 %v1268_v19, %v1267_v11  ;;  %v1405_v11 = vld [vmem:[#allocation2 + $0x170] sm:$0xff]  ;;  %v1408_v19 = vld [vmem:[#allocation2 + $0x188] sm:$0xff] }
 0xb92   :  { %3752 = vmatpush3.bf16.msra.mxu0 %v4727_v23 }
 0xb9a   :  { %v4151_v32 = vpop.eup %4150 }
 0xb9b   :  { %v1133_v28 = vmul.f32 0.5, %v4151_v32  ;;  %v1218_v29 = vpop.f32.mrb[14].mxu0 }
 0xb9c   :  { %v1224_v34 = vrot.slane %v1218_v29, 6  ;;  %v1220_v35 = vpop.f32.mrb[15].mxu0 }
 0xb9d   :  { %v1134_v47 = vadd.f32 0.5, %v1133_v28  ;;  %v1257_v50 = vrot.slane %v1220_v35, 6 }
 0xb9e   :  { %v1226_v38 = vadd.f32 %v1224_v34, %v4354_v39 }
 0xb9f   :  { %1135 = vst.msk [vmem:[%s5305_s2 + $0x1] sm:$0x1] %vm626_vm5, %v1134_v47 }
 0xba0   :  { %v1227_v25 = vadd.f32 %v4709_v10, %v1226_v38  ;;  %v1232_v4 = vadd.f32 %v1226_v38, %v4360_v43 }
 0xba2   :  { %v1228_v52 = vmul.f32 0.5, %v1227_v25  ;;  %v1233_v53 = vmul.f32 0.5, %v1232_v4 }
 0xba4   :  { %4152 = vtanh.f32 %v1228_v52  ;;  %v1353_v52 = vpop.permute.xlu0 %1352 }
 0xba5   :  { %4154 = vtanh.f32 %v1233_v53 }
 0xbae   :  { %v4153_v60 = vpop.eup %4152 }
 0xbaf   :  { %v4155_v3 = vpop.eup %4154  ;;  %v1230_v9 = vmul.f32 0.5, %v4153_v60 }
 0xbb0   :  { %v1235_v33 = vmul.f32 0.5, %v4155_v3 }
 0xbb1   :  { %v1231_v8 = vadd.f32 0.5, %v1230_v9 }
 0xbb2   :  { %v1236_v46 = vadd.f32 0.5, %v1235_v33 }
 0xbb3   :  { %v1255_v17 = vsub.f32 1.0, %v1231_v8 }
 0xbb4   :  { %v1241_v51 = vmul.f32 %v1239_v5, %v1236_v46 }
 0xbb5   :  { %v1259_v14 = vmul.f32 %v1257_v50, %v1255_v17  ;;  %v1400_v17 = vld [vmem:[#allocation2 + $0x148] sm:$0xff]  ;;  %v1402_v50 = vld [vmem:[#allocation2 + $0x158] sm:$0xff] }
 0xbb6   :  { %v1243_v41 = vrot.slane %v1241_v51, 2  ;;  %v4752_v27 = vpack.c.bf16 %v1402_v50, %v1400_v17  ;;  %v1401_v51 = vld [vmem:[#allocation2 + $0x150] sm:$0xff] }
 0xbb7   :  { %v4754_v31 = vpack.c.bf16 %v1401_v51, %v1399_v1  ;;  %v1419_v1 = vld [vmem:[#allocation2 + $0x1e0] sm:$0xff]  ;;  %v1421_v51 = vld [vmem:[#allocation2 + $0x1f0] sm:$0xff] }
 0xbb8   :  { %1244 = vrot.lane.b32.xlu1 %v1243_v41, %s4287_s24  ;;  %v1406_v41 = vld [vmem:[#allocation2 + $0x178] sm:$0xff]  ;;  %3754 = vmatprep.subr.bf16.mxu0 %v4752_v27 }
 0xbbc   :  { %1362 = vrot.lane.b32.xlu1 %v4646_v62, %s4285_s20 }
 0xc2a   :  { %v1245_v32 = vpop.permute.xlu1 %1244 }
 0xc2b   :  { %v1247_v28 = vmul.f32 %v1245_v32, %v4390_v12  ;;  %v1410_v32 = vld [vmem:[#allocation2 + $0x198] sm:$0xff] }
 0xc2d   :  { %v1249_v29 = vrot.slane %v1247_v28, 6 }
 0xc2e   :  { %v1363_v46 = vpop.permute.xlu1 %1362 }
 0xc2f   :  { %v1251_v34 = vadd.f32 %v1249_v29, %v4356_v40  ;;  %v4763_v29 = vpack.c.bf16 %v1410_v32, %v1408_v19  ;;  %v1423_v19 = vld [vmem:[#allocation2 + $0x200] sm:$0xff]  ;;  %v1425_v32 = vld [vmem:[#allocation2 + $0x210] sm:$0xff] }
 0xc31   :  { %v1252_v35 = vadd.f32 %v1251_v34, %v4393_v16  ;;  %v1407_v34 = vld [vmem:[#allocation2 + $0x180] sm:$0xff] }
 0xc33   :  { %4156 = vtanh.f32 %v1252_v35  ;;  %v1409_v35 = vld [vmem:[#allocation2 + $0x190] sm:$0xff] }
 0xc3d   :  { %v4157_v47 = vpop.eup %4156 }
 0xc3e   :  { %v1254_v38 = vmul.f32 %v4157_v47, %v1231_v8  ;;  %v1412_v47 = vld [vmem:[#allocation2 + $0x1a8] sm:$0xff] }
 0xc40   :  { %v4734_v25 = vadd.f32 %v1259_v14, %v1254_v38  ;;  %v1404_v14 = vld [vmem:[#allocation2 + $0x168] sm:$0xff]  ;;  %v1414_v38 = vld [vmem:[#allocation2 + $0x1b8] sm:$0xff] }
 0xc41   :  { %v4756_v44 = vpack.c.bf16 %v1406_v41, %v1404_v14  ;;  %v1424_v14 = vld [vmem:[#allocation2 + $0x208] sm:$0xff]  ;;  %v1426_v41 = vld [vmem:[#allocation2 + $0x218] sm:$0xff] }
 0xc42   :  { %v4737_v4 = vrot.slane %v4734_v25, 2 }
 0xc44   :  { %3398 = vmatmul.mubr.msk.f32.vlgmr.msra.gmra.mrb[16].mxu0 %vm140_vm2, %v4737_v4 }
 0xc45   :  { %3756 = vmatpush1.bf16.msra.mxu0 %v4754_v31 }
 0xc46   :  { %3758 = vmatprep.subr.bf16.mxu0 %v4756_v44 }
 0xd17   :  { %v4741_v53 = vpop.f32.mrb[16].mxu0 }
 0xd18   :  { %v1355_v12 = vadd.f32 %v1353_v52, %v4741_v53  ;;  %v3399_v60 = vpop.f32.mrb[17].mxu0  ;;  %v4766_v52 = vpack.c.bf16 %v1409_v35, %v1407_v34  ;;  %v1428_v34 = vld [vmem:[#allocation2 + $0x228] sm:$0xff]  ;;  %v1430_v35 = vld [vmem:[#allocation2 + $0x238] sm:$0xff] }
 0xd19   :  { %v1411_v60 = vld [vmem:[#allocation2 + $0x1a0] sm:$0xff] }
 0xd1a   :  { %v1356_v3 = vadd.f32 %v1355_v12, %v4405_v26  ;;  %v4769_v12 = vpack.c.bf16 %v1414_v38, %v1412_v47  ;;  %v4790_v47 = vpack.c.bf16 %v1425_v32, %v1423_v19  ;;  %v4793_v38 = vpack.c.bf16 %v1430_v35, %v1428_v34  ;;  %v1435_v19 = vld [vmem:[#allocation2 + $0x260] sm:$0xff]  ;;  %v1437_v32 = vld [vmem:[#allocation2 + $0x270] sm:$0xff]  ;;  %v1440_v34 = vld [vmem:[#allocation2 + $0x288] sm:$0xff] }
 0xd1b   :  { %v1442_v35 = vld [vmem:[#allocation2 + $0x298] sm:$0xff]  ;;  %v1443_v26 = vld [vmem:[#allocation2 + $0x2a0] sm:$0xff] }
 0xd1c   :  { %v1357_v16 = vmul.f32 0.5, %v1356_v3  ;;  %v1413_v3 = vld [vmem:[#allocation2 + $0x1b0] sm:$0xff] }
 0xd1e   :  { %4158 = vtanh.f32 %v1357_v16  ;;  %v1416_v16 = vld [vmem:[#allocation2 + $0x1c8] sm:$0xff] }
 0xd28   :  { %v4159_v9 = vpop.eup %4158 }
 0xd29   :  { %v1359_v33 = vmul.f32 0.5, %v4159_v9  ;;  %v1418_v9 = vld [vmem:[#allocation2 + $0x1d8] sm:$0xff] }
 0xd2b   :  { %v1360_v8 = vadd.f32 0.5, %v1359_v33  ;;  %v4772_v33 = vpack.c.bf16 %v1413_v3, %v1411_v60  ;;  %v1427_v60 = vld [vmem:[#allocation2 + $0x220] sm:$0xff]  ;;  %v1429_v3 = vld [vmem:[#allocation2 + $0x230] sm:$0xff] }
 0xd2d   :  { %v1365_v55 = vmul.f32 %v1363_v46, %v1360_v8  ;;  %v4775_v8 = vpack.c.bf16 %v1418_v9, %v1416_v16  ;;  %v1415_v46 = vld [vmem:[#allocation2 + $0x1c0] sm:$0xff]  ;;  %v1432_v16 = vld [vmem:[#allocation2 + $0x248] sm:$0xff]  ;;  %v1434_v9 = vld [vmem:[#allocation2 + $0x258] sm:$0xff] }
 0xd2f   :  { %1367 = vrot.lane.b32.xlu0 %v1365_v55, %s4290_s0  ;;  %v1417_v55 = vld [vmem:[#allocation2 + $0x1d0] sm:$0xff] }
 0xd30   :  { %v4778_v17 = vpack.c.bf16 %v1417_v55, %v1415_v46  ;;  %v4796_v46 = vpack.c.bf16 %v1429_v3, %v1427_v60  ;;  %v4799_v55 = vpack.c.bf16 %v1434_v9, %v1432_v16  ;;  %v4808_v60 = vpack.c.bf16 %v1437_v32, %v1435_v19  ;;  %v1439_v16 = vld [vmem:[#allocation2 + $0x280] sm:$0xff]  ;;  %v1441_v9 = vld [vmem:[#allocation2 + $0x290] sm:$0xff] }
 0xd31   :  { %v4811_v3 = vpack.c.bf16 %v1442_v35, %v1440_v34 }
 0xd32   :  { %5336 = vst [vmem:[#allocation8_spill] sm:$0xff] %v4808_v60 }
 0xd33   :  { %5337 = vst [vmem:[#allocation9_spill] sm:$0xff] %v4811_v3 }
 0xda1   :  { %v1368_v56 = vpop.permute.xlu0 %1367 }
 0xda2   :  { %v1370_v5 = vmul.f32 %v1368_v56, %v4413_v45  ;;  %v1403_v45 = vld [vmem:[#allocation2 + $0x160] sm:$0xff]  ;;  %v1420_v56 = vld [vmem:[#allocation2 + $0x1e8] sm:$0xff] }
 0xda3   :  { %v4760_v28 = vpack.c.bf16 %v1405_v11, %v1403_v45  ;;  %v4784_v45 = vpack.c.bf16 %v1421_v51, %v1419_v1  ;;  %v4787_v11 = vpack.c.bf16 %v1426_v41, %v1424_v14  ;;  %v1436_v1 = vld [vmem:[#allocation2 + $0x268] sm:$0xff]  ;;  %v1438_v51 = vld [vmem:[#allocation2 + $0x278] sm:$0xff] }
 0xda4   :  { %1372 = vrot.lane.b32.xlu1 %v1370_v5, %s4291_s25  ;;  %v1422_v5 = vld [vmem:[#allocation2 + $0x1f8] sm:$0xff]  ;;  %v4805_v41 = vpack.c.bf16 %v1438_v51, %v1436_v1  ;;  %v4814_v1 = vpack.c.bf16 %v1441_v9, %v1439_v16  ;;  %v1448_v16 = vld [vmem:[#allocation2 + $0x2c8] sm:$0xff] }
 0xda5   :  { %3760 = vmatpush1.bf16.msra.mxu0 %v4760_v28  ;;  %v4781_v50 = vpack.c.bf16 %v1422_v5, %v1420_v56  ;;  %v1431_v56 = vld [vmem:[#allocation2 + $0x240] sm:$0xff]  ;;  %v1433_v5 = vld [vmem:[#allocation2 + $0x250] sm:$0xff]  ;;  %v1450_v9 = vld [vmem:[#allocation2 + $0x2d8] sm:$0xff] }
 0xda6   :  { %3762 = vmatprep.subr.bf16.mxu0 %v4763_v29  ;;  %v4802_v14 = vpack.c.bf16 %v1433_v5, %v1431_v56  ;;  %v1444_v56 = vld [vmem:[#allocation2 + $0x2a8] sm:$0xff]  ;;  %v1446_v5 = vld [vmem:[#allocation2 + $0x2b8] sm:$0xff] }
 0xda7   :  { %v4817_v51 = vpack.c.bf16 %v1446_v5, %v1444_v56  ;;  %v1447_v56 = vld [vmem:[#allocation2 + $0x2c0] sm:$0xff]  ;;  %v1449_v5 = vld [vmem:[#allocation2 + $0x2d0] sm:$0xff] }
 0xda8   :  { %1386 = vrot.lane.b32.xlu1 %v4737_v4, %s4285_s20  ;;  %5335 = vst [vmem:[#allocation7_spill] sm:$0xff] %v4802_v14 }
 0xda9   :  { %3764 = vmatpush1.bf16.msra.mxu0 %v4766_v52 }
 0xdaa   :  { %3766 = vmatprep.subr.bf16.mxu0 %v4769_v12 }
 0xdac   :  { %1393 = vrot.lane.b32.xlu1 %v4669_v22, %s4285_s20 }
 0xdad   :  { %3768 = vmatpush1.bf16.msra.mxu0 %v4772_v33 }
 0xdae   :  { %3770 = vmatprep.subr.bf16.mxu0 %v4775_v8 }
 0xdb1   :  { %3772 = vmatpush1.bf16.msra.mxu0 %v4778_v17 }
 0xdb2   :  { %3774 = vmatprep.subr.bf16.mxu0 %v4781_v50 }
 0xdb5   :  { %3776 = vmatpush1.bf16.msra.mxu0 %v4784_v45 }
 0xdb6   :  { %3778 = vmatprep.subr.bf16.mxu0 %v4787_v11 }
 0xdb9   :  { %3780 = vmatpush1.bf16.msra.mxu0 %v4790_v47 }
 0xdba   :  { %3782 = vmatprep.subr.bf16.mxu0 %v4793_v38 }
 0xdbd   :  { %3784 = vmatpush1.bf16.msra.mxu0 %v4796_v46 }
 0xdbe   :  { %3786 = vmatprep.subr.bf16.mxu0 %v4799_v55 }
 0xdc1   :  { %3788 = vmatpush1.bf16.msra.mxu0 %v4802_v14  ;;  %v1445_v14 = vld [vmem:[#allocation2 + $0x2b0] sm:$0xff] }
 0xdc2   :  { %3790 = vmatprep.subr.bf16.mxu0 %v4805_v41  ;;  %v4820_v19 = vpack.c.bf16 %v1445_v14, %v1443_v26  ;;  %v1343_v14 = vmul.f32 %v4646_v62, %v4497_v59 }
 0xdc4   :  { %5338 = vst [vmem:[#allocation10_spill] sm:$0xff] %v4820_v19 }
 0xdc5   :  { %3792 = vmatpush1.bf16.msra.mxu0 %v4808_v60  ;;  %v4828_v60 = vpack.c.bf16 %v1449_v5, %v1447_v56 }
 0xdc6   :  { %3794 = vmatprep.subr.bf16.mxu0 %v4811_v3  ;;  %v4826_v3 = vpack.c.bf16 %v1450_v9, %v1448_v16 }
 0xdc7   :  { %5340 = vst [vmem:[#allocation12_spill] sm:$0xff] %v4828_v60 }
 0xdc8   :  { %5339 = vst [vmem:[#allocation11_spill] sm:$0xff] %v4826_v3 }
 0xdc9   :  { %3796 = vmatpush1.bf16.msra.mxu0 %v4814_v1 }
 0xdca   :  { %3798 = vmatprep.subr.bf16.mxu0 %v4817_v51 }
 0xdcd   :  { %3800 = vmatpush1.bf16.msra.mxu0 %v4820_v19 }
 0xdce   :  { %3802 = vmatprep.subr.bf16.mxu0 %v4826_v3 }
 0xdd1   :  { %3804 = vmatpush1.bf16.msra.mxu0 %v4828_v60 }
 0xdd2   :  { %3897 = vmatprep.subr.bf16.mxu0 %v5333_v0 }
 0xe16   :  { %v1373_v32 = vpop.permute.xlu1 %1372 }
 0xe17   :  { %v1375_v34 = vadd.f32 %v1373_v32, %v4741_v53  ;;  %v1344_v32 = vadd.f32 %v1343_v14, %v4741_v53 }
 0xe19   :  { %v1376_v35 = vadd.f32 %v1375_v34, %v4490_v7  ;;  %v1345_v34 = vadd.f32 %v1344_v32, %v4501_v6 }
 0xe1b   :  { %4160 = vtanh.f32 %v1376_v35  ;;  %v1346_v35 = vmul.f32 0.5, %v1345_v34  ;;  %v1558_v34 = vld [vmem:[#allocation2 + $0x2e0] sm:$0xff] }
 0xe1d   :  { %4162 = vtanh.f32 %v1346_v35  ;;  %v1559_v35 = vld [vmem:[#allocation2 + $0x2f0] sm:$0xff] }
 0xe25   :  { %v4161_v26 = vpop.eup %4160 }
 0xe26   :  { %1379 = vrot.lane.b32.xlu0 %v4161_v26, %s4292_s26  ;;  %v1387_v26 = vpop.permute.xlu1 %1386 }
 0xe27   :  { %v4163_v16 = vpop.eup %4162 }
 0xe28   :  { %v1348_v9 = vmul.f32 0.5, %v4163_v16  ;;  %v3806_v16 = vpack.c.bf16 %v1559_v35, %v1558_v34 }
 0xe2a   :  { %1389 = vrot.lane.b32.xlu0 %v4674_v36, %s4293_s29  ;;  %v1349_v56 = vadd.f32 0.5, %v1348_v9  ;;  %3807 = vmatpush3.bf16.msra.mxu1 %v3806_v16  ;;  %v1561_v9 = vld [vmem:[#allocation2 + $0x310] sm:$0xff] }
 0xe2b   :  { %3808 = vmatprep.subr.bf16.mxu1 %v5333_v0 }
 0xe2c   :  { %v1383_v5 = vsub.f32 1.0, %v1349_v56 }
 0xe2e   :  { %1547 = vrot.lane.b32.xlu0 %v4669_v22, %s4287_s24  ;;  %v1384_v36 = vmul.f32 %v1383_v5, %v4646_v62  ;;  %v1394_v22 = vpop.permute.xlu1 %1393  ;;  %v1562_v5 = vld [vmem:[#allocation2 + $0x320] sm:$0xff] }
 0xe98   :  { %v1380_v7 = vpop.permute.xlu0 %1379 }
 0xe99   :  { %v1382_v60 = vmul.f32 %v1380_v7, %v1349_v56 }
 0xe9b   :  { %v4843_v3 = vadd.f32 %v1384_v36, %v1382_v60 }
 0xe9c   :  { %v1390_v19 = vpop.permute.xlu0 %1389 }
 0xe9d   :  { %v1396_v59 = vsel %vm374_vm3, %v4843_v3, %v1387_v26  ;;  %v1398_v6 = vsel %vm374_vm3, %v1390_v19, %v1394_v22  ;;  %v1563_v26 = vld [vmem:[#allocation2 + $0x330] sm:$0xff] }
 0xe9e   :  { %v1397_v53 = vsel %vm376_vm4, %v1396_v59, %v1390_v19  ;;  %3183 = vmatprep.mubr.msk.f32.mxu0 %vm376_vm4, %v1398_v6  ;;  %v1560_v19 = vld [vmem:[#allocation2 + $0x300] sm:$0xff]  ;;  %v3812_v36 = vpack.c.bf16 %v1563_v26, %v1562_v5  ;;  %v1565_v6 = vld [vmem:[#allocation2 + $0x350] sm:$0xff] }
 0xe9f   :  { %1519 = vmatmul.mubr.f32.vlgmr.msra.gmra.mrb[18].mxu0 %v1397_v53  ;;  %v3809_v56 = vpack.c.bf16 %v1561_v9, %v1560_v19  ;;  %v1564_v59 = vld [vmem:[#allocation2 + $0x340] sm:$0xff]  ;;  %v4863_v19 = vld [vmem:[#allocation2 + $0x372] ss:$0 sm:$0xff] }
 0xea0   :  { %3454 = vmatprep.mubr.msk.f32.mxu0 %vm4289_vm1, %v5334_v2  ;;  %3899 = vmatpush3.bf16.msra.mxu0 %v3806_v16  ;;  %v1548_v35 = vpop.permute.xlu0 %1547  ;;  %v1858_v9 = vmul.f32 %v4863_v19, %v4843_v3 }
 0xea1   :  { %3900 = vmatprep.subr.bf16.mxu0 %v5333_v0  ;;  %3810 = vmatpush3.bf16.msra.mxu1 %v3809_v56 }
 0xea2   :  { %3811 = vmatprep.subr.bf16.mxu1 %v5333_v0 }
 0xea4   :  { %3902 = vmatpush3.bf16.msra.mxu0 %v3809_v56 }
 0xea5   :  { %3903 = vmatprep.subr.bf16.mxu0 %v5333_v0  ;;  %3813 = vmatpush3.bf16.msra.mxu1 %v3812_v36 }
 0xea6   :  { %3814 = vmatprep.subr.bf16.mxu1 %v5333_v0 }
 0xea8   :  { %3905 = vmatpush3.bf16.msra.mxu0 %v3812_v36 }
 0xea9   :  { %3906 = vmatprep.subr.bf16.mxu0 %v5333_v0 }
 0xf72   :  { %v1520_v7 = vpop.f32.mrb[18].mxu0 }
 0xf73   :  { %v1530_v62 = vadd.f32 %v1520_v7, %v4533_v54  ;;  %v1522_v60 = vpop.f32.mrb[19].mxu0 }
 0xf74   :  { %v1540_v14 = vadd.f32 %v1522_v60, %v4535_v57  ;;  %v1535_v5 = vadd.f32 %v1522_v60, %v4565_v13 }
 0xf75   :  { %v1531_v32 = vmul.f32 0.5, %v1530_v62 }
 0xf76   :  { %4164 = vtanh.f32 %v1540_v14  ;;  %v1745_v14 = vrot.slane %v4734_v25, 7  ;;  %v1525_v25 = vadd.f32 %v1520_v7, %v4562_v61  ;;  %v1536_v36 = vmul.f32 0.5, %v1535_v5 }
 0xf77   :  { %4166 = vtanh.f32 %v1531_v32  ;;  %v3815_v32 = vpack.c.bf16 %v1565_v6, %v1564_v59 }
 0xf78   :  { %v1526_v56 = vmul.f32 0.5, %v1525_v25 }
 0xf79   :  { %3816 = vmatpush3.bf16.msra.mxu1 %v3815_v32  ;;  %3908 = vmatpush3.bf16.msra.mxu0 %v3815_v32 }
 0xf7a   :  { %3818 = vmatprep.subr.bf16.mxu1 %v4657_v15  ;;  %4168 = vtanh.f32 %v1526_v56 }
 0xf7b   :  { %4170 = vtanh.f32 %v1536_v36 }
 0xf80   :  { %v4165_v22 = vpop.eup %4164 }
 0xf81   :  { %1543 = vrot.lane.b32.xlu1 %v4165_v22, %s4287_s24  ;;  %v4167_v53 = vpop.eup %4166 }
 0xf82   :  { %v1533_v62 = vmul.f32 0.5, %v4167_v53 }
 0xf84   :  { %v1534_v34 = vadd.f32 0.5, %v1533_v62  ;;  %v4169_v26 = vpop.eup %4168 }
 0xf85   :  { %1746 = vrot.lane.b32.xlu1 %v1745_v14, %s4287_s24  ;;  %v1528_v22 = vmul.f32 0.5, %v4169_v26  ;;  %v4171_v15 = vpop.eup %4170 }
 0xf86   :  { %v1550_v16 = vmul.f32 %v1548_v35, %v1534_v34  ;;  %v1538_v32 = vmul.f32 0.5, %v4171_v15 }
 0xf87   :  { %v1529_v6 = vadd.f32 0.5, %v1528_v22 }
 0xf88   :  { %1552 = vrot.lane.b32.xlu0 %v1550_v16, %s4287_s24  ;;  %v1539_v34 = vadd.f32 0.5, %v1538_v32 }
 0xf89   :  { %1860 = vrot.lane.b32.xlu1 %v1858_v9, %s4285_s20 }
 0xff3   :  { %v1544_v59 = vpop.permute.xlu1 %1543 }
 0xff4   :  { %v1546_v53 = vmul.f32 %v1544_v59, %v1529_v6 }
 0xff7   :  { %v1747_v5 = vpop.permute.xlu1 %1746 }
 0xffa   :  { %v1553_v62 = vpop.permute.xlu0 %1552 }
 0xffb   :  { %v4872_v14 = vadd.f32 %v1553_v62, %v1546_v53  ;;  %v4911_v62 = vld [vmem:[#allocation2 + $0x363] ss:$0 sm:$0xff] }
 0xffd   :  { %4172 = vtanh.f32 %v4872_v14 }
0x1007   :  { %v4173_v61 = vpop.eup %4172 }
0x1008   :  { %v4875_v7 = vmul.f32 %v4173_v61, %v1539_v34  ;;  %v4915_v61 = vld [vmem:[#allocation2 + $0x362] ss:$0 sm:$0xff] }
0x100a   :  { %3417 = vmatmul.mubr.msk.f32.vlgmr.msra.gmra.mrb[4].mxu1 %vm140_vm2, %v4875_v7 }
0x100b   :  { %3820 = vmatpush1.bf16.msra.mxu1 %v4672_v18  ;;  %1724 = vmatprep.mubr.f32.mxu1 %v5334_v2 }
0x100c   :  { %3822 = vmatprep.subr.bf16.mxu1 %v4676_v37 }
0x100f   :  { %3824 = vmatpush1.bf16.msra.mxu1 %v4681_v42 }
0x1010   :  { %3826 = vmatprep.subr.bf16.mxu1 %v4685_v63 }
0x1013   :  { %3828 = vmatpush1.bf16.msra.mxu1 %v4688_v24 }
0x1014   :  { %3830 = vmatprep.subr.bf16.mxu1 %v4691_v30 }
0x1017   :  { %3832 = vmatpush1.bf16.msra.mxu1 %v4694_v48 }
0x1018   :  { %3833 = vmatprep.subr.bf16.mxu1 %v5333_v0 }
0x101a   :  { %3185 = vmatmul.mubr.msk.f32.vlgmr.msra.gmra.mrb[6].mxu1 %vm140_vm2, %v4737_v4 }
0x101b   :  { %3835 = vmatpush3.bf16.msra.mxu1 %v4713_v20  ;;  %3435 = vmatprep.mubr.msk.f32.mxu1 %vm4289_vm1, %v5334_v2 }
0x101c   :  { %3836 = vmatprep.subr.bf16.mxu1 %v5333_v0 }
0x101f   :  { %3838 = vmatpush3.bf16.msra.mxu1 %v4716_v49 }
0x1020   :  { %3839 = vmatprep.subr.bf16.mxu1 %v5333_v0 }
0x1023   :  { %3841 = vmatpush3.bf16.msra.mxu1 %v4721_v58 }
0x1024   :  { %3842 = vmatprep.subr.bf16.mxu1 %v5333_v0 }
0x1027   :  { %3844 = vmatpush3.bf16.msra.mxu1 %v4727_v23 }
0x1028   :  { %3846 = vmatprep.subr.bf16.mxu1 %v4752_v27 }
0x10dd   :  { %v1635_v13 = vpop.f32.mrb[4].mxu1 }
0x10de   :  { %v1636_v18 = vadd.f32 %v1635_v13, %v4596_v21  ;;  %v3418_v37 = vpop.f32.mrb[5].mxu1 }
0x10e0   :  { %v1639_v42 = vmul.f32 0.5, %v1636_v18 }
0x10e2   :  { %4174 = vtanh.f32 %v1639_v42 }
0x10ec   :  { %v4175_v63 = vpop.eup %4174 }
0x10ed   :  { %v1641_v24 = vmul.f32 0.5, %v4175_v63  ;;  %v1726_v30 = vpop.f32.mrb[6].mxu1 }
0x10ee   :  { %v1732_v48 = vrot.slane %v1726_v30, 5  ;;  %v1728_v20 = vpop.f32.mrb[7].mxu1 }
0x10ef   :  { %v1642_v49 = vadd.f32 0.5, %v1641_v24  ;;  %v1765_v36 = vrot.slane %v1728_v20, 5  ;;  %v4953_v24 = vld [vmem:[#allocation2 + $0x373] ss:$0 sm:$0xff] }
0x10f0   :  { %v1734_v58 = vadd.f32 %v1732_v48, %v4354_v39 }
0x10f1   :  { %1643 = vst.msk [vmem:[%s5305_s2 + $0x2] sm:$0x1] %vm626_vm5, %v1642_v49  ;;  %v5349_v49 = vld [vmem:[#allocation6_spill] sm:$0xff] }
0x10f2   :  { %v1735_v23 = vadd.f32 %v4709_v10, %v1734_v58  ;;  %v1740_v21 = vadd.f32 %v1734_v58, %v4360_v43 }
0x10f4   :  { %v1736_v4 = vmul.f32 0.5, %v1735_v23  ;;  %v1741_v27 = vmul.f32 0.5, %v1740_v21  ;;  %v4967_v21 = vld [vmem:[#allocation2 + $0x371] ss:$0 sm:$0xff] }
0x10f6   :  { %4176 = vtanh.f32 %v1736_v4  ;;  %v1851_v4 = vmul.f32 %v4967_v21, %v4843_v3 }
0x10f7   :  { %4178 = vtanh.f32 %v1741_v27 }
0x1100   :  { %v4177_v60 = vpop.eup %4176 }
0x1101   :  { %v4179_v35 = vpop.eup %4178  ;;  %v1738_v16 = vmul.f32 0.5, %v4177_v60  ;;  %v4971_v60 = vld [vmem:[#allocation2 + $0x374] ss:$0 sm:$0xff] }
0x1102   :  { %v1743_v9 = vmul.f32 0.5, %v4179_v35 }
0x1103   :  { %v1739_v25 = vadd.f32 0.5, %v1738_v16 }
0x1104   :  { %v1744_v56 = vadd.f32 0.5, %v1743_v9 }
0x1105   :  { %v1763_v26 = vsub.f32 1.0, %v1739_v25 }
0x1106   :  { %v1749_v22 = vmul.f32 %v1747_v5, %v1744_v56 }
0x1107   :  { %v1767_v59 = vmul.f32 %v1765_v36, %v1763_v26 }
0x1108   :  { %v1751_v6 = vrot.slane %v1749_v22, 3 }
0x110a   :  { %1752 = vrot.lane.b32.xlu0 %v1751_v6, %s4287_s24 }
0x110e   :  { %1870 = vrot.lane.b32.xlu0 %v4843_v3, %s4285_s20 }
0x117c   :  { %v1753_v53 = vpop.permute.xlu0 %1752 }
0x117d   :  { %v1755_v15 = vmul.f32 %v4911_v62, %v1753_v53 }
0x117f   :  { %v1757_v32 = vrot.slane %v1755_v15, 5 }
0x1181   :  { %v1759_v34 = vadd.f32 %v1757_v32, %v4356_v40 }
0x1183   :  { %v1760_v13 = vadd.f32 %v4915_v61, %v1759_v34 }
0x1185   :  { %4180 = vtanh.f32 %v1760_v13 }
0x118f   :  { %v4181_v18 = vpop.eup %4180 }
0x1190   :  { %v1762_v37 = vmul.f32 %v4181_v18, %v1739_v25 }
0x1192   :  { %v4918_v42 = vadd.f32 %v1767_v59, %v1762_v37 }
0x1194   :  { %v4921_v63 = vrot.slane %v4918_v42, 3 }
0x1196   :  { %3436 = vmatmul.mubr.msk.f32.vlgmr.msra.gmra.mrb[8].mxu1 %vm140_vm2, %v4921_v63 }
0x1197   :  { %3848 = vmatpush1.bf16.msra.mxu1 %v4754_v31  ;;  %v5341_v31 = vld [vmem:[#allocation7_spill] sm:$0xff] }
0x1198   :  { %3850 = vmatprep.subr.bf16.mxu1 %v4756_v44  ;;  %v5342_v44 = vld [vmem:[#allocation8_spill] sm:$0xff]  ;;  %5348 = vst [vmem:[#allocation7_spill] sm:$0xff] %v4953_v24 }
0x119b   :  { %3852 = vmatpush1.bf16.msra.mxu1 %v4760_v28  ;;  %v5343_v28 = vld [vmem:[#allocation9_spill] sm:$0xff] }
0x119c   :  { %3854 = vmatprep.subr.bf16.mxu1 %v4763_v29  ;;  %v5344_v29 = vld [vmem:[#allocation10_spill] sm:$0xff] }
0x119f   :  { %3856 = vmatpush1.bf16.msra.mxu1 %v4766_v52  ;;  %v5345_v52 = vld [vmem:[#allocation11_spill] sm:$0xff] }
0x11a0   :  { %3858 = vmatprep.subr.bf16.mxu1 %v4769_v12  ;;  %v5346_v12 = vld [vmem:[#allocation12_spill] sm:$0xff] }
0x11a3   :  { %3860 = vmatpush1.bf16.msra.mxu1 %v4772_v33  ;;  %v1861_v33 = vpop.permute.xlu1 %1860 }
0x11a4   :  { %3862 = vmatprep.subr.bf16.mxu1 %v4775_v8 }
0x11a7   :  { %3864 = vmatpush1.bf16.msra.mxu1 %v4778_v17 }
0x11a8   :  { %3866 = vmatprep.subr.bf16.mxu1 %v4781_v50 }
0x11ab   :  { %3868 = vmatpush1.bf16.msra.mxu1 %v4784_v45  ;;  %v5347_v45 = vld [vmem:[#allocation5_spill] sm:$0xff] }
0x11ac   :  { %3870 = vmatprep.subr.bf16.mxu1 %v4787_v11 }
0x11af   :  { %3872 = vmatpush1.bf16.msra.mxu1 %v4790_v47 }
0x11b0   :  { %3874 = vmatprep.subr.bf16.mxu1 %v4793_v38 }
0x11b3   :  { %3876 = vmatpush1.bf16.msra.mxu1 %v4796_v46 }
0x11b4   :  { %3878 = vmatprep.subr.bf16.mxu1 %v4799_v55 }
0x11b7   :  { %3880 = vmatpush1.bf16.msra.mxu1 %v5341_v31  ;;  %v2153_v31 = vld [vmem:[#allocation2 + $0x48] sm:$0xff] }
0x11b8   :  { %3882 = vmatprep.subr.bf16.mxu1 %v4805_v41  ;;  %v1871_v41 = vpop.permute.xlu0 %1870 }
0x11bb   :  { %3884 = vmatpush1.bf16.msra.mxu1 %v5342_v44  ;;  %v2155_v44 = vld [vmem:[#allocation2 + $0x58] sm:$0xff] }
0x11bc   :  { %3886 = vmatprep.subr.bf16.mxu1 %v5343_v28  ;;  %v4986_v28 = vpack.c.bf16 %v2155_v44, %v2153_v31  ;;  %v2164_v44 = vld [vmem:[#allocation2 + $0xa0] sm:$0xff] }
0x11be   :  { %3910 = vmatprep.subr.bf16.mxu0 %v4986_v28 }
0x11bf   :  { %3888 = vmatpush1.bf16.msra.mxu1 %v4814_v1 }
0x11c0   :  { %3890 = vmatprep.subr.bf16.mxu1 %v4817_v51 }
0x11c3   :  { %3892 = vmatpush1.bf16.msra.mxu1 %v5344_v29 }
0x11c4   :  { %3894 = vmatprep.subr.bf16.mxu1 %v5345_v52 }
0x11c7   :  { %3896 = vmatpush1.bf16.msra.mxu1 %v5346_v12 }
0x11c8   :  { %3989 = vmatprep.subr.bf16.mxu1 %v5333_v0 }
0x1269   :  { %v1847_v8 = vpop.f32.mrb[8].mxu1 }
0x126a   :  { %v1863_v17 = vadd.f32 %v1861_v33, %v1847_v8  ;;  %v3437_v50 = vpop.f32.mrb[9].mxu1  ;;  %v1852_v27 = vadd.f32 %v1851_v4, %v1847_v8  ;;  %v2253_v33 = vrot.slane %v4918_v42, 7 }
0x126c   :  { %v1864_v11 = vadd.f32 %v1863_v17, %v5347_v45  ;;  %v1853_v35 = vadd.f32 %v4971_v60, %v1852_v27 }
0x126e   :  { %v1865_v47 = vmul.f32 0.5, %v1864_v11  ;;  %v1854_v16 = vmul.f32 0.5, %v1853_v35  ;;  %v2152_v35 = vld [vmem:[#allocation2 + $0x40] sm:$0xff] }
0x1270   :  { %4182 = vtanh.f32 %v1865_v47  ;;  %v4996_v47 = vld [vmem:[#allocation2 + $0x364] ss:$0 sm:$0xff] }
0x127a   :  { %v4183_v38 = vpop.eup %4182 }
0x127b   :  { %v1867_v46 = vmul.f32 0.5, %v4183_v38 }
0x127d   :  { %v1868_v55 = vadd.f32 0.5, %v1867_v46 }
0x127f   :  { %v1873_v1 = vmul.f32 %v1871_v41, %v1868_v55  ;;  %v4999_v55 = vld [vmem:[#allocation2 + $0x366] ss:$0 sm:$0xff] }
0x1281   :  { %1875 = vrot.lane.b32.xlu1 %v1873_v1, %s4290_s0 }
0x12f3   :  { %v1876_v51 = vpop.permute.xlu1 %1875 }
0x12f4   :  { %v1878_v30 = vmul.f32 %v4953_v24, %v1876_v51 }
0x12f6   :  { %1880 = vrot.lane.b32.xlu0 %v1878_v30, %s4291_s25 }
0x12fa   :  { %1894 = vrot.lane.b32.xlu0 %v4921_v63, %s4285_s20 }
0x12fe   :  { %1901 = vrot.lane.b32.xlu0 %v4872_v14, %s4285_s20 }
0x1368   :  { %v1881_v48 = vpop.permute.xlu0 %1880 }
0x1369   :  { %v1883_v20 = vadd.f32 %v1881_v48, %v1847_v8 }
0x136b   :  { %v1884_v58 = vadd.f32 %v1883_v20, %v5349_v49 }
0x136d   :  { %4184 = vtanh.f32 %v1884_v58 }
0x136e   :  { %4186 = vtanh.f32 %v1854_v16  ;;  %v2154_v16 = vld [vmem:[#allocation2 + $0x50] sm:$0xff] }
0x1377   :  { %v4185_v23 = vpop.eup %4184 }
0x1378   :  { %1887 = vrot.lane.b32.xlu1 %v4185_v23, %s4292_s26  ;;  %v4187_v9 = vpop.eup %4186 }
0x1379   :  { %v1856_v25 = vmul.f32 0.5, %v4187_v9  ;;  %v2157_v9 = vld [vmem:[#allocation2 + $0x68] sm:$0xff] }
0x137b   :  { %v1857_v56 = vadd.f32 0.5, %v1856_v25  ;;  %v2159_v25 = vld [vmem:[#allocation2 + $0x78] sm:$0xff] }
0x137c   :  { %1897 = vrot.lane.b32.xlu1 %v4875_v7, %s4293_s29  ;;  %v1895_v7 = vpop.permute.xlu0 %1894 }
0x137d   :  { %v1891_v5 = vsub.f32 1.0, %v1857_v56 }
0x1380   :  { %2055 = vrot.lane.b32.xlu1 %v4872_v14, %s4287_s24  ;;  %v1892_v14 = vmul.f32 %v1891_v5, %v4843_v3  ;;  %v1902_v59 = vpop.permute.xlu0 %1901 }
0x13ea   :  { %v1888_v26 = vpop.permute.xlu1 %1887 }
0x13eb   :  { %v1890_v36 = vmul.f32 %v1888_v26, %v1857_v56 }
0x13ed   :  { %v4975_v22 = vadd.f32 %v1892_v14, %v1890_v36  ;;  %v5009_v36 = vpack.c.bf16 %v2159_v25, %v2157_v9  ;;  %v2156_v14 = vld [vmem:[#allocation2 + $0x60] sm:$0xff] }
0x13ee   :  { %v1898_v6 = vpop.permute.xlu1 %1897  ;;  %v2277_v25 = vld [vmem:[#allocation2 + $0xc0] sm:$0xff] }
0x13ef   :  { %v1904_v53 = vsel %vm374_vm3, %v4975_v22, %v1895_v7  ;;  %v1906_v15 = vsel %vm374_vm3, %v1898_v6, %v1902_v59  ;;  %v2366_v11 = vmul.f32 %v4863_v19, %v4975_v22  ;;  %v5005_v7 = vpack.c.bf16 %v2154_v16, %v2152_v35  ;;  %v2158_v59 = vld [vmem:[#allocation2 + $0x70] sm:$0xff] }
0x13f0   :  { %v1905_v32 = vsel %vm376_vm4, %v1904_v53, %v1898_v6  ;;  %3187 = vmatprep.mubr.msk.f32.mxu1 %vm376_vm4, %v1906_v15  ;;  %v2161_v6 = vld [vmem:[#allocation2 + $0x88] sm:$0xff]  ;;  %v2163_v53 = vld [vmem:[#allocation2 + $0x98] sm:$0xff]  ;;  %v5014_v15 = vpack.c.bf16 %v2158_v59, %v2156_v14 }
0x13f1   :  { %2027 = vmatmul.mubr.f32.vlgmr.msra.gmra.mrb[10].mxu1 %v1905_v32  ;;  %v5018_v32 = vpack.c.bf16 %v2163_v53, %v2161_v6  ;;  %v2280_v53 = vld [vmem:[#allocation2 + $0xf0] sm:$0xff] }
0x13f2   :  { %3492 = vmatprep.mubr.msk.f32.mxu1 %vm4289_vm1, %v5334_v2  ;;  %v2056_v17 = vpop.permute.xlu1 %2055 }
0x14c4   :  { %v2028_v34 = vpop.f32.mrb[10].mxu1 }
0x14c5   :  { %v2038_v3 = vadd.f32 %v2028_v34, %v4533_v54  ;;  %v2030_v13 = vpop.f32.mrb[11].mxu1  ;;  %v2033_v38 = vadd.f32 %v4996_v47, %v2028_v34  ;;  %v2160_v34 = vld [vmem:[#allocation2 + $0x80] sm:$0xff] }
0x14c6   :  { %v2048_v18 = vadd.f32 %v2030_v13, %v4535_v57  ;;  %v2043_v42 = vadd.f32 %v4999_v55, %v2030_v13  ;;  %v2165_v13 = vld [vmem:[#allocation2 + $0xa8] sm:$0xff] }
0x14c7   :  { %v2039_v37 = vmul.f32 0.5, %v2038_v3  ;;  %v2034_v46 = vmul.f32 0.5, %v2033_v38  ;;  %v2162_v3 = vld [vmem:[#allocation2 + $0x90] sm:$0xff] }
0x14c8   :  { %4188 = vtanh.f32 %v2048_v18  ;;  %v2044_v1 = vmul.f32 0.5, %v2043_v42  ;;  %v2167_v18 = vld [vmem:[#allocation2 + $0xb8] sm:$0xff] }
0x14c9   :  { %4190 = vtanh.f32 %v2039_v37  ;;  %v5021_v37 = vpack.c.bf16 %v2162_v3, %v2160_v34  ;;  %v5024_v31 = vpack.c.bf16 %v2167_v18, %v2165_v13 }
0x14ca   :  { %4192 = vtanh.f32 %v2034_v46 }
0x14cb   :  { %4194 = vtanh.f32 %v2044_v1 }
0x14d2   :  { %v4189_v29 = vpop.eup %4188 }
0x14d3   :  { %2051 = vrot.lane.b32.xlu0 %v4189_v29, %s4287_s24  ;;  %v4191_v52 = vpop.eup %4190  ;;  %v2166_v29 = vld [vmem:[#allocation2 + $0xb0] sm:$0xff] }
0x14d4   :  { %v2041_v12 = vmul.f32 0.5, %v4191_v52  ;;  %v4193_v41 = vpop.eup %4192  ;;  %v5027_v52 = vpack.c.bf16 %v2166_v29, %v2164_v44  ;;  %v2281_v44 = vld [vmem:[#allocation2 + $0x100] sm:$0xff]  ;;  %v2282_v29 = vld [vmem:[#allocation2 + $0x110] sm:$0xff] }
0x14d5   :  { %v2036_v51 = vmul.f32 0.5, %v4193_v41  ;;  %v4195_v4 = vpop.eup %4194 }
0x14d6   :  { %v2042_v8 = vadd.f32 0.5, %v2041_v12  ;;  %v2046_v27 = vmul.f32 0.5, %v4195_v4 }
0x14d7   :  { %2254 = vrot.lane.b32.xlu0 %v2253_v33, %s4287_s24  ;;  %v2037_v48 = vadd.f32 0.5, %v2036_v51  ;;  %v5036_v33 = vld [vmem:[#allocation2 + $0x370] ss:$0 sm:$0xff] }
0x14d8   :  { %v2058_v50 = vmul.f32 %v2056_v17, %v2042_v8  ;;  %v2047_v56 = vadd.f32 0.5, %v2046_v27 }
0x14da   :  { %2060 = vrot.lane.b32.xlu1 %v2058_v50, %s4287_s24 }
0x14db   :  { %2368 = vrot.lane.b32.xlu0 %v2366_v11, %s4285_s20 }
0x1545   :  { %v2052_v30 = vpop.permute.xlu0 %2051 }
0x1546   :  { %v2054_v20 = vmul.f32 %v2052_v30, %v2037_v48 }
0x154c   :  { %v2061_v58 = vpop.permute.xlu1 %2060 }
0x154d   :  { %v5002_v23 = vadd.f32 %v2061_v58, %v2054_v20 }
0x154f   :  { %4196 = vtanh.f32 %v5002_v23 }
0x1559   :  { %v4197_v5 = vpop.eup %4196 }
0x155a   :  { %v5007_v26 = vmul.f32 %v4197_v5, %v2047_v56  ;;  %v2278_v56 = vld [vmem:[#allocation2 + $0xd0] sm:$0xff]  ;;  %v2255_v5 = vpop.permute.xlu0 %2254 }
0x155b   :  { %v5046_v6 = vpack.c.bf16 %v2278_v56, %v2277_v25 }
0x155c   :  { %3455 = vmatmul.mubr.msk.f32.vlgmr.msra.gmra.mrb[20].mxu0 %vm140_vm2, %v5007_v26 }
0x155d   :  { %3912 = vmatpush1.bf16.msra.mxu0 %v5005_v7  ;;  %2232 = vmatprep.mubr.f32.mxu0 %v5334_v2 }
0x155e   :  { %3914 = vmatprep.subr.bf16.mxu0 %v5009_v36 }
0x1561   :  { %3916 = vmatpush1.bf16.msra.mxu0 %v5014_v15 }
0x1562   :  { %3918 = vmatprep.subr.bf16.mxu0 %v5018_v32 }
0x1565   :  { %3920 = vmatpush1.bf16.msra.mxu0 %v5021_v37 }
0x1566   :  { %3922 = vmatprep.subr.bf16.mxu0 %v5024_v31 }
0x1569   :  { %3924 = vmatpush1.bf16.msra.mxu0 %v5027_v52 }
0x156a   :  { %3925 = vmatprep.subr.bf16.mxu0 %v5333_v0 }
0x156c   :  { %3189 = vmatmul.mubr.msk.f32.vlgmr.msra.gmra.mrb[22].mxu0 %vm140_vm2, %v4921_v63 }
0x156d   :  { %3473 = vmatprep.mubr.msk.f32.mxu0 %vm4289_vm1, %v5334_v2  ;;  %3927 = vmatpush3.bf16.msra.mxu0 %v5046_v6 }
0x156e   :  { %3928 = vmatprep.subr.bf16.mxu0 %v5333_v0 }
0x162f   :  { %v2143_v12 = vpop.f32.mrb[20].mxu0 }
0x1630   :  { %v2144_v8 = vadd.f32 %v5036_v33, %v2143_v12  ;;  %v3456_v17 = vpop.f32.mrb[21].mxu0  ;;  %v5054_v12 = vpack.c.bf16 %v2282_v29, %v2281_v44  ;;  %v2420_v44 = vld [vmem:[#allocation2 + $0x168] sm:$0xff]  ;;  %v2422_v29 = vld [vmem:[#allocation2 + $0x178] sm:$0xff] }
0x1631   :  { %v2284_v17 = vld [vmem:[#allocation2 + $0x130] sm:$0xff] }
0x1632   :  { %v2147_v50 = vmul.f32 0.5, %v2144_v8  ;;  %v2283_v8 = vld [vmem:[#allocation2 + $0x120] sm:$0xff] }
0x1634   :  { %4198 = vtanh.f32 %v2147_v50  ;;  %v5060_v50 = vpack.c.bf16 %v2284_v17, %v2283_v8  ;;  %v5089_v17 = vpack.c.bf16 %v2422_v29, %v2420_v44  ;;  %v2435_v29 = vld [vmem:[#allocation2 + $0x1e0] sm:$0xff] }
0x163e   :  { %v4199_v11 = vpop.eup %4198 }
0x163f   :  { %v2149_v38 = vmul.f32 0.5, %v4199_v11  ;;  %v2234_v46 = vpop.f32.mrb[22].mxu0 }
0x1640   :  { %v2240_v42 = vrot.slane %v2234_v46, 4  ;;  %v2236_v41 = vpop.f32.mrb[23].mxu0 }
0x1641   :  { %v2150_v1 = vadd.f32 0.5, %v2149_v38  ;;  %v2273_v59 = vrot.slane %v2236_v41, 4 }
0x1642   :  { %v2242_v51 = vadd.f32 %v2240_v42, %v4354_v39 }
0x1643   :  { %2151 = vst.msk [vmem:[%s5305_s2 + $0x3] sm:$0x1] %vm626_vm5, %v2150_v1 }
0x1644   :  { %v2243_v63 = vadd.f32 %v4709_v10, %v2242_v51  ;;  %v2248_v30 = vadd.f32 %v2242_v51, %v4360_v43  ;;  %v2279_v10 = vld [vmem:[#allocation2 + $0xe0] sm:$0xff] }
0x1645   :  { %v5049_v13 = vpack.c.bf16 %v2280_v53, %v2279_v10  ;;  %v2416_v10 = vld [vmem:[#allocation2 + $0x148] sm:$0xff]  ;;  %v2418_v53 = vld [vmem:[#allocation2 + $0x158] sm:$0xff] }
0x1646   :  { %v2244_v48 = vmul.f32 0.5, %v2243_v63  ;;  %v2249_v20 = vmul.f32 0.5, %v2248_v30 }
0x1647   :  { %3930 = vmatpush3.bf16.msra.mxu0 %v5049_v13 }
0x1648   :  { %4200 = vtanh.f32 %v2244_v48  ;;  %3931 = vmatprep.subr.bf16.mxu0 %v5333_v0  ;;  %v2369_v48 = vpop.permute.xlu0 %2368 }
0x1649   :  { %4202 = vtanh.f32 %v2249_v20 }
0x164b   :  { %3933 = vmatpush3.bf16.msra.mxu0 %v5054_v12 }
0x164c   :  { %3934 = vmatprep.subr.bf16.mxu0 %v5333_v0 }
0x164f   :  { %3936 = vmatpush3.bf16.msra.mxu0 %v5060_v50 }
0x1652   :  { %v4201_v58 = vpop.eup %4200 }
0x1653   :  { %v4203_v4 = vpop.eup %4202  ;;  %v2246_v27 = vmul.f32 0.5, %v4201_v58 }
0x1654   :  { %v2251_v35 = vmul.f32 0.5, %v4203_v4 }
0x1655   :  { %v2247_v16 = vadd.f32 0.5, %v2246_v27 }
0x1656   :  { %v2252_v9 = vadd.f32 0.5, %v2251_v35 }
0x1657   :  { %v2271_v14 = vsub.f32 1.0, %v2247_v16 }
0x1658   :  { %v2257_v34 = vmul.f32 %v2255_v5, %v2252_v9 }
0x1659   :  { %v2275_v3 = vmul.f32 %v2273_v59, %v2271_v14 }
0x165a   :  { %v2259_v18 = vrot.slane %v2257_v34, 4  ;;  %v2415_v34 = vld [vmem:[#allocation2 + $0x140] sm:$0xff] }
0x165c   :  { %2260 = vrot.lane.b32.xlu1 %v2259_v18, %s4287_s24  ;;  %v2417_v18 = vld [vmem:[#allocation2 + $0x150] sm:$0xff] }
0x165d   :  { %v5087_v8 = vpack.c.bf16 %v2417_v18, %v2415_v34  ;;  %v2438_v34 = vld [vmem:[#allocation2 + $0x1f8] sm:$0xff] }
0x1660   :  { %2378 = vrot.lane.b32.xlu1 %v4975_v22, %s4285_s20 }
0x16ce   :  { %v2261_v11 = vpop.permute.xlu1 %2260 }
0x16cf   :  { %v2263_v38 = vmul.f32 %v4911_v62, %v2261_v11  ;;  %v2419_v11 = vld [vmem:[#allocation2 + $0x160] sm:$0xff] }
0x16d1   :  { %v2265_v46 = vrot.slane %v2263_v38, 4  ;;  %v2421_v38 = vld [vmem:[#allocation2 + $0x170] sm:$0xff] }
0x16d2   :  { %v2379_v56 = vpop.permute.xlu1 %2378 }
0x16d3   :  { %v2267_v42 = vadd.f32 %v2265_v46, %v4356_v40  ;;  %v2424_v46 = vld [vmem:[#allocation2 + $0x188] sm:$0xff] }
0x16d5   :  { %v2268_v41 = vadd.f32 %v4915_v61, %v2267_v42  ;;  %v2426_v42 = vld [vmem:[#allocation2 + $0x198] sm:$0xff] }
0x16d7   :  { %4204 = vtanh.f32 %v2268_v41  ;;  %v5093_v41 = vpack.c.bf16 %v2421_v38, %v2419_v11  ;;  %v2437_v11 = vld [vmem:[#allocation2 + $0x1f0] sm:$0xff]  ;;  %v2440_v38 = vld [vmem:[#allocation2 + $0x208] sm:$0xff] }
0x16e1   :  { %v4205_v1 = vpop.eup %4204 }
0x16e2   :  { %v2270_v51 = vmul.f32 %v4205_v1, %v2247_v16  ;;  %v5096_v1 = vpack.c.bf16 %v2426_v42, %v2424_v46  ;;  %v2442_v46 = vld [vmem:[#allocation2 + $0x218] sm:$0xff]  ;;  %v5117_v42 = vpack.c.bf16 %v2437_v11, %v2435_v29  ;;  %v2447_v11 = vld [vmem:[#allocation2 + $0x240] sm:$0xff] }
0x16e4   :  { %v5067_v63 = vadd.f32 %v2275_v3, %v2270_v51  ;;  %v5085_v3 = vpack.c.bf16 %v2418_v53, %v2416_v10  ;;  %v2423_v51 = vld [vmem:[#allocation2 + $0x180] sm:$0xff]  ;;  %v2433_v10 = vld [vmem:[#allocation2 + $0x1d0] sm:$0xff]  ;;  %v2436_v53 = vld [vmem:[#allocation2 + $0x1e8] sm:$0xff] }
0x16e5   :  { %v5114_v44 = vpack.c.bf16 %v2438_v34, %v2436_v53  ;;  %v2450_v53 = vld [vmem:[#allocation2 + $0x258] sm:$0xff] }
0x16e6   :  { %v5070_v30 = vrot.slane %v5067_v63, 4  ;;  %3938 = vmatprep.subr.bf16.mxu0 %v5085_v3 }
0x16e8   :  { %3474 = vmatmul.mubr.msk.f32.vlgmr.msra.gmra.mrb[24].mxu0 %vm140_vm2, %v5070_v30 }
0x16e9   :  { %3940 = vmatpush1.bf16.msra.mxu0 %v5087_v8 }
0x16ea   :  { %3942 = vmatprep.subr.bf16.mxu0 %v5089_v17 }
0x16ed   :  { %3944 = vmatpush1.bf16.msra.mxu0 %v5093_v41 }
0x16ee   :  { %3946 = vmatprep.subr.bf16.mxu0 %v5096_v1 }
0x17bb   :  { %v5074_v20 = vpop.f32.mrb[24].mxu0 }
0x17bc   :  { %v2371_v58 = vadd.f32 %v2369_v48, %v5074_v20  ;;  %v3475_v4 = vpop.f32.mrb[25].mxu0  ;;  %v2425_v48 = vld [vmem:[#allocation2 + $0x190] sm:$0xff] }
0x17bd   :  { %v2430_v4 = vld [vmem:[#allocation2 + $0x1b8] sm:$0xff] }
0x17be   :  { %v2372_v27 = vadd.f32 %v2371_v58, %v5347_v45  ;;  %v2428_v58 = vld [vmem:[#allocation2 + $0x1a8] sm:$0xff]  ;;  %v2455_v45 = vld [vmem:[#allocation2 + $0x280] sm:$0xff] }
0x17c0   :  { %v2373_v35 = vmul.f32 0.5, %v2372_v27  ;;  %v5099_v27 = vpack.c.bf16 %v2425_v48, %v2423_v51  ;;  %v5120_v51 = vpack.c.bf16 %v2442_v46, %v2440_v38  ;;  %v2439_v48 = vld [vmem:[#allocation2 + $0x200] sm:$0xff]  ;;  %v2449_v38 = vld [vmem:[#allocation2 + $0x250] sm:$0xff]  ;;  %v2452_v46 = vld [vmem:[#allocation2 + $0x268] sm:$0xff] }
0x17c2   :  { %4206 = vtanh.f32 %v2373_v35  ;;  %v5102_v35 = vpack.c.bf16 %v2430_v4, %v2428_v58  ;;  %3948 = vmatpush1.bf16.msra.mxu0 %v5099_v27  ;;  %v2441_v58 = vld [vmem:[#allocation2 + $0x210] sm:$0xff]  ;;  %v2444_v4 = vld [vmem:[#allocation2 + $0x228] sm:$0xff] }
0x17c4   :  { %3950 = vmatprep.subr.bf16.mxu0 %v5102_v35 }
0x17cc   :  { %v4207_v9 = vpop.eup %4206 }
0x17cd   :  { %v2375_v16 = vmul.f32 0.5, %v4207_v9  ;;  %v2427_v9 = vld [vmem:[#allocation2 + $0x1a0] sm:$0xff] }
0x17cf   :  { %v2376_v25 = vadd.f32 0.5, %v2375_v16  ;;  %v2429_v16 = vld [vmem:[#allocation2 + $0x1b0] sm:$0xff] }
0x17d1   :  { %v2381_v5 = vmul.f32 %v2379_v56, %v2376_v25  ;;  %v2432_v25 = vld [vmem:[#allocation2 + $0x1c8] sm:$0xff]  ;;  %v2434_v56 = vld [vmem:[#allocation2 + $0x1d8] sm:$0xff] }
0x17d3   :  { %2383 = vrot.lane.b32.xlu0 %v2381_v5, %s4290_s0  ;;  %v5105_v5 = vpack.c.bf16 %v2429_v16, %v2427_v9  ;;  %v2446_v9 = vld [vmem:[#allocation2 + $0x238] sm:$0xff]  ;;  %v5123_v16 = vpack.c.bf16 %v2441_v58, %v2439_v48  ;;  %v5135_v58 = vpack.c.bf16 %v2449_v38, %v2447_v11  ;;  %v2460_v11 = vld [vmem:[#allocation2 + $0x2a8] sm:$0xff] }
0x17d4   :  { %v2454_v48 = vld [vmem:[#allocation2 + $0x278] sm:$0xff] }
0x17d5   :  { %3952 = vmatpush1.bf16.msra.mxu0 %v5105_v5  ;;  %5352 = vst [vmem:[#allocation10_spill] sm:$0xff] %v5135_v58  ;;  %v2462_v38 = vld [vmem:[#allocation2 + $0x2b8] sm:$0xff] }
0x1845   :  { %v2384_v14 = vpop.permute.xlu0 %2383 }
0x1846   :  { %v2386_v59 = vmul.f32 %v4953_v24, %v2384_v14  ;;  %v5108_v14 = vpack.c.bf16 %v2434_v56, %v2432_v25  ;;  %v5126_v25 = vpack.c.bf16 %v2446_v9, %v2444_v4  ;;  %v2443_v56 = vld [vmem:[#allocation2 + $0x220] sm:$0xff]  ;;  %v5138_v4 = vpack.c.bf16 %v2454_v48, %v2452_v46  ;;  %v2453_v24 = vld [vmem:[#allocation2 + $0x270] sm:$0xff] }
0x1847   :  { %v2451_v9 = vld [vmem:[#allocation2 + $0x260] sm:$0xff]  ;;  %v5150_v48 = vpack.c.bf16 %v2462_v38, %v2460_v11  ;;  %v2465_v38 = vld [vmem:[#allocation2 + $0x2d0] sm:$0xff] }
0x1848   :  { %2388 = vrot.lane.b32.xlu1 %v2386_v59, %s4291_s25  ;;  %v2431_v59 = vld [vmem:[#allocation2 + $0x1c0] sm:$0xff]  ;;  %3954 = vmatprep.subr.bf16.mxu0 %v5108_v14 }
0x1849   :  { %v5111_v18 = vpack.c.bf16 %v2433_v10, %v2431_v59  ;;  %v2445_v59 = vld [vmem:[#allocation2 + $0x230] sm:$0xff]  ;;  %v2448_v10 = vld [vmem:[#allocation2 + $0x248] sm:$0xff]  ;;  %v2463_v11 = vld [vmem:[#allocation2 + $0x2c0] sm:$0xff] }
0x184a   :  { %v5129_v34 = vpack.c.bf16 %v2445_v59, %v2443_v56  ;;  %v5132_v29 = vpack.c.bf16 %v2450_v53, %v2448_v10  ;;  %v2456_v56 = vld [vmem:[#allocation2 + $0x288] sm:$0xff]  ;;  %v2458_v59 = vld [vmem:[#allocation2 + $0x298] sm:$0xff]  ;;  %v5141_v10 = vpack.c.bf16 %v2453_v24, %v2451_v9 }
0x184b   :  { %3956 = vmatpush1.bf16.msra.mxu0 %v5111_v18  ;;  %v5144_v53 = vpack.c.bf16 %v2458_v59, %v2456_v56  ;;  %v2466_v59 = vld [vmem:[#allocation2 + $0x2d8] sm:$0xff] }
0x184c   :  { %2402 = vrot.lane.b32.xlu1 %v5070_v30, %s4285_s20  ;;  %3958 = vmatprep.subr.bf16.mxu0 %v5114_v44  ;;  %5350 = vst [vmem:[#allocation8_spill] sm:$0xff] %v5129_v34  ;;  %5351 = vst [vmem:[#allocation9_spill] sm:$0xff] %v5132_v29 }
0x184d   :  { %5353 = vst [vmem:[#allocation11_spill] sm:$0xff] %v5141_v10  ;;  %5354 = vst [vmem:[#allocation12_spill] sm:$0xff] %v5144_v53 }
0x184f   :  { %3960 = vmatpush1.bf16.msra.mxu0 %v5117_v42 }
0x1850   :  { %2409 = vrot.lane.b32.xlu1 %v5002_v23, %s4285_s20  ;;  %3962 = vmatprep.subr.bf16.mxu0 %v5120_v51 }
0x1853   :  { %3964 = vmatpush1.bf16.msra.mxu0 %v5123_v16 }
0x1854   :  { %3966 = vmatprep.subr.bf16.mxu0 %v5126_v25 }
0x1857   :  { %3968 = vmatpush1.bf16.msra.mxu0 %v5129_v34  ;;  %v2457_v34 = vld [vmem:[#allocation2 + $0x290] sm:$0xff] }
0x1858   :  { %3970 = vmatprep.subr.bf16.mxu0 %v5132_v29  ;;  %v5147_v46 = vpack.c.bf16 %v2457_v34, %v2455_v45  ;;  %v2459_v29 = vld [vmem:[#allocation2 + $0x2a0] sm:$0xff]  ;;  %v2464_v34 = vld [vmem:[#allocation2 + $0x2c8] sm:$0xff] }
0x185b   :  { %3972 = vmatpush1.bf16.msra.mxu0 %v5135_v58  ;;  %v2461_v58 = vld [vmem:[#allocation2 + $0x2b0] sm:$0xff] }
0x185c   :  { %3974 = vmatprep.subr.bf16.mxu0 %v5138_v4  ;;  %v5153_v24 = vpack.c.bf16 %v2461_v58, %v2459_v29  ;;  %v2359_v58 = vmul.f32 %v4967_v21, %v4975_v22 }
0x185e   :  { %5355 = vst [vmem:[#allocation13_spill] sm:$0xff] %v5153_v24 }
0x185f   :  { %3976 = vmatpush1.bf16.msra.mxu0 %v5141_v10  ;;  %v5161_v10 = vpack.c.bf16 %v2465_v38, %v2463_v11 }
0x1860   :  { %3978 = vmatprep.subr.bf16.mxu0 %v5144_v53  ;;  %v5159_v53 = vpack.c.bf16 %v2466_v59, %v2464_v34 }
0x1861   :  { %5357 = vst [vmem:[#allocation15_spill] sm:$0xff] %v5161_v10 }
0x1862   :  { %5356 = vst [vmem:[#allocation14_spill] sm:$0xff] %v5159_v53 }
0x1863   :  { %3980 = vmatpush1.bf16.msra.mxu0 %v5147_v46 }
0x1864   :  { %3982 = vmatprep.subr.bf16.mxu0 %v5150_v48 }
0x1867   :  { %3984 = vmatpush1.bf16.msra.mxu0 %v5153_v24 }
0x1868   :  { %3986 = vmatprep.subr.bf16.mxu0 %v5159_v53 }
0x186b   :  { %3988 = vmatpush1.bf16.msra.mxu0 %v5161_v10 }
0x186c   :  { %4081 = vmatprep.subr.bf16.mxu0 %v5333_v0 }
0x18ba   :  { %v2389_v9 = vpop.permute.xlu1 %2388 }
0x18bb   :  { %v2391_v56 = vadd.f32 %v2389_v9, %v5074_v20  ;;  %v2360_v9 = vadd.f32 %v2359_v58, %v5074_v20 }
0x18bd   :  { %v2392_v45 = vadd.f32 %v2391_v56, %v5349_v49  ;;  %v2361_v56 = vadd.f32 %v4971_v60, %v2360_v9 }
0x18bf   :  { %4208 = vtanh.f32 %v2392_v45  ;;  %v2362_v45 = vmul.f32 0.5, %v2361_v56 }
0x18c1   :  { %4210 = vtanh.f32 %v2362_v45 }
0x18c9   :  { %v4209_v29 = vpop.eup %4208 }
0x18ca   :  { %2395 = vrot.lane.b32.xlu0 %v4209_v29, %s4292_s26  ;;  %v2403_v29 = vpop.permute.xlu1 %2402 }
0x18cb   :  { %v4211_v34 = vpop.eup %4210 }
0x18cc   :  { %v2364_v59 = vmul.f32 0.5, %v4211_v34  ;;  %v2574_v34 = vld [vmem:[#allocation2 + $0x2e0] sm:$0xff] }
0x18ce   :  { %2405 = vrot.lane.b32.xlu0 %v5007_v26, %s4293_s29  ;;  %v2365_v11 = vadd.f32 0.5, %v2364_v59  ;;  %v2575_v59 = vld [vmem:[#allocation2 + $0x2f0] sm:$0xff] }
0x18d0   :  { %v2399_v38 = vsub.f32 1.0, %v2365_v11 }
0x18d2   :  { %2563 = vrot.lane.b32.xlu0 %v5002_v23, %s4287_s24  ;;  %v2400_v26 = vmul.f32 %v2399_v38, %v4975_v22  ;;  %v2410_v23 = vpop.permute.xlu1 %2409  ;;  %v2577_v38 = vld [vmem:[#allocation2 + $0x310] sm:$0xff] }
0x193c   :  { %v2396_v49 = vpop.permute.xlu0 %2395 }
0x193d   :  { %v2398_v10 = vmul.f32 %v2396_v49, %v2365_v11  ;;  %v3990_v11 = vpack.c.bf16 %v2575_v59, %v2574_v34  ;;  %v2761_v34 = vrot.slane %v5067_v63, 7 }
0x193f   :  { %v5176_v53 = vadd.f32 %v2400_v26, %v2398_v10  ;;  %3991 = vmatpush3.bf16.msra.mxu1 %v3990_v11  ;;  %v2578_v26 = vld [vmem:[#allocation2 + $0x320] sm:$0xff] }
0x1940   :  { %v2406_v24 = vpop.permute.xlu0 %2405  ;;  %3992 = vmatprep.subr.bf16.mxu1 %v5333_v0 }
0x1941   :  { %v2412_v20 = vsel %vm374_vm3, %v5176_v53, %v2403_v29  ;;  %v2414_v58 = vsel %vm374_vm3, %v2406_v24, %v2410_v23  ;;  %v2579_v23 = vld [vmem:[#allocation2 + $0x330] sm:$0xff] }
0x1942   :  { %v2413_v9 = vsel %vm376_vm4, %v2412_v20, %v2406_v24  ;;  %3191 = vmatprep.mubr.msk.f32.mxu0 %vm376_vm4, %v2414_v58  ;;  %v2576_v24 = vld [vmem:[#allocation2 + $0x300] sm:$0xff]  ;;  %v3996_v20 = vpack.c.bf16 %v2579_v23, %v2578_v26 }
0x1943   :  { %2535 = vmatmul.mubr.f32.vlgmr.msra.gmra.mrb[26].mxu0 %v2413_v9  ;;  %v3993_v29 = vpack.c.bf16 %v2577_v38, %v2576_v24  ;;  %v2580_v9 = vld [vmem:[#allocation2 + $0x340] sm:$0xff] }
0x1944   :  { %3530 = vmatprep.mubr.msk.f32.mxu0 %vm4289_vm1, %v5334_v2  ;;  %4083 = vmatpush3.bf16.msra.mxu0 %v3990_v11  ;;  %v2564_v24 = vpop.permute.xlu0 %2563 }
0x1945   :  { %4084 = vmatprep.subr.bf16.mxu0 %v5333_v0  ;;  %3994 = vmatpush3.bf16.msra.mxu1 %v3993_v29 }
0x1946   :  { %3995 = vmatprep.subr.bf16.mxu1 %v5333_v0 }
0x1948   :  { %4086 = vmatpush3.bf16.msra.mxu0 %v3993_v29  ;;  %v2874_v29 = vmul.f32 %v4863_v19, %v5176_v53 }
0x1949   :  { %4087 = vmatprep.subr.bf16.mxu0 %v5333_v0  ;;  %3997 = vmatpush3.bf16.msra.mxu1 %v3996_v20 }
0x194a   :  { %3998 = vmatprep.subr.bf16.mxu1 %v5333_v0 }
0x194c   :  { %4089 = vmatpush3.bf16.msra.mxu0 %v3996_v20 }
0x194d   :  { %4090 = vmatprep.subr.bf16.mxu0 %v5333_v0 }
0x1a16   :  { %v2536_v49 = vpop.f32.mrb[26].mxu0 }
0x1a17   :  { %v2546_v22 = vadd.f32 %v2536_v49, %v4533_v54  ;;  %v2538_v10 = vpop.f32.mrb[27].mxu0  ;;  %v2541_v63 = vadd.f32 %v4996_v47, %v2536_v49 }
0x1a18   :  { %v2556_v56 = vadd.f32 %v2538_v10, %v4535_v57  ;;  %v2551_v23 = vadd.f32 %v4999_v55, %v2538_v10 }
0x1a19   :  { %v2547_v45 = vmul.f32 0.5, %v2546_v22  ;;  %v2581_v22 = vld [vmem:[#allocation2 + $0x350] sm:$0xff]  ;;  %v2542_v26 = vmul.f32 0.5, %v2541_v63 }
0x1a1a   :  { %4212 = vtanh.f32 %v2556_v56  ;;  %v3999_v59 = vpack.c.bf16 %v2581_v22, %v2580_v9 }
0x1a1b   :  { %4214 = vtanh.f32 %v2547_v45 }
0x1a1c   :  { %4000 = vmatpush3.bf16.msra.mxu1 %v3999_v59  ;;  %4092 = vmatpush3.bf16.msra.mxu0 %v3999_v59  ;;  %4216 = vtanh.f32 %v2542_v26 }
0x1a1d   :  { %4002 = vmatprep.subr.bf16.mxu1 %v4986_v28 }
0x1a24   :  { %v4213_v58 = vpop.eup %4212 }
0x1a25   :  { %2559 = vrot.lane.b32.xlu1 %v4213_v58, %s4287_s24  ;;  %v4215_v56 = vpop.eup %4214  ;;  %v2552_v58 = vmul.f32 0.5, %v2551_v23 }
0x1a26   :  { %v2549_v45 = vmul.f32 0.5, %v4215_v56  ;;  %v4217_v20 = vpop.eup %4216 }
0x1a27   :  { %v2544_v9 = vmul.f32 0.5, %v4217_v20  ;;  %4218 = vtanh.f32 %v2552_v58 }
0x1a28   :  { %v2550_v11 = vadd.f32 0.5, %v2549_v45 }
0x1a29   :  { %2762 = vrot.lane.b32.xlu1 %v2761_v34, %s4287_s24  ;;  %v2545_v19 = vadd.f32 0.5, %v2544_v9 }
0x1a2a   :  { %v2566_v38 = vmul.f32 %v2564_v24, %v2550_v11 }
0x1a2c   :  { %2568 = vrot.lane.b32.xlu0 %v2566_v38, %s4287_s24 }
0x1a2d   :  { %2876 = vrot.lane.b32.xlu1 %v2874_v29, %s4285_s20 }
0x1a31   :  { %v4219_v28 = vpop.eup %4218 }
0x1a32   :  { %v2554_v59 = vmul.f32 0.5, %v4219_v28 }
0x1a34   :  { %v2555_v11 = vadd.f32 0.5, %v2554_v59 }
0x1a97   :  { %v2560_v22 = vpop.permute.xlu1 %2559 }
0x1a98   :  { %v2562_v56 = vmul.f32 %v2560_v22, %v2545_v19 }
0x1a9e   :  { %v2569_v45 = vpop.permute.xlu0 %2568 }
0x1a9f   :  { %v5203_v34 = vadd.f32 %v2569_v45, %v2562_v56 }
0x1aa1   :  { %4220 = vtanh.f32 %v5203_v34 }
0x1aab   :  { %v4221_v49 = vpop.eup %4220 }
0x1aac   :  { %v5206_v24 = vmul.f32 %v4221_v49, %v2555_v11 }
0x1aae   :  { %3493 = vmatmul.mubr.msk.f32.vlgmr.msra.gmra.mrb[12].mxu1 %vm140_vm2, %v5206_v24 }
0x1aaf   :  { %4004 = vmatpush1.bf16.msra.mxu1 %v5005_v7  ;;  %2740 = vmatprep.mubr.f32.mxu1 %v5334_v2 }
0x1ab0   :  { %4006 = vmatprep.subr.bf16.mxu1 %v5009_v36 }
0x1ab3   :  { %4008 = vmatpush1.bf16.msra.mxu1 %v5014_v15 }
0x1ab4   :  { %4010 = vmatprep.subr.bf16.mxu1 %v5018_v32 }
0x1ab7   :  { %4012 = vmatpush1.bf16.msra.mxu1 %v5021_v37 }
0x1ab8   :  { %4014 = vmatprep.subr.bf16.mxu1 %v5024_v31 }
0x1abb   :  { %4016 = vmatpush1.bf16.msra.mxu1 %v5027_v52 }
0x1abc   :  { %4017 = vmatprep.subr.bf16.mxu1 %v5333_v0 }
0x1abe   :  { %3193 = vmatmul.mubr.msk.f32.vlgmr.msra.gmra.mrb[14].mxu1 %vm140_vm2, %v5070_v30 }
0x1abf   :  { %4019 = vmatpush3.bf16.msra.mxu1 %v5046_v6  ;;  %3511 = vmatprep.mubr.msk.f32.mxu1 %vm4289_vm1, %v5334_v2 }
0x1ac0   :  { %4020 = vmatprep.subr.bf16.mxu1 %v5333_v0 }
0x1ac3   :  { %4022 = vmatpush3.bf16.msra.mxu1 %v5049_v13 }
0x1ac4   :  { %4023 = vmatprep.subr.bf16.mxu1 %v5333_v0 }
0x1ac7   :  { %4025 = vmatpush3.bf16.msra.mxu1 %v5054_v12 }
0x1ac8   :  { %4026 = vmatprep.subr.bf16.mxu1 %v5333_v0  ;;  %v4258_v0 = vld [vmem:[#allocation2 + $0x360] ss:$0 sm:$0xff] }
0x1acb   :  { %4028 = vmatpush3.bf16.msra.mxu1 %v5060_v50 }
0x1acc   :  { %4030 = vmatprep.subr.bf16.mxu1 %v5085_v3 }
0x1b81   :  { %v2651_v7 = vpop.f32.mrb[12].mxu1 }
0x1b82   :  { %v2652_v36 = vadd.f32 %v5036_v33, %v2651_v7  ;;  %v3494_v15 = vpop.f32.mrb[13].mxu1 }
0x1b84   :  { %v2655_v32 = vmul.f32 0.5, %v2652_v36 }
0x1b86   :  { %4222 = vtanh.f32 %v2655_v32 }
0x1b90   :  { %v4223_v2 = vpop.eup %4222 }
0x1b91   :  { %v2657_v37 = vmul.f32 0.5, %v4223_v2  ;;  %v2742_v31 = vpop.f32.mrb[14].mxu1  ;;  %v5367_v2 = vld [vmem:[#allocation7_spill] sm:$0xff] }
0x1b92   :  { %v2748_v52 = vrot.slane %v2742_v31, 3  ;;  %v2744_v6 = vpop.f32.mrb[15].mxu1 }
0x1b93   :  { %v2658_v13 = vadd.f32 0.5, %v2657_v37  ;;  %v2781_v9 = vrot.slane %v2744_v6, 3  ;;  %v5368_v6 = vld [vmem:[#allocation6_spill] sm:$0xff] }
0x1b94   :  { %v2750_v12 = vadd.f32 %v2748_v52, %v4354_v39  ;;  %v2763_v39 = vpop.permute.xlu1 %2762 }
0x1b95   :  { %2659 = vst.msk [vmem:[%s5305_s2 + $0x4] sm:$0x1] %vm626_vm5, %v2658_v13 }
0x1b96   :  { %v2751_v50 = vadd.f32 %v4258_v0, %v2750_v12  ;;  %v2756_v30 = vadd.f32 %v2750_v12, %v4360_v43  ;;  %v2867_v0 = vmul.f32 %v4967_v21, %v5176_v53 }
0x1b98   :  { %v2752_v3 = vmul.f32 0.5, %v2751_v50  ;;  %v2757_v10 = vmul.f32 0.5, %v2756_v30 }
0x1b9a   :  { %4224 = vtanh.f32 %v2752_v3 }
0x1b9b   :  { %4226 = vtanh.f32 %v2757_v10 }
0x1ba4   :  { %v4225_v38 = vpop.eup %4224 }
0x1ba5   :  { %v4227_v29 = vpop.eup %4226  ;;  %v2754_v63 = vmul.f32 0.5, %v4225_v38 }
0x1ba6   :  { %v2759_v26 = vmul.f32 0.5, %v4227_v29 }
0x1ba7   :  { %v2755_v23 = vadd.f32 0.5, %v2754_v63 }
0x1ba8   :  { %v2760_v20 = vadd.f32 0.5, %v2759_v26 }
0x1ba9   :  { %v2779_v58 = vsub.f32 1.0, %v2755_v23 }
0x1baa   :  { %v2765_v22 = vmul.f32 %v2763_v39, %v2760_v20 }
0x1bab   :  { %v2783_v19 = vmul.f32 %v2781_v9, %v2779_v58 }
0x1bac   :  { %v2767_v56 = vrot.slane %v2765_v22, 5 }
0x1bae   :  { %2768 = vrot.lane.b32.xlu0 %v2767_v56, %s4287_s24 }
0x1bb2   :  { %2886 = vrot.lane.b32.xlu0 %v5176_v53, %s4285_s20 }
0x1c20   :  { %v2769_v43 = vpop.permute.xlu0 %2768 }
0x1c21   :  { %v2771_v45 = vmul.f32 %v4911_v62, %v2769_v43  ;;  %v5359_v62 = vld [vmem:[#allocation9_spill] sm:$0xff] }
0x1c23   :  { %v2773_v28 = vrot.slane %v2771_v45, 3 }
0x1c25   :  { %v2775_v59 = vadd.f32 %v2773_v28, %v4356_v40  ;;  %v5358_v40 = vld [vmem:[#allocation8_spill] sm:$0xff] }
0x1c27   :  { %v2776_v11 = vadd.f32 %v4915_v61, %v2775_v59  ;;  %v5360_v61 = vld [vmem:[#allocation10_spill] sm:$0xff] }
0x1c29   :  { %4228 = vtanh.f32 %v2776_v11 }
0x1c33   :  { %v4229_v49 = vpop.eup %4228 }
0x1c34   :  { %v2778_v7 = vmul.f32 %v4229_v49, %v2755_v23 }
0x1c36   :  { %v2784_v36 = vadd.f32 %v2783_v19, %v2778_v7 }
0x1c38   :  { %v2794_v15 = vrot.slane %v2784_v36, 5 }
0x1c3a   :  { %3512 = vmatmul.mubr.msk.f32.vlgmr.msra.gmra.mrb[16].mxu1 %vm140_vm2, %v2794_v15 }
0x1c3b   :  { %4032 = vmatpush1.bf16.msra.mxu1 %v5087_v8  ;;  %v5361_v8 = vld [vmem:[#allocation11_spill] sm:$0xff] }
0x1c3c   :  { %4034 = vmatprep.subr.bf16.mxu1 %v5089_v17  ;;  %v5362_v17 = vld [vmem:[#allocation12_spill] sm:$0xff] }
0x1c3f   :  { %4036 = vmatpush1.bf16.msra.mxu1 %v5093_v41  ;;  %v5363_v41 = vld [vmem:[#allocation13_spill] sm:$0xff] }
0x1c40   :  { %4038 = vmatprep.subr.bf16.mxu1 %v5096_v1  ;;  %v5364_v1 = vld [vmem:[#allocation14_spill] sm:$0xff] }
0x1c43   :  { %4040 = vmatpush1.bf16.msra.mxu1 %v5099_v27  ;;  %v5365_v27 = vld [vmem:[#allocation15_spill] sm:$0xff] }
0x1c44   :  { %4042 = vmatprep.subr.bf16.mxu1 %v5102_v35  ;;  %v2877_v35 = vpop.permute.xlu1 %2876 }
0x1c47   :  { %4044 = vmatpush1.bf16.msra.mxu1 %v5105_v5 }
0x1c48   :  { %4046 = vmatprep.subr.bf16.mxu1 %v5108_v14 }
0x1c4b   :  { %4048 = vmatpush1.bf16.msra.mxu1 %v5111_v18 }
0x1c4c   :  { %4050 = vmatprep.subr.bf16.mxu1 %v5114_v44  ;;  %v5366_v44 = vld [vmem:[#allocation5_spill] sm:$0xff] }
0x1c4f   :  { %4052 = vmatpush1.bf16.msra.mxu1 %v5117_v42 }
0x1c50   :  { %4054 = vmatprep.subr.bf16.mxu1 %v5120_v51 }
0x1c53   :  { %4056 = vmatpush1.bf16.msra.mxu1 %v5123_v16 }
0x1c54   :  { %4058 = vmatprep.subr.bf16.mxu1 %v5126_v25 }
0x1c57   :  { %4060 = vmatpush1.bf16.msra.mxu1 %v5358_v40 }
0x1c58   :  { %4062 = vmatprep.subr.bf16.mxu1 %v5359_v62 }
0x1c5b   :  { %4064 = vmatpush1.bf16.msra.mxu1 %v5360_v61 }
0x1c5c   :  { %4066 = vmatprep.subr.bf16.mxu1 %v5138_v4 }
0x1c5f   :  { %4068 = vmatpush1.bf16.msra.mxu1 %v5361_v8 }
0x1c60   :  { %4070 = vmatprep.subr.bf16.mxu1 %v5362_v17 }
0x1c63   :  { %4072 = vmatpush1.bf16.msra.mxu1 %v5147_v46  ;;  %v2887_v46 = vpop.permute.xlu0 %2886 }
0x1c64   :  { %4074 = vmatprep.subr.bf16.mxu1 %v5150_v48 }
0x1c67   :  { %4076 = vmatpush1.bf16.msra.mxu1 %v5363_v41 }
0x1c68   :  { %4078 = vmatprep.subr.bf16.mxu1 %v5364_v1 }
0x1c6b   :  { %4080 = vmatpush1.bf16.msra.mxu1 %v5365_v27 }
0x1d0d   :  { %v2863_v5 = vpop.f32.mrb[16].mxu1 }
0x1d0e   :  { %v2879_v14 = vadd.f32 %v2877_v35, %v2863_v5  ;;  %v3513_v18 = vpop.f32.mrb[17].mxu1  ;;  %v2868_v50 = vadd.f32 %v2867_v0, %v2863_v5 }
0x1d10   :  { %v2880_v42 = vadd.f32 %v2879_v14, %v5366_v44  ;;  %v2869_v30 = vadd.f32 %v4971_v60, %v2868_v50 }
0x1d12   :  { %v2881_v51 = vmul.f32 0.5, %v2880_v42  ;;  %v2870_v3 = vmul.f32 0.5, %v2869_v30 }
0x1d14   :  { %4230 = vtanh.f32 %v2881_v51 }
0x1d1e   :  { %v4231_v16 = vpop.eup %4230 }
0x1d1f   :  { %v2883_v25 = vmul.f32 0.5, %v4231_v16 }
0x1d21   :  { %v2884_v4 = vadd.f32 0.5, %v2883_v25 }
0x1d23   :  { %v2889_v32 = vmul.f32 %v2887_v46, %v2884_v4 }
0x1d25   :  { %2891 = vrot.lane.b32.xlu1 %v2889_v32, %s4290_s0 }
0x1d97   :  { %v2892_v48 = vpop.permute.xlu1 %2891 }
0x1d98   :  { %v2894_v37 = vmul.f32 %v5367_v2, %v2892_v48 }
0x1d9a   :  { %2896 = vrot.lane.b32.xlu0 %v2894_v37, %s4291_s25 }
0x1d9e   :  { %2910 = vrot.lane.b32.xlu0 %v2794_v15, %s4285_s20 }
0x1da2   :  { %2917 = vrot.lane.b32.xlu0 %v5203_v34, %s4285_s20 }
0x1e0c   :  { %v2897_v31 = vpop.permute.xlu0 %2896 }
0x1e0d   :  { %v2899_v52 = vadd.f32 %v2897_v31, %v2863_v5 }
0x1e0f   :  { %v2900_v13 = vadd.f32 %v2899_v52, %v5368_v6 }
0x1e10   :  { %v2911_v26 = vpop.permute.xlu0 %2910 }
0x1e11   :  { %4232 = vtanh.f32 %v2900_v13 }
0x1e12   :  { %4234 = vtanh.f32 %v2870_v3 }
0x1e14   :  { %v2918_v58 = vpop.permute.xlu0 %2917 }
0x1e1b   :  { %v4233_v12 = vpop.eup %4232 }
0x1e1c   :  { %2903 = vrot.lane.b32.xlu1 %v4233_v12, %s4292_s26  ;;  %v4235_v10 = vpop.eup %4234 }
0x1e1d   :  { %v2872_v38 = vmul.f32 0.5, %v4235_v10 }
0x1e1f   :  { %v2873_v29 = vadd.f32 0.5, %v2872_v38 }
0x1e20   :  { %2913 = vrot.lane.b32.xlu1 %v5206_v24, %s4293_s29 }
0x1e21   :  { %v2907_v63 = vsub.f32 1.0, %v2873_v29 }
0x1e23   :  { %v2908_v24 = vmul.f32 %v2907_v63, %v5176_v53 }
0x1e24   :  { %3071 = vrot.lane.b32.xlu1 %v5203_v34, %s4287_s24 }
0x1e8e   :  { %v2904_v23 = vpop.permute.xlu1 %2903 }
0x1e8f   :  { %v2906_v20 = vmul.f32 %v2904_v23, %v2873_v29 }
0x1e91   :  { %v2909_v39 = vadd.f32 %v2908_v24, %v2906_v20 }
0x1e92   :  { %v2914_v34 = vpop.permute.xlu1 %2913 }
0x1e93   :  { %v2920_v9 = vsel %vm374_vm3, %v2909_v39, %v2911_v26  ;;  %v2922_v21 = vsel %vm374_vm3, %v2914_v34, %v2918_v58 }
0x1e94   :  { %v2921_v60 = vsel %vm376_vm4, %v2920_v9, %v2914_v34  ;;  %3195 = vmatprep.mubr.msk.f32.mxu1 %vm376_vm4, %v2922_v21 }
0x1e95   :  { %3043 = vmatmul.mubr.f32.vlgmr.msra.gmra.mrb[18].mxu1 %v2921_v60 }
0x1e96   :  { %v3072_v49 = vpop.permute.xlu1 %3071 }
0x1f68   :  { %v3044_v22 = vpop.f32.mrb[18].mxu1 }
0x1f69   :  { %v3054_v19 = vadd.f32 %v3044_v22, %v4533_v54  ;;  %v3046_v56 = vpop.f32.mrb[19].mxu1  ;;  %v3049_v36 = vadd.f32 %v4996_v47, %v3044_v22 }
0x1f6a   :  { %v3064_v43 = vadd.f32 %v3046_v56, %v4535_v57  ;;  %v3059_v54 = vadd.f32 %v4999_v55, %v3046_v56 }
0x1f6b   :  { %v3055_v45 = vmul.f32 0.5, %v3054_v19  ;;  %v3050_v15 = vmul.f32 0.5, %v3049_v36 }
0x1f6c   :  { %4236 = vtanh.f32 %v3064_v43  ;;  %v3060_v40 = vmul.f32 0.5, %v3059_v54 }
0x1f6d   :  { %4238 = vtanh.f32 %v3055_v45 }
0x1f6e   :  { %4240 = vtanh.f32 %v3050_v15 }
0x1f6f   :  { %4242 = vtanh.f32 %v3060_v40 }
0x1f76   :  { %v4237_v53 = vpop.eup %4236 }
0x1f77   :  { %3067 = vrot.lane.b32.xlu0 %v4237_v53, %s4287_s24  ;;  %v4239_v28 = vpop.eup %4238 }
0x1f78   :  { %v3057_v59 = vmul.f32 0.5, %v4239_v28  ;;  %v4241_v57 = vpop.eup %4240 }
0x1f79   :  { %v3052_v62 = vmul.f32 0.5, %v4241_v57  ;;  %v4243_v27 = vpop.eup %4242 }
0x1f7a   :  { %v3058_v11 = vadd.f32 0.5, %v3057_v59  ;;  %v3062_v35 = vmul.f32 0.5, %v4243_v27 }
0x1f7b   :  { %v3053_v8 = vadd.f32 0.5, %v3052_v62 }
0x1f7c   :  { %v3074_v7 = vmul.f32 %v3072_v49, %v3058_v11  ;;  %v3063_v5 = vadd.f32 0.5, %v3062_v35 }
0x1f7e   :  { %3076 = vrot.lane.b32.xlu1 %v3074_v7, %s4287_s24 }
0x1fe9   :  { %v3068_v61 = vpop.permute.xlu0 %3067 }
0x1fea   :  { %v3070_v17 = vmul.f32 %v3068_v61, %v3053_v8 }
0x1ff0   :  { %v3077_v41 = vpop.permute.xlu1 %3076 }
0x1ff1   :  { %v3079_v1 = vadd.f32 %v3077_v41, %v3070_v17 }
0x1ff3   :  { %4244 = vtanh.f32 %v3079_v1 }
0x1ffd   :  { %v4245_v14 = vpop.eup %4244 }
0x1ffe   :  { %v3081_v18 = vmul.f32 %v4245_v14, %v3063_v5 }
0x2000   :  { %3531 = vmatmul.mubr.msk.f32.vlgmr.msra.gmra.mrb[28].mxu0 %vm140_vm2, %v3081_v18 }
0x20d3   :  { %v3159_v47 = vpop.f32.mrb[28].mxu0 }
0x20d4   :  { %v3160_v55 = vadd.f32 %v5036_v33, %v3159_v47  ;;  %v3532_v44 = vpop.f32.mrb[29].mxu0 }
0x20d6   :  { %v3163_v42 = vmul.f32 0.5, %v3160_v55 }
0x20d8   :  { %4246 = vtanh.f32 %v3163_v42 }
0x20e2   :  { %v4247_v51 = vpop.eup %4246 }
0x20e3   :  { %v3165_v16 = vmul.f32 0.5, %v4247_v51 }
0x20e5   :  { %v3166_v25 = vadd.f32 0.5, %v3165_v16 }
0x20e7   :  { %3167 = vst.msk [vmem:[%s5305_s2 + $0x5] sm:$0x1] %vm626_vm5, %v3166_v25 }
0x20e8   :  { %3172 = vsyncpa [#allocation3], 1 }

</bundles_post_ra>
